<compile_context>
chip_gen: v6e
topology: v6e:2x2x1
jax: 0.10.0
libtpu: 0.0.40
codegen_flags: <defaults>
</compile_context>

<pallas_src>
import functools

import jax
import jax.numpy as jnp
from jax.experimental import pallas as pl
from jax.experimental.pallas import tpu as pltpu


_LANES = 128
_ROW_PAD = 8   # zero row padding so shifted tap slices stay in bounds


def _round_up(v, m):
    return (v + m - 1) // m * m


# ------------------------- fused DoubleConv kernel ---------------------------
def _double_conv_kernel(x_ref, w1_ref, s1_ref, b1_ref, w2_ref, s2_ref, b2_ref,
                        o_ref, mid_ref, *, H, W, Cp):
    """Fused (3x3 valid conv + folded BN + ReLU) x 2 on one NHWC image.

    x_ref   : (1, H*W + _ROW_PAD, Cin)   flattened NHWC input (zero row pad)
    w1_ref  : (9, Cin, Cp)               tap-major conv1 weights (Cp lane-padded)
    w2_ref  : (9, Cp,  Cp)               tap-major conv2 weights
    s*_ref  : (1, Cp) f32                folded BN scale
    b*_ref  : (1, Cp) f32                folded BN bias (includes conv bias)
    o_ref   : (1, (H-4)*W, Cp)           flat output (cols j >= W-4 are garbage)
    mid_ref : ((H-2)*W + _ROW_PAD, Cp)   VMEM scratch for the intermediate act
    """
    h1, h2 = H - 2, H - 4
    m1, m2 = h1 * W, h2 * W

    # Hoisted (single) loads of the epilogue scale/bias broadcasts.
    s1 = s1_ref[...]
    b1 = b1_ref[...]
    s2 = s2_ref[...]
    b2 = b2_ref[...]

    # ---- conv1: 9 taps, each one lane-dense (m1, Cin) x (Cin, Cp) matmul ----
    acc1 = jnp.zeros((m1, Cp), jnp.float32)
    for dy in range(3):
        for dx in range(3):
            off = dy * W + dx
            acc1 += jnp.dot(x_ref[0, off:off + m1, :], w1_ref[dy * 3 + dx],
                            preferred_element_type=jnp.float32)

    # f32 epilogue: folded BN + ReLU, single store into VMEM scratch.
    mid = jnp.maximum(acc1 * s1 + b1, 0.0)
    mid_ref[0:m1, :] = mid.astype(mid_ref.dtype)
    mid_ref[m1:, :] = jnp.zeros((_ROW_PAD, Cp), mid_ref.dtype)

    # ---- conv2: 9 taps, each one (m2, Cp) x (Cp, Cp) matmul ----
    acc2 = jnp.zeros((m2, Cp), jnp.float32)
    for dy in range(3):
        for dx in range(3):
            off = dy * W + dx
            acc2 += jnp.dot(mid_ref[off:off + m2, :], w2_ref[dy * 3 + dx],
                            preferred_element_type=jnp.float32)

    # f32 epilogue + single lane-dense store of the whole tile.
    o_ref[0] = jnp.maximum(acc2 * s2 + b2, 0.0).astype(o_ref.dtype)


# ------------------------- parameter preparation -----------------------------
def prepare_double_conv_params(w1, b1, bn1, w2, b2, bn2, *, eps=1e-5,
                               compute_dtype=jnp.bfloat16):
    """Fold BatchNorm (running stats, eval mode) and pad Cout to 128 lanes.

    w1: (3, 3, Cin, Cout) HWIO   (from PyTorch OIHW: w.transpose(2, 3, 1, 0))
    w2: (3, 3, Cout, Cout) HWIO
    b1, b2: (Cout,) conv biases
    bn1, bn2: dicts with 'gamma', 'beta', 'mean', 'var' of shape (Cout,)
    """
    cin, cout = w1.shape[2], w1.shape[3]
    cp = _round_up(cout, _LANES)
    pad_c = cp - cout

    def fold(conv_b, bn):
        s = bn["gamma"] / jnp.sqrt(bn["var"] + eps)
        return s, bn["beta"] + s * (conv_b - bn["mean"])

    s1, fb1 = fold(b1, bn1)
    s2, fb2 = fold(b2, bn2)

    return {
        "cin": cin, "cout": cout, "cp": cp, "compute_dtype": compute_dtype,
        "w1": jnp.pad(w1.reshape(9, cin, cout),
                      ((0, 0), (0, 0), (0, pad_c))).astype(compute_dtype),
        "w2": jnp.pad(w2.reshape(9, cout, cout),
                      ((0, 0), (0, pad_c), (0, pad_c))).astype(compute_dtype),
        "s1": jnp.pad(s1, (0, pad_c)).reshape(1, cp).astype(jnp.float32),
        "b1": jnp.pad(fb1, (0, pad_c)).reshape(1, cp).astype(jnp.float32),
        "s2": jnp.pad(s2, (0, pad_c)).reshape(1, cp).astype(jnp.float32),
        "b2": jnp.pad(fb2, (0, pad_c)).reshape(1, cp).astype(jnp.float32),
    }


# ------------------------------ forward wrapper -------------------------------
def double_conv_forward(params, x):
    """x: (N, Cin, H, W) NCHW (PyTorch layout) -> (N, Cout, H-4, W-4) NCHW."""
    n, cin, h, w = x.shape
    assert cin == params["cin"], (cin, params["cin"])
    cp, cout = params["cp"], params["cout"]
    cdt = params["compute_dtype"]
    h2 = h - 4
    m1, m2 = (h - 2) * w, h2 * w
    hwp = h * w + _ROW_PAD

    # NCHW -> flattened NHWC rows (+ zero row pad), single cast for the MXU.
    xf = jnp.transpose(x, (0, 2, 3, 1)).reshape(n, h * w, cin)
    xf = jnp.pad(xf, ((0, 0), (0, _ROW_PAD), (0, 0))).astype(cdt)

    kernel = functools.partial(_double_conv_kernel, H=h, W=w, Cp=cp)

    flops = 2 * n * 9 * (m1 * cin * cp + m2 * cp * cp)
    bytes_accessed = (xf.size * xf.dtype.itemsize
                      + params["w1"].size * params["w1"].dtype.itemsize
                      + params["w2"].size * params["w2"].dtype.itemsize
                      + 4 * cp * 4
                      + n * m2 * cp * 4)

    out_flat = pl.pallas_call(
        kernel,
        out_shape=jax.ShapeDtypeStruct((n, m2, cp), jnp.float32),
        grid=(n,),
        in_specs=[
            pl.BlockSpec((1, hwp, cin), lambda i: (i, 0, 0)),
            pl.BlockSpec((9, cin, cp), lambda i: (0, 0, 0)),
            pl.BlockSpec((1, cp), lambda i: (0, 0)),
            pl.BlockSpec((1, cp), lambda i: (0, 0)),
            pl.BlockSpec((9, cp, cp), lambda i: (0, 0, 0)),
            pl.BlockSpec((1, cp), lambda i: (0, 0)),
            pl.BlockSpec((1, cp), lambda i: (0, 0)),
        ],
        out_specs=pl.BlockSpec((1, m2, cp), lambda i: (i, 0, 0)),
        scratch_shapes=[pltpu.VMEM((m1 + _ROW_PAD, cp), cdt)],
        compiler_params=pltpu.CompilerParams(
            dimension_semantics=("parallel",)),
        cost_estimate=pl.CostEstimate(flops=flops, transcendentals=0,
                                      bytes_accessed=bytes_accessed),
    )(xf, params["w1"], params["s1"], params["b1"],
      params["w2"], params["s2"], params["b2"])

    # Drop flat-layout garbage columns (j >= W-4) and lane padding, back to NCHW.
    y = out_flat.reshape(n, h2, w, cp)[:, :, :w - 4, :cout]
    return jnp.transpose(y, (0, 3, 1, 2))


# ------------------------------ pure-XLA reference ----------------------------
def _reference_double_conv(x, w1, b1, bn1, w2, b2, bn2, eps=1e-5):
    def conv_bn_relu(h, wgt, b, bn):
        y = jax.lax.conv_general_dilated(
            h, wgt, window_strides=(1, 1), padding="VALID",
            dimension_numbers=("NCHW", "HWIO", "NCHW"))
        y = y + b[None, :, None, None]
        s = bn["gamma"] / jnp.sqrt(bn["var"] + eps)
        y = (y - bn["mean"][None, :, None, None]) * s[None, :, None, None] \
            + bn["beta"][None, :, None, None]
        return jnp.maximum(y, 0.0)
    return conv_bn_relu(conv_bn_relu(x, w1, b1, bn1), w2, b2, bn2)


# ------------------------------------ demo ------------------------------------
if __name__ == "__main__":
    key = jax.random.PRNGKey(0)
    k = jax.random.split(key, 5)

    N, Cin, H, W = 2, 4, 16, 16
    Cout = 8

    x = jax.random.normal(k[0], (N, Cin, H, W), jnp.float32)
    w1 = 0.1 * jax.random.normal(k[1], (3, 3, Cin, Cout), jnp.float32)    # HWIO
    b1 = 0.05 * jax.random.normal(k[2], (Cout,), jnp.float32)
    w2 = 0.1 * jax.random.normal(k[3], (3, 3, Cout, Cout), jnp.float32)   # HWIO
    b2 = 0.05 * jax.random.normal(k[4], (Cout,), jnp.float32)
    bn1 = dict(gamma=jnp.ones((Cout,), jnp.float32),
               beta=jnp.zeros((Cout,), jnp.float32),
               mean=jnp.zeros((Cout,), jnp.float32),
               var=jnp.ones((Cout,), jnp.float32))
    bn2 = dict(gamma=jnp.full((Cout,), 1.5, jnp.float32),
               beta=jnp.full((Cout,), 0.1, jnp.float32),
               mean=jnp.full((Cout,), 0.05, jnp.float32),
               var=jnp.full((Cout,), 0.8, jnp.float32))

    # f32 compute path: validated against a pure-XLA reference.
    params_f32 = prepare_double_conv_params(w1, b1, bn1, w2, b2, bn2,
                                            compute_dtype=jnp.float32)
    out_f32 = jax.block_until_ready(double_conv_forward(params_f32, x))
    ref = jax.block_until_ready(
        _reference_double_conv(x, w1, b1, bn1, w2, b2, bn2))
    assert out_f32.shape == (N, Cout, H - 4, W - 4), out_f32.shape
    max_err = float(jnp.max(jnp.abs(out_f32 - ref)))
    assert max_err < 1e-3, f"mismatch vs reference: {max_err}"

    # bf16 MXU path (f32 accumulation + epilogue): production configuration.
    params_bf16 = prepare_double_conv_params(w1, b1, bn1, w2, b2, bn2,
                                             compute_dtype=jnp.bfloat16)
    fwd = jax.jit(lambda xx: double_conv_forward(params_bf16, xx))
    out = jax.block_until_ready(fwd(x))
    assert out.shape == (N, Cout, H - 4, W - 4), out.shape
    assert bool(jnp.all(jnp.isfinite(out)))

    print("KERNEL_OK")
</pallas_src>

<mosaic_0001>
module attributes {stable_mosaic.version = 11 : i64} {
  func.func @_double_conv_kernel(%arg0: i32, %arg1: memref<1x264x4xf32, #tpu.memory_space<vmem>>, %arg2: memref<9x4x128xf32, #tpu.memory_space<vmem>>, %arg3: memref<1x128xf32, #tpu.memory_space<vmem>>, %arg4: memref<1x128xf32, #tpu.memory_space<vmem>>, %arg5: memref<9x128x128xf32, #tpu.memory_space<vmem>>, %arg6: memref<1x128xf32, #tpu.memory_space<vmem>>, %arg7: memref<1x128xf32, #tpu.memory_space<vmem>>, %arg8: memref<1x192x128xf32, #tpu.memory_space<vmem>>, %arg9: memref<232x128xf32, #tpu.memory_space<vmem>>) attributes {dimension_semantics = [#tpu.dimension_semantics<parallel>], iteration_bounds = array<i64: 2>, scalar_prefetch = 0 : i64, scratch_operands = 1 : i64, tpu.core_type = #tpu.core_type<tc>, window_params = [{transform_indices = @transform_0, window_bounds = array<i64: 1, 264, 4>}, {pipeline_mode = #tpu.pipeline_mode<synchronous>, transform_indices = @transform_1, window_bounds = array<i64: 9, 4, 128>}, {pipeline_mode = #tpu.pipeline_mode<synchronous>, transform_indices = @transform_2, window_bounds = array<i64: 1, 128>}, {pipeline_mode = #tpu.pipeline_mode<synchronous>, transform_indices = @transform_3, window_bounds = array<i64: 1, 128>}, {pipeline_mode = #tpu.pipeline_mode<synchronous>, transform_indices = @transform_4, window_bounds = array<i64: 9, 128, 128>}, {pipeline_mode = #tpu.pipeline_mode<synchronous>, transform_indices = @transform_5, window_bounds = array<i64: 1, 128>}, {pipeline_mode = #tpu.pipeline_mode<synchronous>, transform_indices = @transform_6, window_bounds = array<i64: 1, 128>}, {transform_indices = @transform_7, window_bounds = array<i64: 1, 192, 128>}]} {
    %c0 = arith.constant 0 : index
    %c0_0 = arith.constant 0 : index
    %0 = vector.load %arg3[%c0, %c0_0] : memref<1x128xf32, #tpu.memory_space<vmem>>, vector<1x128xf32>
    %c0_1 = arith.constant 0 : index
    %c0_2 = arith.constant 0 : index
    %1 = vector.load %arg4[%c0_1, %c0_2] : memref<1x128xf32, #tpu.memory_space<vmem>>, vector<1x128xf32>
    %c0_3 = arith.constant 0 : index
    %c0_4 = arith.constant 0 : index
    %2 = vector.load %arg6[%c0_3, %c0_4] : memref<1x128xf32, #tpu.memory_space<vmem>>, vector<1x128xf32>
    %c0_5 = arith.constant 0 : index
    %c0_6 = arith.constant 0 : index
    %3 = vector.load %arg7[%c0_5, %c0_6] : memref<1x128xf32, #tpu.memory_space<vmem>>, vector<1x128xf32>
    %cst = arith.constant 0.000000e+00 : f32
    %4 = vector.broadcast %cst : f32 to vector<224x128xf32>
    %c0_7 = arith.constant 0 : index
    %c0_8 = arith.constant 0 : index
    %c0_9 = arith.constant 0 : index
    %5 = vector.load %arg1[%c0_7, %c0_8, %c0_9] : memref<1x264x4xf32, #tpu.memory_space<vmem>>, vector<1x224x4xf32>
    %6 = vector.shape_cast %5 : vector<1x224x4xf32> to vector<224x4xf32>
    %c0_10 = arith.constant 0 : index
    %c0_11 = arith.constant 0 : index
    %c0_12 = arith.constant 0 : index
    %7 = vector.load %arg2[%c0_10, %c0_11, %c0_12] : memref<9x4x128xf32, #tpu.memory_space<vmem>>, vector<1x4x128xf32>
    %8 = vector.shape_cast %7 : vector<1x4x128xf32> to vector<4x128xf32>
    %cst_13 = arith.constant dense<0.000000e+00> : vector<224x128xf32>
    %9 = tpu.matmul %6, %8, %cst_13 {dimension_numbers = #tpu.dot_dimension_numbers<[1], [0], [0], [1], [0, 0, 1, 1], [], []>} : vector<224x4xf32>, vector<4x128xf32>, vector<224x128xf32> -> vector<224x128xf32>
    %10 = arith.addf %4, %9 : vector<224x128xf32>
    %c0_14 = arith.constant 0 : index
    %c1 = arith.constant 1 : index
    %c0_15 = arith.constant 0 : index
    %11 = vector.load %arg1[%c0_14, %c1, %c0_15] : memref<1x264x4xf32, #tpu.memory_space<vmem>>, vector<1x224x4xf32>
    %12 = vector.shape_cast %11 : vector<1x224x4xf32> to vector<224x4xf32>
    %c1_16 = arith.constant 1 : index
    %c0_17 = arith.constant 0 : index
    %c0_18 = arith.constant 0 : index
    %13 = vector.load %arg2[%c1_16, %c0_17, %c0_18] : memref<9x4x128xf32, #tpu.memory_space<vmem>>, vector<1x4x128xf32>
    %14 = vector.shape_cast %13 : vector<1x4x128xf32> to vector<4x128xf32>
    %cst_19 = arith.constant dense<0.000000e+00> : vector<224x128xf32>
    %15 = tpu.matmul %12, %14, %cst_19 {dimension_numbers = #tpu.dot_dimension_numbers<[1], [0], [0], [1], [0, 0, 1, 1], [], []>} : vector<224x4xf32>, vector<4x128xf32>, vector<224x128xf32> -> vector<224x128xf32>
    %16 = arith.addf %10, %15 : vector<224x128xf32>
    %c0_20 = arith.constant 0 : index
    %c2 = arith.constant 2 : index
    %c0_21 = arith.constant 0 : index
    %17 = vector.load %arg1[%c0_20, %c2, %c0_21] : memref<1x264x4xf32, #tpu.memory_space<vmem>>, vector<1x224x4xf32>
    %18 = vector.shape_cast %17 : vector<1x224x4xf32> to vector<224x4xf32>
    %c2_22 = arith.constant 2 : index
    %c0_23 = arith.constant 0 : index
    %c0_24 = arith.constant 0 : index
    %19 = vector.load %arg2[%c2_22, %c0_23, %c0_24] : memref<9x4x128xf32, #tpu.memory_space<vmem>>, vector<1x4x128xf32>
    %20 = vector.shape_cast %19 : vector<1x4x128xf32> to vector<4x128xf32>
    %cst_25 = arith.constant dense<0.000000e+00> : vector<224x128xf32>
    %21 = tpu.matmul %18, %20, %cst_25 {dimension_numbers = #tpu.dot_dimension_numbers<[1], [0], [0], [1], [0, 0, 1, 1], [], []>} : vector<224x4xf32>, vector<4x128xf32>, vector<224x128xf32> -> vector<224x128xf32>
    %22 = arith.addf %16, %21 : vector<224x128xf32>
    %c0_26 = arith.constant 0 : index
    %c16 = arith.constant 16 : index
    %c0_27 = arith.constant 0 : index
    %23 = vector.load %arg1[%c0_26, %c16, %c0_27] : memref<1x264x4xf32, #tpu.memory_space<vmem>>, vector<1x224x4xf32>
    %24 = vector.shape_cast %23 : vector<1x224x4xf32> to vector<224x4xf32>
    %c3 = arith.constant 3 : index
    %c0_28 = arith.constant 0 : index
    %c0_29 = arith.constant 0 : index
    %25 = vector.load %arg2[%c3, %c0_28, %c0_29] : memref<9x4x128xf32, #tpu.memory_space<vmem>>, vector<1x4x128xf32>
    %26 = vector.shape_cast %25 : vector<1x4x128xf32> to vector<4x128xf32>
    %cst_30 = arith.constant dense<0.000000e+00> : vector<224x128xf32>
    %27 = tpu.matmul %24, %26, %cst_30 {dimension_numbers = #tpu.dot_dimension_numbers<[1], [0], [0], [1], [0, 0, 1, 1], [], []>} : vector<224x4xf32>, vector<4x128xf32>, vector<224x128xf32> -> vector<224x128xf32>
    %28 = arith.addf %22, %27 : vector<224x128xf32>
    %c0_31 = arith.constant 0 : index
    %c17 = arith.constant 17 : index
    %c0_32 = arith.constant 0 : index
    %29 = vector.load %arg1[%c0_31, %c17, %c0_32] : memref<1x264x4xf32, #tpu.memory_space<vmem>>, vector<1x224x4xf32>
    %30 = vector.shape_cast %29 : vector<1x224x4xf32> to vector<224x4xf32>
    %c4 = arith.constant 4 : index
    %c0_33 = arith.constant 0 : index
    %c0_34 = arith.constant 0 : index
    %31 = vector.load %arg2[%c4, %c0_33, %c0_34] : memref<9x4x128xf32, #tpu.memory_space<vmem>>, vector<1x4x128xf32>
    %32 = vector.shape_cast %31 : vector<1x4x128xf32> to vector<4x128xf32>
    %cst_35 = arith.constant dense<0.000000e+00> : vector<224x128xf32>
    %33 = tpu.matmul %30, %32, %cst_35 {dimension_numbers = #tpu.dot_dimension_numbers<[1], [0], [0], [1], [0, 0, 1, 1], [], []>} : vector<224x4xf32>, vector<4x128xf32>, vector<224x128xf32> -> vector<224x128xf32>
    %34 = arith.addf %28, %33 : vector<224x128xf32>
    %c0_36 = arith.constant 0 : index
    %c18 = arith.constant 18 : index
    %c0_37 = arith.constant 0 : index
    %35 = vector.load %arg1[%c0_36, %c18, %c0_37] : memref<1x264x4xf32, #tpu.memory_space<vmem>>, vector<1x224x4xf32>
    %36 = vector.shape_cast %35 : vector<1x224x4xf32> to vector<224x4xf32>
    %c5 = arith.constant 5 : index
    %c0_38 = arith.constant 0 : index
    %c0_39 = arith.constant 0 : index
    %37 = vector.load %arg2[%c5, %c0_38, %c0_39] : memref<9x4x128xf32, #tpu.memory_space<vmem>>, vector<1x4x128xf32>
    %38 = vector.shape_cast %37 : vector<1x4x128xf32> to vector<4x128xf32>
    %cst_40 = arith.constant dense<0.000000e+00> : vector<224x128xf32>
    %39 = tpu.matmul %36, %38, %cst_40 {dimension_numbers = #tpu.dot_dimension_numbers<[1], [0], [0], [1], [0, 0, 1, 1], [], []>} : vector<224x4xf32>, vector<4x128xf32>, vector<224x128xf32> -> vector<224x128xf32>
    %40 = arith.addf %34, %39 : vector<224x128xf32>
    %c0_41 = arith.constant 0 : index
    %c32 = arith.constant 32 : index
    %c0_42 = arith.constant 0 : index
    %41 = vector.load %arg1[%c0_41, %c32, %c0_42] : memref<1x264x4xf32, #tpu.memory_space<vmem>>, vector<1x224x4xf32>
    %42 = vector.shape_cast %41 : vector<1x224x4xf32> to vector<224x4xf32>
    %c6 = arith.constant 6 : index
    %c0_43 = arith.constant 0 : index
    %c0_44 = arith.constant 0 : index
    %43 = vector.load %arg2[%c6, %c0_43, %c0_44] : memref<9x4x128xf32, #tpu.memory_space<vmem>>, vector<1x4x128xf32>
    %44 = vector.shape_cast %43 : vector<1x4x128xf32> to vector<4x128xf32>
    %cst_45 = arith.constant dense<0.000000e+00> : vector<224x128xf32>
    %45 = tpu.matmul %42, %44, %cst_45 {dimension_numbers = #tpu.dot_dimension_numbers<[1], [0], [0], [1], [0, 0, 1, 1], [], []>} : vector<224x4xf32>, vector<4x128xf32>, vector<224x128xf32> -> vector<224x128xf32>
    %46 = arith.addf %40, %45 : vector<224x128xf32>
    %c0_46 = arith.constant 0 : index
    %c33 = arith.constant 33 : index
    %c0_47 = arith.constant 0 : index
    %47 = vector.load %arg1[%c0_46, %c33, %c0_47] : memref<1x264x4xf32, #tpu.memory_space<vmem>>, vector<1x224x4xf32>
    %48 = vector.shape_cast %47 : vector<1x224x4xf32> to vector<224x4xf32>
    %c7 = arith.constant 7 : index
    %c0_48 = arith.constant 0 : index
    %c0_49 = arith.constant 0 : index
    %49 = vector.load %arg2[%c7, %c0_48, %c0_49] : memref<9x4x128xf32, #tpu.memory_space<vmem>>, vector<1x4x128xf32>
    %50 = vector.shape_cast %49 : vector<1x4x128xf32> to vector<4x128xf32>
    %cst_50 = arith.constant dense<0.000000e+00> : vector<224x128xf32>
    %51 = tpu.matmul %48, %50, %cst_50 {dimension_numbers = #tpu.dot_dimension_numbers<[1], [0], [0], [1], [0, 0, 1, 1], [], []>} : vector<224x4xf32>, vector<4x128xf32>, vector<224x128xf32> -> vector<224x128xf32>
    %52 = arith.addf %46, %51 : vector<224x128xf32>
    %c0_51 = arith.constant 0 : index
    %c34 = arith.constant 34 : index
    %c0_52 = arith.constant 0 : index
    %53 = vector.load %arg1[%c0_51, %c34, %c0_52] : memref<1x264x4xf32, #tpu.memory_space<vmem>>, vector<1x224x4xf32>
    %54 = vector.shape_cast %53 : vector<1x224x4xf32> to vector<224x4xf32>
    %c8 = arith.constant 8 : index
    %c0_53 = arith.constant 0 : index
    %c0_54 = arith.constant 0 : index
    %55 = vector.load %arg2[%c8, %c0_53, %c0_54] : memref<9x4x128xf32, #tpu.memory_space<vmem>>, vector<1x4x128xf32>
    %56 = vector.shape_cast %55 : vector<1x4x128xf32> to vector<4x128xf32>
    %cst_55 = arith.constant dense<0.000000e+00> : vector<224x128xf32>
    %57 = tpu.matmul %54, %56, %cst_55 {dimension_numbers = #tpu.dot_dimension_numbers<[1], [0], [0], [1], [0, 0, 1, 1], [], []>} : vector<224x4xf32>, vector<4x128xf32>, vector<224x128xf32> -> vector<224x128xf32>
    %58 = arith.addf %52, %57 : vector<224x128xf32>
    %59 = vector.broadcast %0 : vector<1x128xf32> to vector<224x128xf32>
    %60 = arith.mulf %58, %59 : vector<224x128xf32>
    %61 = vector.broadcast %1 : vector<1x128xf32> to vector<224x128xf32>
    %62 = arith.addf %60, %61 : vector<224x128xf32>
    %cst_56 = arith.constant 0.000000e+00 : f32
    %63 = vector.broadcast %cst_56 : f32 to vector<224x128xf32>
    %64 = arith.maximumf %62, %63 : vector<224x128xf32>
    %c0_57 = arith.constant 0 : index
    %c0_58 = arith.constant 0 : index
    %65 = vector.load %arg9[%c0_57, %c0_58] : memref<232x128xf32, #tpu.memory_space<vmem>>, vector<224x128xf32>
    tpu.vector_store %arg9[%c0_57, %c0_58], %64 {strides = array<i32>} : memref<232x128xf32, #tpu.memory_space<vmem>>, vector<224x128xf32>,
    %cst_59 = arith.constant 0.000000e+00 : f32
    %66 = vector.broadcast %cst_59 : f32 to vector<8x128xf32>
    %c224 = arith.constant 224 : index
    %c0_60 = arith.constant 0 : index
    %67 = vector.load %arg9[%c224, %c0_60] : memref<232x128xf32, #tpu.memory_space<vmem>>, vector<8x128xf32>
    tpu.vector_store %arg9[%c224, %c0_60], %66 {strides = array<i32>} : memref<232x128xf32, #tpu.memory_space<vmem>>, vector<8x128xf32>,
    %cst_61 = arith.constant 0.000000e+00 : f32
    %68 = vector.broadcast %cst_61 : f32 to vector<192x128xf32>
    %c0_62 = arith.constant 0 : index
    %c0_63 = arith.constant 0 : index
    %69 = vector.load %arg9[%c0_62, %c0_63] : memref<232x128xf32, #tpu.memory_space<vmem>>, vector<192x128xf32>
    %c0_64 = arith.constant 0 : index
    %c0_65 = arith.constant 0 : index
    %c0_66 = arith.constant 0 : index
    %70 = vector.load %arg5[%c0_64, %c0_65, %c0_66] : memref<9x128x128xf32, #tpu.memory_space<vmem>>, vector<1x128x128xf32>
    %71 = vector.shape_cast %70 : vector<1x128x128xf32> to vector<128x128xf32>
    %cst_67 = arith.constant dense<0.000000e+00> : vector<192x128xf32>
    %72 = tpu.matmul %69, %71, %cst_67 {dimension_numbers = #tpu.dot_dimension_numbers<[1], [0], [0], [1], [0, 0, 1, 1], [], []>} : vector<192x128xf32>, vector<128x128xf32>, vector<192x128xf32> -> vector<192x128xf32>
    %73 = arith.addf %68, %72 : vector<192x128xf32>
    %c1_68 = arith.constant 1 : index
    %c0_69 = arith.constant 0 : index
    %74 = vector.load %arg9[%c1_68, %c0_69] : memref<232x128xf32, #tpu.memory_space<vmem>>, vector<192x128xf32>
    %c1_70 = arith.constant 1 : index
    %c0_71 = arith.constant 0 : index
    %c0_72 = arith.constant 0 : index
    %75 = vector.load %arg5[%c1_70, %c0_71, %c0_72] : memref<9x128x128xf32, #tpu.memory_space<vmem>>, vector<1x128x128xf32>
    %76 = vector.shape_cast %75 : vector<1x128x128xf32> to vector<128x128xf32>
    %cst_73 = arith.constant dense<0.000000e+00> : vector<192x128xf32>
    %77 = tpu.matmul %74, %76, %cst_73 {dimension_numbers = #tpu.dot_dimension_numbers<[1], [0], [0], [1], [0, 0, 1, 1], [], []>} : vector<192x128xf32>, vector<128x128xf32>, vector<192x128xf32> -> vector<192x128xf32>
    %78 = arith.addf %73, %77 : vector<192x128xf32>
    %c2_74 = arith.constant 2 : index
    %c0_75 = arith.constant 0 : index
    %79 = vector.load %arg9[%c2_74, %c0_75] : memref<232x128xf32, #tpu.memory_space<vmem>>, vector<192x128xf32>
    %c2_76 = arith.constant 2 : index
    %c0_77 = arith.constant 0 : index
    %c0_78 = arith.constant 0 : index
    %80 = vector.load %arg5[%c2_76, %c0_77, %c0_78] : memref<9x128x128xf32, #tpu.memory_space<vmem>>, vector<1x128x128xf32>
    %81 = vector.shape_cast %80 : vector<1x128x128xf32> to vector<128x128xf32>
    %cst_79 = arith.constant dense<0.000000e+00> : vector<192x128xf32>
    %82 = tpu.matmul %79, %81, %cst_79 {dimension_numbers = #tpu.dot_dimension_numbers<[1], [0], [0], [1], [0, 0, 1, 1], [], []>} : vector<192x128xf32>, vector<128x128xf32>, vector<192x128xf32> -> vector<192x128xf32>
    %83 = arith.addf %78, %82 : vector<192x128xf32>
    %c16_80 = arith.constant 16 : index
    %c0_81 = arith.constant 0 : index
    %84 = vector.load %arg9[%c16_80, %c0_81] : memref<232x128xf32, #tpu.memory_space<vmem>>, vector<192x128xf32>
    %c3_82 = arith.constant 3 : index
    %c0_83 = arith.constant 0 : index
    %c0_84 = arith.constant 0 : index
    %85 = vector.load %arg5[%c3_82, %c0_83, %c0_84] : memref<9x128x128xf32, #tpu.memory_space<vmem>>, vector<1x128x128xf32>
    %86 = vector.shape_cast %85 : vector<1x128x128xf32> to vector<128x128xf32>
    %cst_85 = arith.constant dense<0.000000e+00> : vector<192x128xf32>
    %87 = tpu.matmul %84, %86, %cst_85 {dimension_numbers = #tpu.dot_dimension_numbers<[1], [0], [0], [1], [0, 0, 1, 1], [], []>} : vector<192x128xf32>, vector<128x128xf32>, vector<192x128xf32> -> vector<192x128xf32>
    %88 = arith.addf %83, %87 : vector<192x128xf32>
    %c17_86 = arith.constant 17 : index
    %c0_87 = arith.constant 0 : index
    %89 = vector.load %arg9[%c17_86, %c0_87] : memref<232x128xf32, #tpu.memory_space<vmem>>, vector<192x128xf32>
    %c4_88 = arith.constant 4 : index
    %c0_89 = arith.constant 0 : index
    %c0_90 = arith.constant 0 : index
    %90 = vector.load %arg5[%c4_88, %c0_89, %c0_90] : memref<9x128x128xf32, #tpu.memory_space<vmem>>, vector<1x128x128xf32>
    %91 = vector.shape_cast %90 : vector<1x128x128xf32> to vector<128x128xf32>
    %cst_91 = arith.constant dense<0.000000e+00> : vector<192x128xf32>
    %92 = tpu.matmul %89, %91, %cst_91 {dimension_numbers = #tpu.dot_dimension_numbers<[1], [0], [0], [1], [0, 0, 1, 1], [], []>} : vector<192x128xf32>, vector<128x128xf32>, vector<192x128xf32> -> vector<192x128xf32>
    %93 = arith.addf %88, %92 : vector<192x128xf32>
    %c18_92 = arith.constant 18 : index
    %c0_93 = arith.constant 0 : index
    %94 = vector.load %arg9[%c18_92, %c0_93] : memref<232x128xf32, #tpu.memory_space<vmem>>, vector<192x128xf32>
    %c5_94 = arith.constant 5 : index
    %c0_95 = arith.constant 0 : index
    %c0_96 = arith.constant 0 : index
    %95 = vector.load %arg5[%c5_94, %c0_95, %c0_96] : memref<9x128x128xf32, #tpu.memory_space<vmem>>, vector<1x128x128xf32>
    %96 = vector.shape_cast %95 : vector<1x128x128xf32> to vector<128x128xf32>
    %cst_97 = arith.constant dense<0.000000e+00> : vector<192x128xf32>
    %97 = tpu.matmul %94, %96, %cst_97 {dimension_numbers = #tpu.dot_dimension_numbers<[1], [0], [0], [1], [0, 0, 1, 1], [], []>} : vector<192x128xf32>, vector<128x128xf32>, vector<192x128xf32> -> vector<192x128xf32>
    %98 = arith.addf %93, %97 : vector<192x128xf32>
    %c32_98 = arith.constant 32 : index
    %c0_99 = arith.constant 0 : index
    %99 = vector.load %arg9[%c32_98, %c0_99] : memref<232x128xf32, #tpu.memory_space<vmem>>, vector<192x128xf32>
    %c6_100 = arith.constant 6 : index
    %c0_101 = arith.constant 0 : index
    %c0_102 = arith.constant 0 : index
    %100 = vector.load %arg5[%c6_100, %c0_101, %c0_102] : memref<9x128x128xf32, #tpu.memory_space<vmem>>, vector<1x128x128xf32>
    %101 = vector.shape_cast %100 : vector<1x128x128xf32> to vector<128x128xf32>
    %cst_103 = arith.constant dense<0.000000e+00> : vector<192x128xf32>
    %102 = tpu.matmul %99, %101, %cst_103 {dimension_numbers = #tpu.dot_dimension_numbers<[1], [0], [0], [1], [0, 0, 1, 1], [], []>} : vector<192x128xf32>, vector<128x128xf32>, vector<192x128xf32> -> vector<192x128xf32>
    %103 = arith.addf %98, %102 : vector<192x128xf32>
    %c33_104 = arith.constant 33 : index
    %c0_105 = arith.constant 0 : index
    %104 = vector.load %arg9[%c33_104, %c0_105] : memref<232x128xf32, #tpu.memory_space<vmem>>, vector<192x128xf32>
    %c7_106 = arith.constant 7 : index
    %c0_107 = arith.constant 0 : index
    %c0_108 = arith.constant 0 : index
    %105 = vector.load %arg5[%c7_106, %c0_107, %c0_108] : memref<9x128x128xf32, #tpu.memory_space<vmem>>, vector<1x128x128xf32>
    %106 = vector.shape_cast %105 : vector<1x128x128xf32> to vector<128x128xf32>
    %cst_109 = arith.constant dense<0.000000e+00> : vector<192x128xf32>
    %107 = tpu.matmul %104, %106, %cst_109 {dimension_numbers = #tpu.dot_dimension_numbers<[1], [0], [0], [1], [0, 0, 1, 1], [], []>} : vector<192x128xf32>, vector<128x128xf32>, vector<192x128xf32> -> vector<192x128xf32>
    %108 = arith.addf %103, %107 : vector<192x128xf32>
    %c34_110 = arith.constant 34 : index
    %c0_111 = arith.constant 0 : index
    %109 = vector.load %arg9[%c34_110, %c0_111] : memref<232x128xf32, #tpu.memory_space<vmem>>, vector<192x128xf32>
    %c8_112 = arith.constant 8 : index
    %c0_113 = arith.constant 0 : index
    %c0_114 = arith.constant 0 : index
    %110 = vector.load %arg5[%c8_112, %c0_113, %c0_114] : memref<9x128x128xf32, #tpu.memory_space<vmem>>, vector<1x128x128xf32>
    %111 = vector.shape_cast %110 : vector<1x128x128xf32> to vector<128x128xf32>
    %cst_115 = arith.constant dense<0.000000e+00> : vector<192x128xf32>
    %112 = tpu.matmul %109, %111, %cst_115 {dimension_numbers = #tpu.dot_dimension_numbers<[1], [0], [0], [1], [0, 0, 1, 1], [], []>} : vector<192x128xf32>, vector<128x128xf32>, vector<192x128xf32> -> vector<192x128xf32>
    %113 = arith.addf %108, %112 : vector<192x128xf32>
    %114 = vector.broadcast %2 : vector<1x128xf32> to vector<192x128xf32>
    %115 = arith.mulf %113, %114 : vector<192x128xf32>
    %116 = vector.broadcast %3 : vector<1x128xf32> to vector<192x128xf32>
    %117 = arith.addf %115, %116 : vector<192x128xf32>
    %cst_116 = arith.constant 0.000000e+00 : f32
    %118 = vector.broadcast %cst_116 : f32 to vector<192x128xf32>
    %119 = arith.maximumf %117, %118 : vector<192x128xf32>
    %c0_117 = arith.constant 0 : index
    %c0_118 = arith.constant 0 : index
    %c0_119 = arith.constant 0 : index
    %120 = vector.load %arg8[%c0_117, %c0_118, %c0_119] : memref<1x192x128xf32, #tpu.memory_space<vmem>>, vector<1x192x128xf32>
    %121 = vector.shape_cast %120 : vector<1x192x128xf32> to vector<192x128xf32>
    %122 = vector.shape_cast %119 : vector<192x128xf32> to vector<1x192x128xf32>
    tpu.vector_store %arg8[%c0_117, %c0_118, %c0_119], %122 {strides = array<i32>} : memref<1x192x128xf32, #tpu.memory_space<vmem>>, vector<1x192x128xf32>,
    return
  }
  func.func @transform_0(%arg0: i32) -> (i32, i32, i32) {
    %c0_i32 = arith.constant 0 : i32
    %c0_i32_0 = arith.constant 0 : i32
    %c0_i32_1 = arith.constant 0 : i32
    return %arg0, %c0_i32, %c0_i32_0 : i32, i32, i32
  }
  func.func @transform_1(%arg0: i32) -> (i32, i32, i32) {
    %c0_i32 = arith.constant 0 : i32
    %c0_i32_0 = arith.constant 0 : i32
    %c0_i32_1 = arith.constant 0 : i32
    %c0_i32_2 = arith.constant 0 : i32
    return %c0_i32, %c0_i32_0, %c0_i32_1 : i32, i32, i32
  }
  func.func @transform_2(%arg0: i32) -> (i32, i32) {
    %c0_i32 = arith.constant 0 : i32
    %c0_i32_0 = arith.constant 0 : i32
    %c0_i32_1 = arith.constant 0 : i32
    return %c0_i32, %c0_i32_0 : i32, i32
  }
  func.func @transform_3(%arg0: i32) -> (i32, i32) {
    %c0_i32 = arith.constant 0 : i32
    %c0_i32_0 = arith.constant 0 : i32
    %c0_i32_1 = arith.constant 0 : i32
    return %c0_i32, %c0_i32_0 : i32, i32
  }
  func.func @transform_4(%arg0: i32) -> (i32, i32, i32) {
    %c0_i32 = arith.constant 0 : i32
    %c0_i32_0 = arith.constant 0 : i32
    %c0_i32_1 = arith.constant 0 : i32
    %c0_i32_2 = arith.constant 0 : i32
    return %c0_i32, %c0_i32_0, %c0_i32_1 : i32, i32, i32
  }
  func.func @transform_5(%arg0: i32) -> (i32, i32) {
    %c0_i32 = arith.constant 0 : i32
    %c0_i32_0 = arith.constant 0 : i32
    %c0_i32_1 = arith.constant 0 : i32
    return %c0_i32, %c0_i32_0 : i32, i32
  }
  func.func @transform_6(%arg0: i32) -> (i32, i32) {
    %c0_i32 = arith.constant 0 : i32
    %c0_i32_0 = arith.constant 0 : i32
    %c0_i32_1 = arith.constant 0 : i32
    return %c0_i32, %c0_i32_0 : i32, i32
  }
  func.func @transform_7(%arg0: i32) -> (i32, i32, i32) {
    %c0_i32 = arith.constant 0 : i32
    %c0_i32_0 = arith.constant 0 : i32
    %c0_i32_1 = arith.constant 0 : i32
    return %arg0, %c0_i32, %c0_i32_0 : i32, i32, i32
  }
}

</mosaic_0001>

<bundles_post_ra>
// kernel: tpu_custom_call.1
= control target key start
LH: loop header
LB: loop body
LE: loop exit
PB: predicated region body
PF: predicated region fallthrough
CT: control target
= control target key end

     0   :  { %12 = vsyncpa [#allocation4], 0  ;;  %s10560_s0 = inlined_call_operand.vmem [shape: f32[2,264,4], index: 0, kind: input, shape index: {}]   ;;  %s10561_s1 = inlined_call_operand.vmem [shape: f32[9,4,128], index: 1, kind: input, shape index: {}]   ;;  %s10562_s2 = inlined_call_operand.vmem [shape: f32[1,128], index: 2, kind: input, shape index: {}]   ;;  %s10563_s3 = inlined_call_operand.vmem [shape: f32[1,128], index: 3, kind: input, shape index: {}]   ;;  %s10564_s4 = inlined_call_operand.hbm [shape: f32[9,128,128], index: 4, kind: input, shape index: {}]   ;;  %s10565_s5 = inlined_call_operand.vmem [shape: f32[1,128], index: 5, kind: input, shape index: {}]   ;;  %s10566_s6 = inlined_call_operand.vmem [shape: f32[1,128], index: 6, kind: input, shape index: {}]   ;;  %s10567_s7 = inlined_call_operand.hbm [shape: f32[2,192,128], index: 7, kind: output, shape index: {}]  }
   0x1   :  { %13 = vsyncpa [#allocation5], 0 }
   0x2   :  { %15 = vsyncpa [#allocation5 + $0x1], 0  ;;  %s8024_s24 = smov 0   ;;  %s8026_s25 = smov 0  }
   0x3   :  { %s8028_s26 = smov 0   ;;  %s8030_s27 = smov 0  }
   0x4 LB: > { %s8045_s28 = sadd.s32 4294967295, %s7975_s27   ;;  %s5913_s29 = sadd.s32 4294967294, %s7975_s27   ;;  %s7975_s27 = sphi %s8030_s27, %s10891_s27   ;;  %s7971_s26 = sphi %s8028_s26, %s10890_s26   ;;  %s7967_s25 = sphi %s8026_s25, %s10889_s25   ;;  %s7963_s24 = sphi %s8024_s24, %s10888_s24  }
   0x5   : > { %s8049_s30 = sadd.s32 1, %s7975_s27   ;;  %s180_s8 = sadd.s32 1, %s7971_s26 }
   0x6   : > { %s177_s9 = ssub.s32 %s7975_s27, %s8049_s30  ;;  %p190_p0 = scmp.ne.s32.totalorder %s7971_s26, %s7967_s25 }
   0x7   : > { %p178_p1 = scmp.eq.s32.totalorder %s177_s9, 0  ;;  %p191_p2 = scmp.eq.s32.totalorder %s8045_s28, 1 }
   0x8   : > { %p196_p3 = scmp.ne.s32.totalorder %s7967_s25, %s7963_s24  ;;  %p197_p4 = scmp.eq.s32.totalorder %s5913_s29, 1 }
   0x9   : > { %s8060_s10 = scalar_select %p178_p1, %s7971_s26, %s180_s8  }
   0xa   : > { %p8062_p5 = por %p191_p2, %p190_p0  ;;  %p8066_p6 = por %p197_p4, %p196_p3 }
   0xb   : > { %p5914_p7 = scmp.ge.s32.totalorder %s7975_s27, 1  ;;  %p204_p8 = scmp.lt.s32.totalorder %s7975_s27, 3 }
   0xc   : > { %s10600_s12 = scalar_select %p8066_p6, 1, 0 }
   0xd   : > { %p7844_p9 = scmp.eq.s32.totalorder %s8045_s28, 0  ;;  %p8073_p10 = pnand %p5914_p7, %p204_p8 }
   0xe   : > { %s7977_s14 = smov [#allocation3]  }
   0xf   : > { %s225_s15 = sshll.u32 %s7977_s14, 4  ;;  %p7836_p11 = pneg %p8073_p10  ;;  %s226_s15 = int_to_ptr.vmem [resolvable:$true] %s225_s15 }
  0x10   : > { %s7896_s16 = scalar_lea.vmem %s226_s15, 18432  ;;  %p7904_p3 = scmp.lt.s32.totalorder %s226_s15, %s226_s15 }
  0x11   : > { %p7837_p12 = pnand %p7844_p9, %p7836_p11  ;;  %p7897_p0 = scmp.ne.s32.totalorder %s226_s15, %s7896_s16 }
  0x12   : > { %p7905_p4 = scmp.lt.s32.totalorder %s7896_s16, %s7896_s16 }
  0x13   : > { %p7887_p13 = pneg %p7837_p12 }
  0x14   : > { %p7906_p6 = por %p7905_p4, %p7904_p3 }
  0x15   : > { %p7899_p1 = pnand %p7897_p0, %p7887_p13 }
  0x17   : > { %p7900_p2 = pneg %p7899_p1 }
  0x19   : > { %p7907_p7 = pnand %p7906_p6, %p7900_p2 }
  0x1b   : > { %7910 = shalt.err (!%p7907_p7)
}
  0x1c   : > { %s7978_s17 = smov 128   ;;  %s7979_s18 = smov 8  }
  0x1d   : > { %7839 = dma.hbm_to_vmem [thread:$0]  (!%p7837_p12), %s10564_s4, 18432, %s226_s15, [#allocation4], %s7978_s17, %s7978_s17, %s7979_s18  }
  0x1e   : > { %255 = sbr.rel (%p8073_p10) target bundleno = 961 (0x3c1), region = 48 }
  0x23   : > { %7954 = dma.done.wait (%p7844_p9), [#allocation4], 18432  }
  0x24   : > { %7956 = vsyncadd (%p7844_p9), [#allocation4], 4294948864  ;;  %p287_p8 = scmp.lt.s32.totalorder %s8045_s28, 1  ;;  %vm440_vm0 = vcmask 1043456   ;;  %v5920_v0 = vld [vmem:[%s10561_s1 + $0x4] sm:$0xf] }
  0x25   : > { %vm355_vm1 = vcmask 31744   ;;  %6817 = vmatprep.subr.msk.mxu0 %vm440_vm0, %v5920_v0  ;;  %7825 = vmatprep.subr.msk.mxu1 %vm440_vm0, %v5920_v0  ;;  %v5979_v5 = vld [vmem:[%s10561_s1 + $0x8] sm:$0xf]  ;;  %v324_v6 = vld [vmem:[%s10561_s1] sm:$0xf]  ;;  %s284_s20 = sand.u32 1, %s7967_s25  }
  0x26   : > { %s288_s21 = scalar_select %p287_p8, %s8045_s28, 1  ;;  %6818 = vmatpush3.msk.msra.mxu0 %vm440_vm0, %v5920_v0  ;;  %7826 = vmatpush3.msk.msra.mxu1 %vm440_vm0, %v5920_v0  ;;  %v6009_v25 = vld [vmem:[%s10561_s1 + $0xc] sm:$0xf]  ;;  %v8215_v26 = vld [vmem:[%s10561_s1 + $0x10] sm:$0xf] }
  0x27   : > { %6905 = vmatprep.subr.msk.mxu0 %vm440_vm0, %v5979_v5  ;;  %6861 = vmatprep.subr.msk.mxu1 %vm440_vm0, %v324_v6  ;;  %v8273_v37 = vld [vmem:[%s10561_s1 + $0x14] sm:$0xf]  ;;  %v8401_v0 = vld [vmem:[%s10561_s1 + $0x18] sm:$0xf]  ;;  %s7827_s23 = smul.u32 192, %s284_s20  ;;  %s7981_s19 = smov [#allocation6]  }
  0x28   : > { %s7828_s22 = smul.u32 264, %s288_s21  ;;  %s7915_s21 = sshll.u32 %s7981_s19, 4  ;;  %s7916_s21 = int_to_ptr.vmem [resolvable:$false] %s7915_s21 }
  0x29   : > { %s10371_s13 = scalar_lea.vmem [#allocation6], %s7827_s23  ;;  %s7829_s14 = smul.u32 3072, %s8045_s28 }
  0x2a   : > { %s8095_s8 = scalar_lea.vmem %s10560_s0, %s7828_s22  ;;  %s5839_s15 = sshll.u32 %s10371_s13, 4  ;;  %s10509_s15 = int_to_ptr.vmem [resolvable:$true] %s5839_s15 }
  0x2b   : > { %v325_v1 = vld [vmem:[%s8095_s8 + $0x1] sm:$0xff]  ;;  %v8102_v2 = vld [vmem:[%s8095_s8 + $0xd1] sm:$0xff]  ;;  %v326_v3 = vld [vmem:[%s8095_s8 + $0x9] sm:$0xff]  ;;  %s10515_s17 = scalar_lea.hbm %s10567_s7, %s7829_s14  ;;  %s10520_s28 = scalar_lea.sflag [#allocation5], %s284_s20 }
  0x2c   : > { %v8108_v4 = vld [vmem:[%s8095_s8 + $0xd9] sm:$0xff]  ;;  %6819 = vmatprep.mubr.msk.f32.mxu0 %vm355_vm1, %v325_v1  ;;  %6858 = vmatprep.mubr.msk.f32.mxu1 %vm355_vm1, %v8102_v2  ;;  %v8122_v7 = vld [vmem:[%s8095_s8 + $0x11] sm:$0xff]  ;;  %v297_v10 = vld [vmem:[%s8095_s8 + $0x8] sm:$0xff]  ;;  %s7911_s18 = scalar_lea.vmem %s10509_s15, 3072  ;;  %s7917_s22 = scalar_lea.vmem %s7916_s21, 6144 }
  0x2d   : > { %6820 = vmatmul.mubr.msk.f32.vlgmr.msra.gmra.mxu0 %vm355_vm1, %v326_v3  ;;  %6859 = vmatmul.mubr.msk.f32.vlgmr.msra.gmra.mxu1 %vm355_vm1, %v8108_v4  ;;  %v296_v8 = vld [vmem:[%s8095_s8] sm:$0xff]  ;;  %v8141_v12 = vld [vmem:[%s8095_s8 + $0x10] sm:$0xff]  ;;  %v8156_v14 = vld [vmem:[%s8095_s8 + $0x18] sm:$0xff]  ;;  %p7912_p6 = scmp.ne.s32.totalorder %s10509_s15, %s7911_s18  ;;  %p7918_p11 = scmp.lt.s32.totalorder %s10509_s15, %s7916_s21 }
  0x2e   : > { %v8131_v9 = vld [vmem:[%s8095_s8 + $0x19] sm:$0xff]  ;;  %6906 = vmatpush3.msk.msra.mxu0 %vm440_vm0, %v5979_v5  ;;  %6822 = vmatprep.mubr.msk.f32.mxu0 %vm355_vm1, %v8122_v7  ;;  %v8138_v11 = vld [vmem:[%s8095_s8 + $0x21] sm:$0xff]  ;;  %v8153_v13 = vld [vmem:[%s8095_s8 + $0x29] sm:$0xff]  ;;  %p7919_p12 = scmp.lt.s32.totalorder %s7917_s22, %s7911_s18 }
  0x2f   : > { %6862 = vmatpush3.msk.msra.mxu1 %vm440_vm0, %v324_v6  ;;  %6863 = vmatprep.mubr.msk.f32.mxu1 %vm355_vm1, %v296_v8  ;;  %v8159_v15 = vld [vmem:[%s8095_s8 + $0x31] sm:$0xff]  ;;  %v8162_v16 = vld [vmem:[%s8095_s8 + $0x20] sm:$0xff]  ;;  %v8176_v18 = vld [vmem:[%s8095_s8 + $0x28] sm:$0xff]  ;;  %p7913_p9 = pnand %p7912_p6, %p8062_p5 }
  0x30   : > { %v8173_v17 = vld [vmem:[%s8095_s8 + $0x39] sm:$0xff]  ;;  %v8179_v19 = vld [vmem:[%s8095_s8 + $0x41] sm:$0xff]  ;;  %v8182_v20 = vld [vmem:[%s8095_s8 + $0x30] sm:$0xff]  ;;  %6949 = vmatprep.subr.msk.mxu1 %vm440_vm0, %v6009_v25  ;;  %6993 = vmatprep.subr.msk.mxu0 %vm440_vm0, %v8215_v26  ;;  %p7920_p13 = por %p7919_p12, %p7918_p11 }
  0x31   : > { %6823 = vmatmul.mubr.msk.f32.gmra.mxu0 %vm355_vm1, %v8131_v9  ;;  %6864 = vmatmul.mubr.msk.f32.vlgmr.msra.gmra.mxu1 %vm355_vm1, %v297_v10  ;;  %v8193_v21 = vld [vmem:[%s8095_s8 + $0x49] sm:$0xff]  ;;  %v8196_v22 = vld [vmem:[%s8095_s8 + $0x38] sm:$0xff]  ;;  %v8202_v24 = vld [vmem:[%s8095_s8 + $0x40] sm:$0xff]  ;;  %p7914_p10 = pneg %p7913_p9 }
  0x32   : > { %6825 = vmatprep.mubr.msk.f32.mxu0 %vm355_vm1, %v8138_v11  ;;  %6866 = vmatprep.mubr.msk.f32.mxu1 %vm355_vm1, %v8141_v12  ;;  %v8199_v23 = vld [vmem:[%s8095_s8 + $0x51] sm:$0xff]  ;;  %10602 = vst [vmem:[#allocation9_spill] sm:$0xff] %v8202_v24  ;;  %v8222_v27 = vld [vmem:[%s8095_s8 + $0x59] sm:$0xff]  ;;  %v8225_v28 = vld [vmem:[%s8095_s8 + $0x48] sm:$0xff] }
  0x33   : > { %10603 = vst [vmem:[#allocation10_spill] sm:$0xff] %v8225_v28  ;;  %v8228_v29 = vld [vmem:[%s8095_s8 + $0x61] sm:$0xff]  ;;  %v8231_v30 = vld [vmem:[%s8095_s8 + $0x50] sm:$0xff]  ;;  %6950 = vmatpush3.msk.msra.mxu1 %vm440_vm0, %v6009_v25  ;;  %v8248_v32 = vld [vmem:[%s8095_s8 + $0x58] sm:$0xff]  ;;  %p7921_p0 = pnand %p7920_p13, %p7914_p10 }
  0x34   : > { %10604 = vst [vmem:[#allocation11_spill] sm:$0xff] %v8231_v30  ;;  %v8245_v31 = vld [vmem:[%s8095_s8 + $0x69] sm:$0xff]  ;;  %10605 = vst [vmem:[#allocation12_spill] sm:$0xff] %v8248_v32  ;;  %v8251_v33 = vld [vmem:[%s8095_s8 + $0x71] sm:$0xff]  ;;  %7037 = vmatprep.subr.msk.mxu1 %vm440_vm0, %v8273_v37 }
  0x35   : > { %6826 = vmatmul.mubr.msk.f32.gmra.mxu0 %vm355_vm1, %v8153_v13  ;;  %6867 = vmatmul.mubr.msk.f32.gmra.mxu1 %vm355_vm1, %v8156_v14  ;;  %v8254_v34 = vld [vmem:[%s8095_s8 + $0x60] sm:$0xff]  ;;  %v8268_v36 = vld [vmem:[%s8095_s8 + $0x68] sm:$0xff]  ;;  %v8279_v39 = vld [vmem:[%s8095_s8 + $0x70] sm:$0xff] }
  0x36   : > { %6828 = vmatprep.mubr.msk.f32.mxu0 %vm355_vm1, %v8159_v15  ;;  %6869 = vmatprep.mubr.msk.f32.mxu1 %vm355_vm1, %v8162_v16  ;;  %10606 = vst [vmem:[#allocation13_spill] sm:$0xff] %v8254_v34  ;;  %v8265_v35 = vld [vmem:[%s8095_s8 + $0x79] sm:$0xff]  ;;  %10607 = vst [vmem:[#allocation14_spill] sm:$0xff] %v8268_v36  ;;  %v8276_v38 = vld [vmem:[%s8095_s8 + $0x81] sm:$0xff] }
  0x37   : > { %10608 = vst [vmem:[#allocation15_spill] sm:$0xff] %v8279_v39  ;;  %v8292_v40 = vld [vmem:[%s8095_s8 + $0x89] sm:$0xff]  ;;  %v8295_v41 = vld [vmem:[%s8095_s8 + $0x78] sm:$0xff]  ;;  %v8301_v43 = vld [vmem:[%s8095_s8 + $0x80] sm:$0xff] }
  0x38   : > { %10609 = vst [vmem:[#allocation16_spill] sm:$0xff] %v8295_v41  ;;  %v8298_v42 = vld [vmem:[%s8095_s8 + $0x91] sm:$0xff]  ;;  %10610 = vst [vmem:[#allocation17_spill] sm:$0xff] %v8301_v43  ;;  %v8312_v44 = vld [vmem:[%s8095_s8 + $0x99] sm:$0xff] }
  0x39   : > { %6829 = vmatmul.mubr.msk.f32.gmra.mxu0 %vm355_vm1, %v8173_v17  ;;  %6870 = vmatmul.mubr.msk.f32.gmra.mxu1 %vm355_vm1, %v8176_v18  ;;  %v8315_v45 = vld [vmem:[%s8095_s8 + $0x88] sm:$0xff]  ;;  %v8321_v47 = vld [vmem:[%s8095_s8 + $0x90] sm:$0xff]  ;;  %v8335_v49 = vld [vmem:[%s8095_s8 + $0x98] sm:$0xff] }
  0x3a   : > { %6831 = vmatprep.mubr.msk.f32.mxu0 %vm355_vm1, %v8179_v19  ;;  %6872 = vmatprep.mubr.msk.f32.mxu1 %vm355_vm1, %v8182_v20  ;;  %10611 = vst [vmem:[#allocation18_spill] sm:$0xff] %v8315_v45  ;;  %v8318_v46 = vld [vmem:[%s8095_s8 + $0xa1] sm:$0xff]  ;;  %10612 = vst [vmem:[#allocation19_spill] sm:$0xff] %v8321_v47  ;;  %v8332_v48 = vld [vmem:[%s8095_s8 + $0xa9] sm:$0xff] }
  0x3b   : > { %10613 = vst [vmem:[#allocation20_spill] sm:$0xff] %v8335_v49  ;;  %v8338_v50 = vld [vmem:[%s8095_s8 + $0xb1] sm:$0xff]  ;;  %v8341_v51 = vld [vmem:[%s8095_s8 + $0xa0] sm:$0xff]  ;;  %v8355_v53 = vld [vmem:[%s8095_s8 + $0xa8] sm:$0xff] }
  0x3c   : > { %10614 = vst [vmem:[#allocation21_spill] sm:$0xff] %v8341_v51  ;;  %v8352_v52 = vld [vmem:[%s8095_s8 + $0xb9] sm:$0xff]  ;;  %10615 = vst [vmem:[#allocation22_spill] sm:$0xff] %v8355_v53  ;;  %v8358_v54 = vld [vmem:[%s8095_s8 + $0xc1] sm:$0xff] }
  0x3d   : > { %6832 = vmatmul.mubr.msk.f32.gmra.mxu0 %vm355_vm1, %v8193_v21  ;;  %6873 = vmatmul.mubr.msk.f32.gmra.mxu1 %vm355_vm1, %v8196_v22  ;;  %v8361_v55 = vld [vmem:[%s8095_s8 + $0xb0] sm:$0xff]  ;;  %v8375_v57 = vld [vmem:[%s8095_s8 + $0xb8] sm:$0xff]  ;;  %v8378_v58 = vld [vmem:[%s8095_s8 + $0xc0] sm:$0xff] }
  0x3e   : > { %6834 = vmatprep.mubr.msk.f32.mxu0 %vm355_vm1, %v8199_v23  ;;  %6875 = vmatprep.mubr.msk.f32.mxu1 %vm355_vm1, %v8202_v24  ;;  %v8372_v56 = vld [vmem:[%s8095_s8 + $0xc9] sm:$0xff]  ;;  %10616 = vst [vmem:[#allocation23_spill] sm:$0xff] %v8375_v57  ;;  %10617 = vst [vmem:[#allocation24_spill] sm:$0xff] %v8378_v58  ;;  %v8396_v63 = vld [vmem:[%s8095_s8 + $0x12] sm:$0xff] }
  0x3f   : > { %v941_v59 = vld [vmem:[%s8095_s8 + $0x2] sm:$0xff]  ;;  %v942_v61 = vld [vmem:[%s8095_s8 + $0xa] sm:$0xff]  ;;  %v8411_v1 = vld [vmem:[%s8095_s8 + $0xd8] sm:$0xff] }
  0x40   : > { %v8389_v60 = vld [vmem:[%s8095_s8 + $0xc8] sm:$0xff]  ;;  %v8393_v62 = vld [vmem:[%s8095_s8 + $0xd0] sm:$0xff]  ;;  %v8414_v3 = vld [vmem:[%s8095_s8 + $0x1a] sm:$0xff] }
  0x41   : > { %6835 = vmatmul.mubr.msk.f32.gmra.mxu0 %vm355_vm1, %v8222_v27  ;;  %6876 = vmatmul.mubr.msk.f32.gmra.mxu1 %vm355_vm1, %v8225_v28  ;;  %v8419_v5 = vld [vmem:[%s8095_s8 + $0x22] sm:$0xff]  ;;  %v8432_v6 = vld [vmem:[%s8095_s8 + $0x2a] sm:$0xff]  ;;  %v8435_v8 = vld [vmem:[%s8095_s8 + $0x32] sm:$0xff] }
  0x42   : > { %6837 = vmatprep.mubr.msk.f32.mxu0 %vm355_vm1, %v8228_v29  ;;  %6878 = vmatprep.mubr.msk.f32.mxu1 %vm355_vm1, %v8231_v30  ;;  %v8444_v10 = vld [vmem:[%s10561_s1 + $0x1c] sm:$0xf]  ;;  %v8454_v25 = vld [vmem:[%s8095_s8 + $0x42] sm:$0xff] }
  0x45   : > { %6838 = vmatmul.mubr.msk.f32.gmra.mxu0 %vm355_vm1, %v8245_v31  ;;  %6879 = vmatmul.mubr.msk.f32.gmra.mxu1 %vm355_vm1, %v8248_v32 }
  0x46   : > { %6840 = vmatprep.mubr.msk.f32.mxu0 %vm355_vm1, %v8251_v33  ;;  %6881 = vmatprep.mubr.msk.f32.mxu1 %vm355_vm1, %v8254_v34 }
  0x49   : > { %6841 = vmatmul.mubr.msk.f32.gmra.mxu0 %vm355_vm1, %v8265_v35  ;;  %6882 = vmatmul.mubr.msk.f32.gmra.mxu1 %vm355_vm1, %v8268_v36 }
  0x4a   : > { %6843 = vmatprep.mubr.msk.f32.mxu0 %vm355_vm1, %v8276_v38  ;;  %6884 = vmatprep.mubr.msk.f32.mxu1 %vm355_vm1, %v8279_v39 }
  0x4d   : > { %6844 = vmatmul.mubr.msk.f32.gmra.mxu0 %vm355_vm1, %v8292_v40  ;;  %6885 = vmatmul.mubr.msk.f32.gmra.mxu1 %vm355_vm1, %v8295_v41 }
  0x4e   : > { %6846 = vmatprep.mubr.msk.f32.mxu0 %vm355_vm1, %v8298_v42  ;;  %6887 = vmatprep.mubr.msk.f32.mxu1 %vm355_vm1, %v8301_v43 }
  0x51   : > { %6847 = vmatmul.mubr.msk.f32.gmra.mxu0 %vm355_vm1, %v8312_v44  ;;  %6888 = vmatmul.mubr.msk.f32.gmra.mxu1 %vm355_vm1, %v8315_v45 }
  0x52   : > { %6849 = vmatprep.mubr.msk.f32.mxu0 %vm355_vm1, %v8318_v46  ;;  %6890 = vmatprep.mubr.msk.f32.mxu1 %vm355_vm1, %v8321_v47 }
  0x55   : > { %6850 = vmatmul.mubr.msk.f32.gmra.mxu0 %vm355_vm1, %v8332_v48  ;;  %6891 = vmatmul.mubr.msk.f32.gmra.mxu1 %vm355_vm1, %v8335_v49 }
  0x56   : > { %6852 = vmatprep.mubr.msk.f32.mxu0 %vm355_vm1, %v8338_v50  ;;  %6893 = vmatprep.mubr.msk.f32.mxu1 %vm355_vm1, %v8341_v51 }
  0x59   : > { %6853 = vmatmul.mubr.msk.f32.gmra.mxu0 %vm355_vm1, %v8352_v52  ;;  %6894 = vmatmul.mubr.msk.f32.gmra.mxu1 %vm355_vm1, %v8355_v53 }
  0x5a   : > { %6855 = vmatprep.mubr.msk.f32.mxu0 %vm355_vm1, %v8358_v54  ;;  %6896 = vmatprep.mubr.msk.f32.mxu1 %vm355_vm1, %v8361_v55 }
  0x5d   : > { %6856 = vmatmul.mubr.msk.f32.gmra.mxu0 %vm355_vm1, %v8372_v56  ;;  %6897 = vmatmul.mubr.msk.f32.gmra.mxu1 %vm355_vm1, %v8375_v57 }
  0x5e   : > { %6899 = vmatprep.mubr.msk.f32.mxu1 %vm355_vm1, %v8378_v58  ;;  %6907 = vmatprep.mubr.msk.f32.mxu0 %vm355_vm1, %v941_v59  ;;  %v8486_v59 = vld [vmem:[%s8095_s8 + $0x62] sm:$0xff] }
  0x61   : > { %6900 = vmatmul.mubr.msk.f32.gmra.mxu1 %vm355_vm1, %v8389_v60  ;;  %6908 = vmatmul.mubr.msk.f32.vlgmr.msra.gmra.mxu0 %vm355_vm1, %v942_v61  ;;  %v8497_v61 = vld [vmem:[%s8095_s8 + $0x6a] sm:$0xff] }
  0x62   : > { %6994 = vmatpush3.msk.msra.mxu0 %vm440_vm0, %v8215_v26  ;;  %6902 = vmatprep.mubr.msk.f32.mxu1 %vm355_vm1, %v8393_v62  ;;  %v8472_v26 = vld [vmem:[%s8095_s8 + $0x52] sm:$0xff] }
  0x63   : > { %6910 = vmatprep.mubr.msk.f32.mxu0 %vm355_vm1, %v8396_v63  ;;  %7081 = vmatprep.subr.msk.mxu0 %vm440_vm0, %v8401_v0 }
  0x65   : > { %6903 = vmatmul.mubr.msk.f32.gmra.mxu1 %vm355_vm1, %v8411_v1  ;;  %6911 = vmatmul.mubr.msk.f32.gmra.mxu0 %vm355_vm1, %v8414_v3 }
  0x66   : > { %6913 = vmatprep.mubr.msk.f32.mxu0 %vm355_vm1, %v8419_v5  ;;  %6951 = vmatprep.mubr.msk.f32.mxu1 %vm355_vm1, %v8141_v12  ;;  %v8451_v12 = vld [vmem:[%s8095_s8 + $0x3a] sm:$0xff] }
  0x69   : > { %6914 = vmatmul.mubr.msk.f32.gmra.mxu0 %vm355_vm1, %v8432_v6  ;;  %6952 = vmatmul.mubr.msk.f32.vlgmr.msra.gmra.mxu1 %vm355_vm1, %v8156_v14  ;;  %v8469_v14 = vld [vmem:[%s8095_s8 + $0x4a] sm:$0xff] }
  0x6a   : > { %6916 = vmatprep.mubr.msk.f32.mxu0 %vm355_vm1, %v8435_v8  ;;  %6954 = vmatprep.mubr.msk.f32.mxu1 %vm355_vm1, %v8162_v16 }
  0x6b   : > { %7038 = vmatpush3.msk.msra.mxu1 %vm440_vm0, %v8273_v37  ;;  %v8483_v37 = vld [vmem:[%s8095_s8 + $0x5a] sm:$0xff] }
  0x6c   : > { %7125 = vmatprep.subr.msk.mxu1 %vm440_vm0, %v8444_v10 }
  0x6d   : > { %6917 = vmatmul.mubr.msk.f32.gmra.mxu0 %vm355_vm1, %v8451_v12  ;;  %6955 = vmatmul.mubr.msk.f32.gmra.mxu1 %vm355_vm1, %v8176_v18 }
  0x6e   : > { %6919 = vmatprep.mubr.msk.f32.mxu0 %vm355_vm1, %v8454_v25  ;;  %6957 = vmatprep.mubr.msk.f32.mxu1 %vm355_vm1, %v8182_v20 }
  0x71   : > { %6920 = vmatmul.mubr.msk.f32.gmra.mxu0 %vm355_vm1, %v8469_v14  ;;  %6958 = vmatmul.mubr.msk.f32.gmra.mxu1 %vm355_vm1, %v8196_v22 }
  0x72   : > { %6922 = vmatprep.mubr.msk.f32.mxu0 %vm355_vm1, %v8472_v26  ;;  %6960 = vmatprep.mubr.msk.f32.mxu1 %vm355_vm1, %v8202_v24  ;;  %v8500_v24 = vld [vmem:[%s8095_s8 + $0x72] sm:$0xff] }
  0x75   : > { %6923 = vmatmul.mubr.msk.f32.gmra.mxu0 %vm355_vm1, %v8483_v37  ;;  %6961 = vmatmul.mubr.msk.f32.gmra.mxu1 %vm355_vm1, %v8225_v28  ;;  %v8511_v28 = vld [vmem:[%s8095_s8 + $0x7a] sm:$0xff] }
  0x76   : > { %6925 = vmatprep.mubr.msk.f32.mxu0 %vm355_vm1, %v8486_v59  ;;  %6963 = vmatprep.mubr.msk.f32.mxu1 %vm355_vm1, %v8231_v30  ;;  %v8514_v30 = vld [vmem:[%s8095_s8 + $0x82] sm:$0xff] }
  0x79   : > { %6926 = vmatmul.mubr.msk.f32.gmra.mxu0 %vm355_vm1, %v8497_v61  ;;  %6964 = vmatmul.mubr.msk.f32.gmra.mxu1 %vm355_vm1, %v8248_v32  ;;  %v8525_v32 = vld [vmem:[%s8095_s8 + $0x8a] sm:$0xff] }
  0x7a   : > { %6928 = vmatprep.mubr.msk.f32.mxu0 %vm355_vm1, %v8500_v24  ;;  %6966 = vmatprep.mubr.msk.f32.mxu1 %vm355_vm1, %v8254_v34  ;;  %v8528_v34 = vld [vmem:[%s8095_s8 + $0x92] sm:$0xff] }
  0x7d   : > { %6929 = vmatmul.mubr.msk.f32.gmra.mxu0 %vm355_vm1, %v8511_v28  ;;  %6967 = vmatmul.mubr.msk.f32.gmra.mxu1 %vm355_vm1, %v8268_v36  ;;  %v8539_v36 = vld [vmem:[%s8095_s8 + $0x9a] sm:$0xff] }
  0x7e   : > { %6931 = vmatprep.mubr.msk.f32.mxu0 %vm355_vm1, %v8514_v30  ;;  %6969 = vmatprep.mubr.msk.f32.mxu1 %vm355_vm1, %v8279_v39  ;;  %v8542_v39 = vld [vmem:[%s8095_s8 + $0xa2] sm:$0xff] }
  0x81   : > { %6932 = vmatmul.mubr.msk.f32.gmra.mxu0 %vm355_vm1, %v8525_v32  ;;  %6970 = vmatmul.mubr.msk.f32.gmra.mxu1 %vm355_vm1, %v8295_v41  ;;  %v8553_v41 = vld [vmem:[%s8095_s8 + $0xaa] sm:$0xff] }
  0x82   : > { %6934 = vmatprep.mubr.msk.f32.mxu0 %vm355_vm1, %v8528_v34  ;;  %6972 = vmatprep.mubr.msk.f32.mxu1 %vm355_vm1, %v8301_v43  ;;  %v8556_v43 = vld [vmem:[%s8095_s8 + $0xb2] sm:$0xff] }
  0x85   : > { %6935 = vmatmul.mubr.msk.f32.gmra.mxu0 %vm355_vm1, %v8539_v36  ;;  %6973 = vmatmul.mubr.msk.f32.gmra.mxu1 %vm355_vm1, %v8315_v45  ;;  %v8567_v45 = vld [vmem:[%s8095_s8 + $0xba] sm:$0xff] }
  0x86   : > { %6937 = vmatprep.mubr.msk.f32.mxu0 %vm355_vm1, %v8542_v39  ;;  %6975 = vmatprep.mubr.msk.f32.mxu1 %vm355_vm1, %v8321_v47  ;;  %v8570_v47 = vld [vmem:[%s8095_s8 + $0xc2] sm:$0xff] }
  0x89   : > { %6938 = vmatmul.mubr.msk.f32.gmra.mxu0 %vm355_vm1, %v8553_v41  ;;  %6976 = vmatmul.mubr.msk.f32.gmra.mxu1 %vm355_vm1, %v8335_v49  ;;  %v8581_v49 = vld [vmem:[%s8095_s8 + $0xca] sm:$0xff] }
  0x8a   : > { %6940 = vmatprep.mubr.msk.f32.mxu0 %vm355_vm1, %v8556_v43  ;;  %6978 = vmatprep.mubr.msk.f32.mxu1 %vm355_vm1, %v8341_v51  ;;  %v8584_v51 = vld [vmem:[%s8095_s8 + $0xd2] sm:$0xff] }
  0x8d   : > { %6941 = vmatmul.mubr.msk.f32.gmra.mxu0 %vm355_vm1, %v8567_v45  ;;  %6979 = vmatmul.mubr.msk.f32.gmra.mxu1 %vm355_vm1, %v8355_v53  ;;  %v8595_v53 = vld [vmem:[%s8095_s8 + $0xda] sm:$0xff] }
  0x8e   : > { %6943 = vmatprep.mubr.msk.f32.mxu0 %vm355_vm1, %v8570_v47  ;;  %6981 = vmatprep.mubr.msk.f32.mxu1 %vm355_vm1, %v8361_v55 }
  0x91   : > { %6944 = vmatmul.mubr.msk.f32.gmra.mxu0 %vm355_vm1, %v8581_v49  ;;  %6982 = vmatmul.mubr.msk.f32.gmra.mxu1 %vm355_vm1, %v8375_v57  ;;  %v8606_v57 = vld [vmem:[%s8095_s8 + $0xe0] sm:$0xff] }
  0x92   : > { %6946 = vmatprep.mubr.msk.f32.mxu0 %vm355_vm1, %v8584_v51  ;;  %6984 = vmatprep.mubr.msk.f32.mxu1 %vm355_vm1, %v8378_v58  ;;  %v8611_v58 = vld [vmem:[%s10561_s1 + $0x20] sm:$0xf] }
  0x95   : > { %6947 = vmatmul.mubr.msk.f32.gmra.mxu0 %vm355_vm1, %v8595_v53  ;;  %6985 = vmatmul.mubr.msk.f32.gmra.mxu1 %vm355_vm1, %v8389_v60 }
  0x96   : > { %6987 = vmatprep.mubr.msk.f32.mxu1 %vm355_vm1, %v8393_v62  ;;  %6995 = vmatprep.mubr.msk.f32.mxu0 %vm355_vm1, %v8122_v7  ;;  %v8622_v7 = vld [vmem:[%s8095_s8 + $0xe8] sm:$0xff] }
  0x99   : > { %6988 = vmatmul.mubr.msk.f32.gmra.mxu1 %vm355_vm1, %v8411_v1  ;;  %6996 = vmatmul.mubr.msk.f32.vlgmr.msra.gmra.mxu0 %vm355_vm1, %v8131_v9  ;;  %v8719_v9 = vld [vmem:[%s8095_s8 + $0xe1] sm:$0xff] }
  0x9a   : > { %7082 = vmatpush3.msk.msra.mxu0 %vm440_vm0, %v8401_v0  ;;  %6990 = vmatprep.mubr.msk.f32.mxu1 %vm355_vm1, %v8606_v57  ;;  %v8741_v0 = vld [vmem:[%s8095_s8 + $0xe2] sm:$0xff] }
  0x9b   : > { %6998 = vmatprep.mubr.msk.f32.mxu0 %vm355_vm1, %v8138_v11  ;;  %7169 = vmatprep.subr.msk.mxu0 %vm440_vm0, %v8611_v58 }
  0x9d   : > { %6991 = vmatmul.mubr.msk.f32.gmra.mxu1 %vm355_vm1, %v8622_v7  ;;  %6999 = vmatmul.mubr.msk.f32.gmra.mxu0 %vm355_vm1, %v8153_v13 }
  0x9e   : > { %7001 = vmatprep.mubr.msk.f32.mxu0 %vm355_vm1, %v8159_v15  ;;  %7039 = vmatprep.mubr.msk.f32.mxu1 %vm355_vm1, %v8396_v63  ;;  %v8730_v63 = vld [vmem:[%s8095_s8 + $0xe9] sm:$0xff] }
  0xa1   : > { %7002 = vmatmul.mubr.msk.f32.gmra.mxu0 %vm355_vm1, %v8173_v17  ;;  %7040 = vmatmul.mubr.msk.f32.vlgmr.msra.gmra.mxu1 %vm355_vm1, %v8414_v3  ;;  %v8752_v3 = vld [vmem:[%s8095_s8 + $0xea] sm:$0xff] }
  0xa2   : > { %7004 = vmatprep.mubr.msk.f32.mxu0 %vm355_vm1, %v8179_v19  ;;  %7042 = vmatprep.mubr.msk.f32.mxu1 %vm355_vm1, %v8419_v5 }
  0xa3   : > { %7126 = vmatpush3.msk.msra.mxu1 %vm440_vm0, %v8444_v10  ;;  %v10629_v10 = vld [vmem:[#allocation20_spill] sm:$0xff] }
  0xa5   : > { %7005 = vmatmul.mubr.msk.f32.gmra.mxu0 %vm355_vm1, %v8193_v21  ;;  %7043 = vmatmul.mubr.msk.f32.gmra.mxu1 %vm355_vm1, %v8432_v6 }
  0xa6   : > { %7007 = vmatprep.mubr.msk.f32.mxu0 %vm355_vm1, %v8199_v23  ;;  %7045 = vmatprep.mubr.msk.f32.mxu1 %vm355_vm1, %v8435_v8 }
  0xa9   : > { %7008 = vmatmul.mubr.msk.f32.gmra.mxu0 %vm355_vm1, %v8222_v27  ;;  %7046 = vmatmul.mubr.msk.f32.gmra.mxu1 %vm355_vm1, %v8451_v12 }
  0xaa   : > { %7010 = vmatprep.mubr.msk.f32.mxu0 %vm355_vm1, %v8228_v29  ;;  %7048 = vmatprep.mubr.msk.f32.mxu1 %vm355_vm1, %v8454_v25 }
  0xad   : > { %7011 = vmatmul.mubr.msk.f32.gmra.mxu0 %vm355_vm1, %v8245_v31  ;;  %7049 = vmatmul.mubr.msk.f32.gmra.mxu1 %vm355_vm1, %v8469_v14 }
  0xae   : > { %7013 = vmatprep.mubr.msk.f32.mxu0 %vm355_vm1, %v8251_v33  ;;  %7051 = vmatprep.mubr.msk.f32.mxu1 %vm355_vm1, %v8472_v26 }
  0xb1   : > { %7014 = vmatmul.mubr.msk.f32.gmra.mxu0 %vm355_vm1, %v8265_v35  ;;  %7052 = vmatmul.mubr.msk.f32.gmra.mxu1 %vm355_vm1, %v8483_v37 }
  0xb2   : > { %7016 = vmatprep.mubr.msk.f32.mxu0 %vm355_vm1, %v8276_v38  ;;  %7054 = vmatprep.mubr.msk.f32.mxu1 %vm355_vm1, %v8486_v59 }
  0xb5   : > { %7017 = vmatmul.mubr.msk.f32.gmra.mxu0 %vm355_vm1, %v8292_v40  ;;  %7055 = vmatmul.mubr.msk.f32.gmra.mxu1 %vm355_vm1, %v8497_v61 }
  0xb6   : > { %7019 = vmatprep.mubr.msk.f32.mxu0 %vm355_vm1, %v8298_v42  ;;  %7057 = vmatprep.mubr.msk.f32.mxu1 %vm355_vm1, %v8500_v24 }
  0xb9   : > { %7020 = vmatmul.mubr.msk.f32.gmra.mxu0 %vm355_vm1, %v8312_v44  ;;  %7058 = vmatmul.mubr.msk.f32.gmra.mxu1 %vm355_vm1, %v8511_v28 }
  0xba   : > { %7022 = vmatprep.mubr.msk.f32.mxu0 %vm355_vm1, %v8318_v46  ;;  %7060 = vmatprep.mubr.msk.f32.mxu1 %vm355_vm1, %v8514_v30 }
  0xbd   : > { %7023 = vmatmul.mubr.msk.f32.gmra.mxu0 %vm355_vm1, %v8332_v48  ;;  %7061 = vmatmul.mubr.msk.f32.gmra.mxu1 %vm355_vm1, %v8525_v32 }
  0xbe   : > { %7025 = vmatprep.mubr.msk.f32.mxu0 %vm355_vm1, %v8338_v50  ;;  %7063 = vmatprep.mubr.msk.f32.mxu1 %vm355_vm1, %v8528_v34 }
  0xc1   : > { %7026 = vmatmul.mubr.msk.f32.gmra.mxu0 %vm355_vm1, %v8352_v52  ;;  %7064 = vmatmul.mubr.msk.f32.gmra.mxu1 %vm355_vm1, %v8539_v36 }
  0xc2   : > { %7028 = vmatprep.mubr.msk.f32.mxu0 %vm355_vm1, %v8358_v54  ;;  %7066 = vmatprep.mubr.msk.f32.mxu1 %vm355_vm1, %v8542_v39 }
  0xc5   : > { %7029 = vmatmul.mubr.msk.f32.gmra.mxu0 %vm355_vm1, %v8372_v56  ;;  %7067 = vmatmul.mubr.msk.f32.gmra.mxu1 %vm355_vm1, %v8553_v41 }
  0xc6   : > { %7031 = vmatprep.mubr.msk.f32.mxu0 %vm355_vm1, %v8102_v2  ;;  %7069 = vmatprep.mubr.msk.f32.mxu1 %vm355_vm1, %v8556_v43 }
  0xc9   : > { %7032 = vmatmul.mubr.msk.f32.gmra.mxu0 %vm355_vm1, %v8108_v4  ;;  %7070 = vmatmul.mubr.msk.f32.gmra.mxu1 %vm355_vm1, %v8567_v45 }
  0xca   : > { %7034 = vmatprep.mubr.msk.f32.mxu0 %vm355_vm1, %v8719_v9  ;;  %7072 = vmatprep.mubr.msk.f32.mxu1 %vm355_vm1, %v8570_v47 }
  0xcd   : > { %7035 = vmatmul.mubr.msk.f32.gmra.mxu0 %vm355_vm1, %v8730_v63  ;;  %7073 = vmatmul.mubr.msk.f32.gmra.mxu1 %vm355_vm1, %v8581_v49 }
  0xce   : > { %7075 = vmatprep.mubr.msk.f32.mxu1 %vm355_vm1, %v8584_v51  ;;  %7083 = vmatprep.mubr.msk.f32.mxu0 %vm355_vm1, %v8162_v16  ;;  %v10618_v16 = vld [vmem:[#allocation9_spill] sm:$0xff] }
  0xd1   : > { %7076 = vmatmul.mubr.msk.f32.gmra.mxu1 %vm355_vm1, %v8595_v53  ;;  %7084 = vmatmul.mubr.msk.f32.vlgmr.msra.gmra.mxu0 %vm355_vm1, %v8176_v18  ;;  %v10619_v18 = vld [vmem:[#allocation10_spill] sm:$0xff] }
  0xd2   : > { %7170 = vmatpush3.msk.msra.mxu0 %vm440_vm0, %v8611_v58  ;;  %7078 = vmatprep.mubr.msk.f32.mxu1 %vm355_vm1, %v8741_v0  ;;  %v10620_v58 = vld [vmem:[#allocation11_spill] sm:$0xff] }
  0xd3   : > { %7086 = vmatprep.mubr.msk.f32.mxu0 %vm355_vm1, %v8182_v20  ;;  %v10621_v20 = vld [vmem:[#allocation12_spill] sm:$0xff] }
  0xd5   : > { %7079 = vmatmul.mubr.msk.f32.gmra.mxu1 %vm355_vm1, %v8752_v3  ;;  %7087 = vmatmul.mubr.msk.f32.gmra.mxu0 %vm355_vm1, %v8196_v22  ;;  %v10622_v22 = vld [vmem:[#allocation13_spill] sm:$0xff] }
  0xd6   : > { %7089 = vmatprep.mubr.msk.f32.mxu0 %vm355_vm1, %v10618_v16  ;;  %7127 = vmatprep.mubr.msk.f32.mxu1 %vm355_vm1, %v8138_v11  ;;  %v10623_v11 = vld [vmem:[#allocation14_spill] sm:$0xff] }
  0xd9   : > { %7090 = vmatmul.mubr.msk.f32.gmra.mxu0 %vm355_vm1, %v10619_v18  ;;  %7128 = vmatmul.mubr.msk.f32.vlgmr.msra.gmra.mxu1 %vm355_vm1, %v8153_v13  ;;  %v10624_v13 = vld [vmem:[#allocation15_spill] sm:$0xff] }
  0xda   : > { %7092 = vmatprep.mubr.msk.f32.mxu0 %vm355_vm1, %v10620_v58  ;;  %7130 = vmatprep.mubr.msk.f32.mxu1 %vm355_vm1, %v8159_v15  ;;  %v10625_v15 = vld [vmem:[#allocation16_spill] sm:$0xff]  ;;  %v10631_v58 = vld [vmem:[#allocation22_spill] sm:$0xff] }
  0xdd   : > { %7093 = vmatmul.mubr.msk.f32.gmra.mxu0 %vm355_vm1, %v10621_v20  ;;  %7131 = vmatmul.mubr.msk.f32.gmra.mxu1 %vm355_vm1, %v8173_v17  ;;  %v10626_v17 = vld [vmem:[#allocation17_spill] sm:$0xff] }
  0xde   : > { %7095 = vmatprep.mubr.msk.f32.mxu0 %vm355_vm1, %v10622_v22  ;;  %7133 = vmatprep.mubr.msk.f32.mxu1 %vm355_vm1, %v8179_v19  ;;  %v10627_v19 = vld [vmem:[#allocation18_spill] sm:$0xff] }
  0xe1   : > { %7096 = vmatmul.mubr.msk.f32.gmra.mxu0 %vm355_vm1, %v10623_v11  ;;  %7134 = vmatmul.mubr.msk.f32.gmra.mxu1 %vm355_vm1, %v8193_v21  ;;  %v10628_v21 = vld [vmem:[#allocation19_spill] sm:$0xff] }
  0xe2   : > { %7098 = vmatprep.mubr.msk.f32.mxu0 %vm355_vm1, %v10624_v13  ;;  %7136 = vmatprep.mubr.msk.f32.mxu1 %vm355_vm1, %v8199_v23  ;;  %v10632_v13 = vld [vmem:[#allocation23_spill] sm:$0xff] }
  0xe5   : > { %7099 = vmatmul.mubr.msk.f32.gmra.mxu0 %vm355_vm1, %v10625_v15  ;;  %7137 = vmatmul.mubr.msk.f32.gmra.mxu1 %vm355_vm1, %v8222_v27  ;;  %v10633_v15 = vld [vmem:[#allocation24_spill] sm:$0xff] }
  0xe6   : > { %7101 = vmatprep.mubr.msk.f32.mxu0 %vm355_vm1, %v10626_v17  ;;  %7139 = vmatprep.mubr.msk.f32.mxu1 %vm355_vm1, %v8228_v29  ;;  %v10630_v29 = vld [vmem:[#allocation21_spill] sm:$0xff] }
  0xe9   : > { %7102 = vmatmul.mubr.msk.f32.gmra.mxu0 %vm355_vm1, %v10627_v19  ;;  %7140 = vmatmul.mubr.msk.f32.gmra.mxu1 %vm355_vm1, %v8245_v31 }
  0xea   : > { %7104 = vmatprep.mubr.msk.f32.mxu0 %vm355_vm1, %v10628_v21  ;;  %7142 = vmatprep.mubr.msk.f32.mxu1 %vm355_vm1, %v8251_v33 }
  0xed   : > { %v6821_v23 = vpop.f32.mrf.mxu0  ;;  %v8804_v27 = vpop.f32.mrf.mxu1  ;;  %7105 = vmatmul.mubr.msk.f32.gmra.mxu0 %vm355_vm1, %v10629_v10  ;;  %7143 = vmatmul.mubr.msk.f32.gmra.mxu1 %vm355_vm1, %v8265_v35 }
  0xee   : > { %7107 = vmatprep.mubr.msk.f32.mxu0 %vm355_vm1, %v10630_v29  ;;  %7145 = vmatprep.mubr.msk.f32.mxu1 %vm355_vm1, %v8276_v38 }
  0xef   : > { %v8814_v31 = vpop.f32.mrf.mxu0  ;;  %v8816_v16 = vpop.f32.mrf.mxu1 }
  0xf1   : > { %v6824_v33 = vpop.f32.mrf.mxu0  ;;  %v6865_v18 = vpop.f32.mrf.mxu1  ;;  %7108 = vmatmul.mubr.msk.f32.gmra.mxu0 %vm355_vm1, %v10631_v58  ;;  %7146 = vmatmul.mubr.msk.f32.gmra.mxu1 %vm355_vm1, %v8292_v40 }
  0xf2   : > { %v8822_v20 = vadd.f32 %v6865_v18, %v6821_v23  ;;  %7110 = vmatprep.mubr.msk.f32.mxu0 %vm355_vm1, %v8361_v55  ;;  %7148 = vmatprep.mubr.msk.f32.mxu1 %vm355_vm1, %v8298_v42 }
  0xf3   : > { %v8828_v35 = vpop.f32.mrf.mxu0  ;;  %v8830_v38 = vpop.f32.mrf.mxu1 }
  0xf5   : > { %v6827_v22 = vpop.f32.mrf.mxu0  ;;  %v6868_v11 = vpop.f32.mrf.mxu1  ;;  %7111 = vmatmul.mubr.msk.f32.gmra.mxu0 %vm355_vm1, %v10632_v13  ;;  %7149 = vmatmul.mubr.msk.f32.gmra.mxu1 %vm355_vm1, %v8312_v44 }
  0xf6   : > { %v8836_v40 = vadd.f32 %v6868_v11, %v6824_v33  ;;  %7113 = vmatprep.mubr.msk.f32.mxu0 %vm355_vm1, %v10633_v15  ;;  %7151 = vmatprep.mubr.msk.f32.mxu1 %vm355_vm1, %v8318_v46 }
  0xf7   : > { %v8842_v42 = vpop.f32.mrf.mxu0  ;;  %v8844_v55 = vpop.f32.mrf.mxu1 }
  0xf9   : > { %v6830_v17 = vpop.f32.mrf.mxu0  ;;  %v6871_v19 = vpop.f32.mrf.mxu1  ;;  %7114 = vmatmul.mubr.msk.f32.gmra.mxu0 %vm355_vm1, %v8389_v60  ;;  %7152 = vmatmul.mubr.msk.f32.gmra.mxu1 %vm355_vm1, %v8332_v48 }
  0xfa   : > { %v8850_v44 = vadd.f32 %v6871_v19, %v6827_v22  ;;  %7116 = vmatprep.mubr.msk.f32.mxu0 %vm355_vm1, %v8393_v62  ;;  %7154 = vmatprep.mubr.msk.f32.mxu1 %vm355_vm1, %v8338_v50  ;;  %v2367_v62 = vld [vmem:[%s8095_s8 + $0xf0] sm:$0xff] }
  0xfb   : > { %v8856_v46 = vpop.f32.mrf.mxu0  ;;  %v8858_v21 = vpop.f32.mrf.mxu1  ;;  %v2717_v22 = vld [vmem:[%s8095_s8 + $0xf1] sm:$0xff] }
  0xfd   : > { %v6833_v23 = vpop.f32.mrf.mxu0  ;;  %v6874_v10 = vpop.f32.mrf.mxu1  ;;  %7117 = vmatmul.mubr.msk.f32.gmra.mxu0 %vm355_vm1, %v8411_v1  ;;  %7155 = vmatmul.mubr.msk.f32.gmra.mxu1 %vm355_vm1, %v8352_v52 }
  0xfe   : > { %v8864_v48 = vadd.f32 %v6874_v10, %v6830_v17  ;;  %7119 = vmatprep.mubr.msk.f32.mxu0 %vm355_vm1, %v8606_v57  ;;  %7157 = vmatprep.mubr.msk.f32.mxu1 %vm355_vm1, %v8358_v54  ;;  %v2368_v54 = vld [vmem:[%s8095_s8 + $0xf8] sm:$0xff] }
  0xff   : > { %v8870_v50 = vpop.f32.mrf.mxu0  ;;  %v8872_v60 = vpop.f32.mrf.mxu1 }
 0x101   : > { %v6836_v29 = vpop.f32.mrf.mxu0  ;;  %v6877_v33 = vpop.f32.mrf.mxu1  ;;  %7120 = vmatmul.mubr.msk.f32.gmra.mxu0 %vm355_vm1, %v8622_v7  ;;  %7158 = vmatmul.mubr.msk.f32.gmra.mxu1 %vm355_vm1, %v8372_v56 }
 0x102   : > { %v8879_v52 = vadd.f32 %v6877_v33, %v6833_v23  ;;  %7122 = vmatprep.mubr.msk.f32.mxu0 %vm355_vm1, %v2367_v62  ;;  %7160 = vmatprep.mubr.msk.f32.mxu1 %vm355_vm1, %v8102_v2 }
 0x103   : > { %v8885_v57 = vpop.f32.mrf.mxu0  ;;  %v8887_v1 = vpop.f32.mrf.mxu1 }
 0x105   : > { %v6839_v18 = vpop.f32.mrf.mxu0  ;;  %v6880_v58 = vpop.f32.mrf.mxu1  ;;  %7123 = vmatmul.mubr.msk.f32.gmra.mxu0 %vm355_vm1, %v2368_v54  ;;  %7161 = vmatmul.mubr.msk.f32.gmra.mxu1 %vm355_vm1, %v8108_v4 }
 0x106   : > { %v8892_v56 = vadd.f32 %v6880_v58, %v6836_v29  ;;  %7163 = vmatprep.mubr.msk.f32.mxu1 %vm355_vm1, %v8719_v9  ;;  %7171 = vmatprep.mubr.msk.f32.mxu0 %vm355_vm1, %v8419_v5  ;;  %v2718_v5 = vld [vmem:[%s8095_s8 + $0xf9] sm:$0xff] }
 0x107   : > { %v8898_v2 = vpop.f32.mrf.mxu0  ;;  %v8900_v7 = vpop.f32.mrf.mxu1 }
 0x109   : > { %v6842_v11 = vpop.f32.mrf.mxu0  ;;  %v6883_v13 = vpop.f32.mrf.mxu1  ;;  %7164 = vmatmul.mubr.msk.f32.gmra.mxu1 %vm355_vm1, %v8730_v63  ;;  %7172 = vmatmul.mubr.msk.f32.vlgmr.msra.gmra.mxu0 %vm355_vm1, %v8432_v6 }
 0x10a   : > { %v8907_v4 = vadd.f32 %v6883_v13, %v6839_v18  ;;  %7166 = vmatprep.mubr.msk.f32.mxu1 %vm355_vm1, %v2717_v22  ;;  %7174 = vmatprep.mubr.msk.f32.mxu0 %vm355_vm1, %v8435_v8 }
 0x10b   : > { %v8913_v9 = vpop.f32.mrf.mxu0  ;;  %v8915_v15 = vpop.f32.mrf.mxu1 }
 0x10d   : > { %v6845_v17 = vpop.f32.mrf.mxu0  ;;  %v6886_v19 = vpop.f32.mrf.mxu1  ;;  %7167 = vmatmul.mubr.msk.f32.gmra.mxu1 %vm355_vm1, %v2718_v5  ;;  %7175 = vmatmul.mubr.msk.f32.gmra.mxu0 %vm355_vm1, %v8451_v12 }
 0x10e   : > { %v8920_v6 = vadd.f32 %v6886_v19, %v6842_v11  ;;  %7177 = vmatprep.mubr.msk.f32.mxu0 %vm355_vm1, %v8454_v25 }
 0x10f   : > { %v8924_v63 = vpop.f32.mrf.mxu0  ;;  %v8926_v8 = vpop.f32.mrf.mxu1 }
 0x111   : > { %v6848_v23 = vpop.f32.mrf.mxu0  ;;  %v6889_v10 = vpop.f32.mrf.mxu1  ;;  %7178 = vmatmul.mubr.msk.f32.gmra.mxu0 %vm355_vm1, %v8469_v14 }
 0x112   : > { %v8930_v62 = vadd.f32 %v6889_v10, %v6845_v17  ;;  %7180 = vmatprep.mubr.msk.f32.mxu0 %vm355_vm1, %v8472_v26 }
 0x113   : > { %v8934_v12 = vpop.f32.mrf.mxu0  ;;  %v8936_v29 = vpop.f32.mrf.mxu1 }
 0x115   : > { %v6851_v33 = vpop.f32.mrf.mxu0  ;;  %v6892_v25 = vpop.f32.mrf.mxu1  ;;  %7181 = vmatmul.mubr.msk.f32.gmra.mxu0 %vm355_vm1, %v8483_v37 }
 0x116   : > { %v8940_v54 = vadd.f32 %v6892_v25, %v6848_v23  ;;  %7183 = vmatprep.mubr.msk.f32.mxu0 %vm355_vm1, %v8486_v59 }
 0x117   : > { %v8944_v14 = vpop.f32.mrf.mxu0  ;;  %v8946_v18 = vpop.f32.mrf.mxu1 }
 0x119   : > { %v6854_v58 = vpop.f32.mrf.mxu0  ;;  %v6895_v26 = vpop.f32.mrf.mxu1  ;;  %7184 = vmatmul.mubr.msk.f32.gmra.mxu0 %vm355_vm1, %v8497_v61 }
 0x11a   : > { %v8950_v22 = vadd.f32 %v6895_v26, %v6851_v33  ;;  %7186 = vmatprep.mubr.msk.f32.mxu0 %vm355_vm1, %v8500_v24  ;;  %v3596_v26 = vld [vmem:[#allocation3 + $0xf8] sm:$0xff] }
 0x11b   : > { %v8954_v37 = vpop.f32.mrf.mxu0  ;;  %v8956_v11 = vpop.f32.mrf.mxu1  ;;  %7213 = vmatprep.subr.mxu1 %v3596_v26 }
 0x11c   : > { %7214 = vmatpush3.msra.mxu1 %v3596_v26 }
 0x11d   : > { %v6857_v13 = vpop.f32.mrf.mxu0  ;;  %v6898_v59 = vpop.f32.mrf.mxu1  ;;  %7187 = vmatmul.mubr.msk.f32.gmra.mxu0 %vm355_vm1, %v8511_v28 }
 0x11e   : > { %v8960_v5 = vadd.f32 %v6898_v59, %v6854_v58  ;;  %7189 = vmatprep.mubr.msk.f32.mxu0 %vm355_vm1, %v8514_v30 }
 0x11f   : > { %v8964_v61 = vpop.f32.mrf.mxu0  ;;  %v8966_v17 = vpop.f32.mrf.mxu1 }
 0x121   : > { %v6901_v19 = vpop.f32.mrf.mxu1  ;;  %v6909_v24 = vpop.f32.mrf.mxu0  ;;  %7190 = vmatmul.mubr.msk.f32.gmra.mxu0 %vm355_vm1, %v8525_v32 }
 0x122   : > { %v8970_v23 = vadd.f32 %v6901_v19, %v6857_v13  ;;  %v1264_v10 = vadd.f32 %v6909_v24, %v8822_v20  ;;  %7192 = vmatprep.mubr.msk.f32.mxu0 %vm355_vm1, %v8528_v34  ;;  %v3595_v19 = vld [vmem:[#allocation3 + $0xf0] sm:$0xff] }
 0x123   : > { %v8975_v28 = vpop.f32.mrf.mxu1  ;;  %v8977_v33 = vpop.f32.mrf.mxu0  ;;  %7215 = vmatprep.subr.mxu1 %v3595_v19 }
 0x124   : > { %7216 = vmatpush3.msra.mxu1 %v3595_v19 }
 0x125   : > { %v6904_v30 = vpop.f32.mrf.mxu1  ;;  %v6912_v25 = vpop.f32.mrf.mxu0  ;;  %7193 = vmatmul.mubr.msk.f32.gmra.mxu0 %vm355_vm1, %v8539_v36 }
 0x126   : > { %v8982_v58 = vadd.f32 %v6904_v30, %v8804_v27  ;;  %v1266_v32 = vadd.f32 %v6912_v25, %v8836_v40  ;;  %7195 = vmatprep.mubr.msk.f32.mxu0 %vm355_vm1, %v8542_v39  ;;  %v3594_v25 = vld [vmem:[#allocation3 + $0xe8] sm:$0xff] }
 0x127   : > { %v8987_v20 = vpop.f32.mrf.mxu1  ;;  %v8989_v34 = vpop.f32.mrf.mxu0  ;;  %7217 = vmatprep.subr.mxu1 %v3594_v25 }
 0x128   : > { %7218 = vmatpush3.msra.mxu1 %v3594_v25  ;;  %v3067_v25 = vld [vmem:[%s8095_s8 + $0xf2] sm:$0xff] }
 0x129   : > { %v6915_v13 = vpop.f32.mrf.mxu0  ;;  %v6953_v59 = vpop.f32.mrf.mxu1  ;;  %7196 = vmatmul.mubr.msk.f32.gmra.mxu0 %vm355_vm1, %v8553_v41 }
 0x12a   : > { %v1268_v36 = vadd.f32 %v6915_v13, %v8850_v44  ;;  %v8994_v27 = vadd.f32 %v6953_v59, %v1264_v10  ;;  %7198 = vmatprep.mubr.msk.f32.mxu0 %vm355_vm1, %v8556_v43  ;;  %v3593_v59 = vld [vmem:[#allocation3 + $0xe0] sm:$0xff] }
 0x12b   : > { %v8998_v39 = vpop.f32.mrf.mxu0  ;;  %v9000_v40 = vpop.f32.mrf.mxu1  ;;  %7219 = vmatprep.subr.mxu1 %v3593_v59 }
 0x12c   : > { %7220 = vmatpush3.msra.mxu1 %v3593_v59 }
 0x12d   : > { %v6918_v24 = vpop.f32.mrf.mxu0  ;;  %v6956_v30 = vpop.f32.mrf.mxu1  ;;  %7199 = vmatmul.mubr.msk.f32.gmra.mxu0 %vm355_vm1, %v8567_v45 }
 0x12e   : > { %v1270_v41 = vadd.f32 %v6918_v24, %v8864_v48  ;;  %v9005_v44 = vadd.f32 %v6956_v30, %v1266_v32  ;;  %7201 = vmatprep.mubr.msk.f32.mxu0 %vm355_vm1, %v8570_v47 }
 0x12f   : > { %v9009_v43 = vpop.f32.mrf.mxu0  ;;  %v9011_v10 = vpop.f32.mrf.mxu1 }
 0x131   : > { %v6921_v26 = vpop.f32.mrf.mxu0  ;;  %v6959_v13 = vpop.f32.mrf.mxu1  ;;  %7202 = vmatmul.mubr.msk.f32.gmra.mxu0 %vm355_vm1, %v8581_v49 }
 0x132   : > { %v1272_v45 = vadd.f32 %v6921_v26, %v8879_v52  ;;  %v9016_v48 = vadd.f32 %v6959_v13, %v1268_v36  ;;  %7204 = vmatprep.mubr.msk.f32.mxu0 %vm355_vm1, %v8584_v51  ;;  %v3592_v51 = vld [vmem:[#allocation3 + $0xd8] sm:$0xff]  ;;  %v3591_v13 = vld [vmem:[#allocation3 + $0xd0] sm:$0xff] }
 0x133   : > { %v9020_v47 = vpop.f32.mrf.mxu0  ;;  %v9022_v32 = vpop.f32.mrf.mxu1  ;;  %7221 = vmatprep.subr.mxu1 %v3592_v51 }
 0x134   : > { %7222 = vmatpush3.msra.mxu1 %v3592_v51 }
 0x135   : > { %v6924_v19 = vpop.f32.mrf.mxu0  ;;  %v6962_v24 = vpop.f32.mrf.mxu1  ;;  %7205 = vmatmul.mubr.msk.f32.gmra.mxu0 %vm355_vm1, %v8595_v53  ;;  %7223 = vmatprep.subr.mxu1 %v3591_v13 }
 0x136   : > { %v1274_v49 = vadd.f32 %v6924_v19, %v8892_v56  ;;  %v9027_v52 = vadd.f32 %v6962_v24, %v1270_v41  ;;  %7207 = vmatprep.mubr.msk.f32.mxu0 %vm355_vm1, %v8741_v0  ;;  %v3068_v0 = vld [vmem:[%s8095_s8 + $0xfa] sm:$0xff]  ;;  %7224 = vmatpush3.msra.mxu1 %v3591_v13 }
 0x137   : > { %v9031_v36 = vpop.f32.mrf.mxu0  ;;  %v9033_v30 = vpop.f32.mrf.mxu1  ;;  %v4006_v13 = vld [vmem:[#allocation3 + $0x170] sm:$0xff] }
 0x138   : > { %10634 = vst [vmem:[#allocation9_spill] sm:$0xff] %v9031_v36  ;;  %10635 = vst [vmem:[#allocation10_spill] sm:$0xff] %v9033_v30 }
 0x139   : > { %v6927_v26 = vpop.f32.mrf.mxu0  ;;  %v6965_v53 = vpop.f32.mrf.mxu1  ;;  %7208 = vmatmul.mubr.msk.f32.gmra.mxu0 %vm355_vm1, %v8752_v3 }
 0x13a   : > { %v1276_v56 = vadd.f32 %v6927_v26, %v8907_v4  ;;  %v9039_v41 = vadd.f32 %v6965_v53, %v1272_v45  ;;  %7210 = vmatprep.mubr.msk.f32.mxu0 %vm355_vm1, %v3067_v25  ;;  %v3590_v4 = vld [vmem:[#allocation3 + $0xc8] sm:$0xff]  ;;  %v4007_v26 = vld [vmem:[#allocation3 + $0x178] sm:$0xff] }
 0x13b   : > { %v9043_v59 = vpop.f32.mrf.mxu0  ;;  %v9045_v19 = vpop.f32.mrf.mxu1  ;;  %7225 = vmatprep.subr.mxu1 %v3590_v4  ;;  %7349 = vmatprep.subr.mxu0 %v4007_v26 }
 0x13c   : > { %10636 = vst [vmem:[#allocation11_spill] sm:$0xff] %v9043_v59  ;;  %10637 = vst [vmem:[#allocation12_spill] sm:$0xff] %v9045_v19  ;;  %7226 = vmatpush3.msra.mxu1 %v3590_v4  ;;  %7350 = vmatpush3.msra.mxu0 %v4007_v26  ;;  %v3588_v4 = vld [vmem:[#allocation3 + $0xb8] sm:$0xff]  ;;  %v4004_v26 = vld [vmem:[#allocation3 + $0x160] sm:$0xff] }
 0x13d   : > { %v6930_v24 = vpop.f32.mrf.mxu0  ;;  %v6968_v51 = vpop.f32.mrf.mxu1  ;;  %7211 = vmatmul.mubr.msk.f32.gmra.mxu0 %vm355_vm1, %v3068_v0  ;;  %7351 = vmatprep.subr.mxu0 %v4006_v13 }
 0x13e   : > { %v1278_v3 = vadd.f32 %v6930_v24, %v8920_v6  ;;  %v9049_v30 = vadd.f32 %v6968_v51, %v1274_v49  ;;  %v3589_v6 = vld [vmem:[#allocation3 + $0xc0] sm:$0xff]  ;;  %7352 = vmatpush3.msra.mxu0 %v4006_v13  ;;  %v4005_v51 = vld [vmem:[#allocation3 + $0x168] sm:$0xff]  ;;  %v4003_v13 = vld [vmem:[#allocation3 + $0x158] sm:$0xff] }
 0x13f   : > { %v9051_v45 = vpop.f32.mrf.mxu0  ;;  %v9053_v25 = vpop.f32.mrf.mxu1  ;;  %7227 = vmatprep.subr.mxu1 %v3589_v6  ;;  %7353 = vmatprep.subr.mxu0 %v4005_v51 }
 0x140   : > { %10638 = vst [vmem:[#allocation13_spill] sm:$0xff] %v9051_v45  ;;  %10639 = vst [vmem:[#allocation14_spill] sm:$0xff] %v9053_v25  ;;  %7228 = vmatpush3.msra.mxu1 %v3589_v6  ;;  %7354 = vmatpush3.msra.mxu0 %v4005_v51  ;;  %v3587_v6 = vld [vmem:[#allocation3 + $0xb0] sm:$0xff] }
 0x141   : > { %v6933_v53 = vpop.f32.mrf.mxu0  ;;  %v6971_v19 = vpop.f32.mrf.mxu1  ;;  %7229 = vmatprep.subr.mxu1 %v3588_v4  ;;  %7355 = vmatprep.subr.mxu0 %v4004_v26  ;;  %v4002_v51 = vld [vmem:[#allocation3 + $0x150] sm:$0xff] }
 0x142   : > { %v1280_v59 = vadd.f32 %v6933_v53, %v8930_v62  ;;  %v9056_v0 = vadd.f32 %v6971_v19, %v1276_v56  ;;  %7230 = vmatpush3.msra.mxu1 %v3588_v4  ;;  %7356 = vmatpush3.msra.mxu0 %v4004_v26 }
 0x143   : > { %v9058_v49 = vpop.f32.mrf.mxu0  ;;  %v9060_v24 = vpop.f32.mrf.mxu1  ;;  %7357 = vmatprep.subr.mxu0 %v4003_v13  ;;  %7231 = vmatprep.subr.mxu1 %v3587_v6 }
 0x144   : > { %10640 = vst [vmem:[#allocation15_spill] sm:$0xff] %v9058_v49  ;;  %10641 = vst [vmem:[#allocation16_spill] sm:$0xff] %v9060_v24  ;;  %7358 = vmatpush3.msra.mxu0 %v4003_v13  ;;  %7232 = vmatpush3.msra.mxu1 %v3587_v6 }
 0x145   : > { %v6936_v25 = vpop.f32.mrf.mxu0  ;;  %v6974_v45 = vpop.f32.mrf.mxu1  ;;  %7359 = vmatprep.subr.mxu0 %v4002_v51 }
 0x146   : > { %v1282_v62 = vadd.f32 %v6936_v25, %v8940_v54  ;;  %v9063_v56 = vadd.f32 %v6974_v45, %v1278_v3  ;;  %7360 = vmatpush3.msra.mxu0 %v4002_v51  ;;  %v4001_v25 = vld [vmem:[#allocation3 + $0x148] sm:$0xff] }
 0x147   : > { %v9065_v19 = vpop.f32.mrf.mxu0  ;;  %v9067_v53 = vpop.f32.mrf.mxu1  ;;  %7361 = vmatprep.subr.mxu0 %v4001_v25 }
 0x148   : > { %10642 = vst [vmem:[#allocation17_spill] sm:$0xff] %v9065_v19  ;;  %10643 = vst [vmem:[#allocation18_spill] sm:$0xff] %v9067_v53  ;;  %7362 = vmatpush3.msra.mxu0 %v4001_v25  ;;  %v4000_v53 = vld [vmem:[#allocation3 + $0x140] sm:$0xff]  ;;  %v3998_v25 = vld [vmem:[#allocation3 + $0x130] sm:$0xff] }
 0x149   : > { %v6939_v24 = vpop.f32.mrf.mxu0  ;;  %v6977_v49 = vpop.f32.mrf.mxu1  ;;  %7363 = vmatprep.subr.mxu0 %v4000_v53 }
 0x14a   : > { %v1284_v36 = vadd.f32 %v6939_v24, %v8950_v22  ;;  %v9070_v54 = vadd.f32 %v6977_v49, %v1280_v59  ;;  %7364 = vmatpush3.msra.mxu0 %v4000_v53  ;;  %v3999_v49 = vld [vmem:[#allocation3 + $0x138] sm:$0xff] }
 0x14b   : > { %v9072_v3 = vpop.f32.mrf.mxu0  ;;  %v9074_v45 = vpop.f32.mrf.mxu1  ;;  %7365 = vmatprep.subr.mxu0 %v3999_v49 }
 0x14c   : > { %10644 = vst [vmem:[#allocation19_spill] sm:$0xff] %v9072_v3  ;;  %10645 = vst [vmem:[#allocation20_spill] sm:$0xff] %v9074_v45  ;;  %7366 = vmatpush3.msra.mxu0 %v3999_v49  ;;  %v3996_v49 = vld [vmem:[#allocation3 + $0x120] sm:$0xff] }
 0x14d   : > { %v6942_v4 = vpop.f32.mrf.mxu0  ;;  %v6980_v26 = vpop.f32.mrf.mxu1  ;;  %7367 = vmatprep.subr.mxu0 %v3998_v25 }
 0x14e   : > { %v1286_v13 = vadd.f32 %v6942_v4, %v8960_v5  ;;  %v9077_v19 = vadd.f32 %v6980_v26, %v1282_v62  ;;  %v3586_v62 = vld [vmem:[#allocation3 + $0xa8] sm:$0xff]  ;;  %7368 = vmatpush3.msra.mxu0 %v3998_v25  ;;  %v3584_v25 = vld [vmem:[#allocation3 + $0x98] sm:$0xff] }
 0x14f   : > { %v9079_v22 = vpop.f32.mrf.mxu0  ;;  %v9081_v59 = vpop.f32.mrf.mxu1  ;;  %7233 = vmatprep.subr.mxu1 %v3586_v62  ;;  %v3997_v4 = vld [vmem:[#allocation3 + $0x128] sm:$0xff] }
 0x150   : > { %10646 = vst [vmem:[#allocation21_spill] sm:$0xff] %v9081_v59  ;;  %7234 = vmatpush3.msra.mxu1 %v3586_v62  ;;  %7369 = vmatprep.subr.mxu0 %v3997_v4 }
 0x151   : > { %v6945_v24 = vpop.f32.mrf.mxu0  ;;  %v6983_v6 = vpop.f32.mrf.mxu1  ;;  %7370 = vmatpush3.msra.mxu0 %v3997_v4  ;;  %v3583_v4 = vld [vmem:[#allocation3 + $0x90] sm:$0xff] }
 0x152   : > { %v1288_v51 = vadd.f32 %v6945_v24, %v8970_v23  ;;  %v9084_v45 = vadd.f32 %v6983_v6, %v1284_v36  ;;  %v3585_v36 = vld [vmem:[#allocation3 + $0xa0] sm:$0xff]  ;;  %7371 = vmatprep.subr.mxu0 %v3996_v49 }
 0x153   : > { %v9086_v3 = vpop.f32.mrf.mxu0  ;;  %v9088_v5 = vpop.f32.mrf.mxu1  ;;  %7235 = vmatprep.subr.mxu1 %v3585_v36  ;;  %7372 = vmatpush3.msra.mxu0 %v3996_v49  ;;  %v3993_v49 = vld [vmem:[#allocation3 + $0x108] sm:$0xff] }
 0x154   : > { %10647 = vst [vmem:[#allocation22_spill] sm:$0xff] %v9086_v3  ;;  %10648 = vst [vmem:[#allocation23_spill] sm:$0xff] %v9088_v5  ;;  %7236 = vmatpush3.msra.mxu1 %v3585_v36  ;;  %v3995_v5 = vld [vmem:[#allocation3 + $0x118] sm:$0xff]  ;;  %v3582_v36 = vld [vmem:[#allocation3 + $0x88] sm:$0xff] }
 0x155   : > { %v6948_v53 = vpop.f32.mrf.mxu0  ;;  %v6986_v26 = vpop.f32.mrf.mxu1  ;;  %7237 = vmatprep.subr.mxu1 %v3584_v25  ;;  %7373 = vmatprep.subr.mxu0 %v3995_v5 }
 0x156   : > { %v1290_v59 = vadd.f32 %v6948_v53, %v8982_v58  ;;  %v9091_v23 = vadd.f32 %v6986_v26, %v1286_v13  ;;  %7238 = vmatpush3.msra.mxu1 %v3584_v25  ;;  %7374 = vmatpush3.msra.mxu0 %v3995_v5  ;;  %v3994_v53 = vld [vmem:[#allocation3 + $0x110] sm:$0xff]  ;;  %v3581_v5 = vld [vmem:[#allocation3 + $0x80] sm:$0xff] }
 0x157   : > { %v9093_v24 = vpop.f32.mrf.mxu0  ;;  %v9095_v6 = vpop.f32.mrf.mxu1  ;;  %7239 = vmatprep.subr.mxu1 %v3583_v4  ;;  %7375 = vmatprep.subr.mxu0 %v3994_v53  ;;  %v3992_v25 = vld [vmem:[#allocation3 + $0x100] sm:$0xff] }
 0x158   : > { %10649 = vst [vmem:[#allocation24_spill] sm:$0xff] %v9093_v24  ;;  %10650 = vst [vmem:[#allocation25_spill] sm:$0xff] %v9095_v6  ;;  %7240 = vmatpush3.msra.mxu1 %v3583_v4  ;;  %7376 = vmatpush3.msra.mxu0 %v3994_v53 }
 0x159   : > { %v6989_v3 = vpop.f32.mrf.mxu1  ;;  %v6997_v62 = vpop.f32.mrf.mxu0  ;;  %7241 = vmatprep.subr.mxu1 %v3582_v36  ;;  %7377 = vmatprep.subr.mxu0 %v3993_v49 }
 0x15a   : > { %v9097_v58 = vadd.f32 %v6989_v3, %v1288_v51  ;;  %v9100_v13 = vadd.f32 %v6997_v62, %v8994_v27  ;;  %7242 = vmatpush3.msra.mxu1 %v3582_v36  ;;  %7378 = vmatpush3.msra.mxu0 %v3993_v49 }
 0x15b   : > { %v9102_v26 = vpop.f32.mrf.mxu1  ;;  %v9104_v6 = vpop.f32.mrf.mxu0  ;;  %7243 = vmatprep.subr.mxu1 %v3581_v5  ;;  %7379 = vmatprep.subr.mxu0 %v3992_v25 }
 0x15c   : > { %10651 = vst [vmem:[#allocation26_spill] sm:$0xff] %v9102_v26  ;;  %7244 = vmatpush3.msra.mxu1 %v3581_v5  ;;  %7380 = vmatpush3.msra.mxu0 %v3992_v25  ;;  %v9133_v25 = vld [vmem:[#allocation3 + $0x78] sm:$0xff] }
 0x15d   : > { %v6992_v24 = vpop.f32.mrf.mxu1  ;;  %v7000_v3 = vpop.f32.mrf.mxu0  ;;  %10660 = vst [vmem:[#allocation35_spill] sm:$0xff] %v9133_v25  ;;  %7281 = vmatprep.subr.mxu1 %v9133_v25  ;;  %v9156_v25 = vld [vmem:[#allocation3 + $0x278] sm:$0xff] }
 0x15e   : > { %v9106_v27 = vadd.f32 %v6992_v24, %v1290_v59  ;;  %v9109_v51 = vadd.f32 %v7000_v3, %v9005_v44  ;;  %10668 = vst [vmem:[#allocation43_spill] sm:$0xff] %v9156_v25  ;;  %7485 = vmatprep.subr.mxu0 %v9156_v25 }
 0x15f   : > { %v9111_v62 = vpop.f32.mrf.mxu1  ;;  %v9113_v26 = vpop.f32.mrf.mxu0 }
 0x160   : > { %10652 = vst [vmem:[#allocation27_spill] sm:$0xff] %v9109_v51  ;;  %10653 = vst [vmem:[#allocation28_spill] sm:$0xff] %v9111_v62 }
 0x161   : > { %10654 = vst [vmem:[#allocation29_spill] sm:$0xff] %v9113_v26  ;;  %v7003_v4 = vpop.f32.mrf.mxu0  ;;  %v9115_v53 = vpop.f32.mrf.mxu1 }
 0x162   : > { %v9118_v59 = vadd.f32 %v7003_v4, %v9016_v48 }
 0x163   : > { %v9120_v44 = vpop.f32.mrf.mxu0  ;;  %v9122_v24 = vpop.f32.mrf.mxu1 }
 0x164   : > { %10655 = vst [vmem:[#allocation30_spill] sm:$0xff] %v9118_v59  ;;  %10656 = vst [vmem:[#allocation31_spill] sm:$0xff] %v9120_v44 }
 0x165   : > { %v7006_v36 = vpop.f32.mrf.mxu0  ;;  %v9124_v49 = vpop.f32.mrf.mxu1 }
 0x166   : > { %v9127_v3 = vadd.f32 %v7006_v36, %v9027_v52 }
 0x167   : > { %v9129_v62 = vpop.f32.mrf.mxu0  ;;  %v9131_v5 = vpop.f32.mrf.mxu1 }
 0x168   : > { %10657 = vst [vmem:[#allocation32_spill] sm:$0xff] %v9127_v3  ;;  %10658 = vst [vmem:[#allocation33_spill] sm:$0xff] %v9129_v62 }
 0x169   : > { %10659 = vst [vmem:[#allocation34_spill] sm:$0xff] %v9131_v5  ;;  %v7009_v26 = vpop.f32.mrf.mxu0  ;;  %v9135_v51 = vpop.f32.mrf.mxu1 }
 0x16a   : > { %10661 = vst [vmem:[#allocation36_spill] sm:$0xff] %v9135_v51  ;;  %v9139_v48 = vadd.f32 %v7009_v26, %v9039_v41 }
 0x16b   : > { %v9141_v4 = vpop.f32.mrf.mxu0  ;;  %v9143_v59 = vpop.f32.mrf.mxu1 }
 0x16c   : > { %10662 = vst [vmem:[#allocation37_spill] sm:$0xff] %v9139_v48 }
 0x16d   : > { %v7012_v52 = vpop.f32.mrf.mxu0  ;;  %v9145_v36 = vpop.f32.mrf.mxu1 }
 0x16e   : > { %10663 = vst [vmem:[#allocation38_spill] sm:$0xff] %v9145_v36  ;;  %v9148_v3 = vadd.f32 %v7012_v52, %v9049_v30 }
 0x16f   : > { %v9150_v5 = vpop.f32.mrf.mxu0  ;;  %v9152_v62 = vpop.f32.mrf.mxu1 }
 0x170   : > { %10664 = vst [vmem:[#allocation39_spill] sm:$0xff] %v9148_v3  ;;  %10665 = vst [vmem:[#allocation40_spill] sm:$0xff] %v9150_v5 }
 0x171   : > { %10666 = vst [vmem:[#allocation41_spill] sm:$0xff] %v9152_v62  ;;  %v7015_v51 = vpop.f32.mrf.mxu0  ;;  %v9154_v44 = vpop.f32.mrf.mxu1 }
 0x172   : > { %10667 = vst [vmem:[#allocation42_spill] sm:$0xff] %v9154_v44  ;;  %v9159_v41 = vadd.f32 %v7015_v51, %v9056_v0 }
 0x173   : > { %v9162_v26 = vpop.f32.mrf.mxu0  ;;  %v9164_v48 = vpop.f32.mrf.mxu1 }
 0x174   : > { %10669 = vst [vmem:[#allocation44_spill] sm:$0xff] %v9159_v41  ;;  %10670 = vst [vmem:[#allocation45_spill] sm:$0xff] %v9162_v26 }
 0x175   : > { %10671 = vst [vmem:[#allocation46_spill] sm:$0xff] %v9164_v48  ;;  %v7018_v30 = vpop.f32.mrf.mxu0  ;;  %v9166_v52 = vpop.f32.mrf.mxu1 }
 0x176   : > { %10672 = vst [vmem:[#allocation47_spill] sm:$0xff] %v9166_v52  ;;  %v9169_v3 = vadd.f32 %v7018_v30, %v9063_v56 }
 0x177   : > { %v9171_v62 = vpop.f32.mrf.mxu0  ;;  %v9173_v44 = vpop.f32.mrf.mxu1 }
 0x178   : > { %10673 = vst [vmem:[#allocation48_spill] sm:$0xff] %v9169_v3  ;;  %10674 = vst [vmem:[#allocation49_spill] sm:$0xff] %v9171_v62 }
 0x179   : > { %10675 = vst [vmem:[#allocation50_spill] sm:$0xff] %v9173_v44  ;;  %v7021_v5 = vpop.f32.mrf.mxu0  ;;  %v9175_v36 = vpop.f32.mrf.mxu1 }
 0x17a   : > { %10676 = vst [vmem:[#allocation51_spill] sm:$0xff] %v9175_v36  ;;  %v9178_v0 = vadd.f32 %v7021_v5, %v9070_v54 }
 0x17b   : > { %v9180_v51 = vpop.f32.mrf.mxu0  ;;  %v9182_v25 = vpop.f32.mrf.mxu1 }
 0x17c   : > { %10677 = vst [vmem:[#allocation52_spill] sm:$0xff] %v9178_v0  ;;  %10678 = vst [vmem:[#allocation53_spill] sm:$0xff] %v9180_v51 }
 0x17d   : > { %10679 = vst [vmem:[#allocation54_spill] sm:$0xff] %v9182_v25  ;;  %v7024_v41 = vpop.f32.mrf.mxu0  ;;  %v9184_v48 = vpop.f32.mrf.mxu1 }
 0x17e   : > { %10680 = vst [vmem:[#allocation55_spill] sm:$0xff] %v9184_v48  ;;  %v9187_v56 = vadd.f32 %v7024_v41, %v9077_v19 }
 0x17f   : > { %v9189_v30 = vpop.f32.mrf.mxu0  ;;  %v9191_v3 = vpop.f32.mrf.mxu1 }
 0x180   : > { %10681 = vst [vmem:[#allocation56_spill] sm:$0xff] %v9187_v56  ;;  %10682 = vst [vmem:[#allocation57_spill] sm:$0xff] %v9189_v30 }
 0x181   : > { %10683 = vst [vmem:[#allocation58_spill] sm:$0xff] %v9191_v3  ;;  %v7027_v44 = vpop.f32.mrf.mxu0  ;;  %v9193_v62 = vpop.f32.mrf.mxu1 }
 0x182   : > { %10684 = vst [vmem:[#allocation59_spill] sm:$0xff] %v9193_v62  ;;  %v9196_v54 = vadd.f32 %v7027_v44, %v9084_v45 }
 0x183   : > { %v9198_v5 = vpop.f32.mrf.mxu0  ;;  %v9200_v0 = vpop.f32.mrf.mxu1 }
 0x184   : > { %10685 = vst [vmem:[#allocation60_spill] sm:$0xff] %v9196_v54  ;;  %10686 = vst [vmem:[#allocation61_spill] sm:$0xff] %v9198_v5 }
 0x185   : > { %10687 = vst [vmem:[#allocation62_spill] sm:$0xff] %v9200_v0  ;;  %v7030_v25 = vpop.f32.mrf.mxu0  ;;  %v9202_v51 = vpop.f32.mrf.mxu1 }
 0x186   : > { %10688 = vst [vmem:[#allocation63_spill] sm:$0xff] %v9202_v51  ;;  %v9205_v19 = vadd.f32 %v7030_v25, %v9091_v23 }
 0x187   : > { %v9207_v41 = vpop.f32.mrf.mxu0  ;;  %v9209_v56 = vpop.f32.mrf.mxu1 }
 0x188   : > { %10689 = vst [vmem:[#allocation64_spill] sm:$0xff] %v9205_v19  ;;  %10690 = vst [vmem:[#allocation65_spill] sm:$0xff] %v9207_v41  ;;  %v7980_v41 = vmov 0.0  }
 0x189   : > { %10691 = vst [vmem:[#allocation66_spill] sm:$0xff] %v9209_v56  ;;  %v7033_v3 = vpop.f32.mrf.mxu0  ;;  %v9211_v30 = vpop.f32.mrf.mxu1  ;;  %3515 = vst [vmem:[#allocation2 + $0xe0] sm:$0xff] %v7980_v41 }
 0x18a   : > { %10692 = vst [vmem:[#allocation67_spill] sm:$0xff] %v9211_v30  ;;  %v9214_v45 = vadd.f32 %v7033_v3, %v9097_v58 }
 0x18b   : > { %v9216_v44 = vpop.f32.mrf.mxu0  ;;  %v9218_v54 = vpop.f32.mrf.mxu1 }
 0x18c   : > { %10693 = vst [vmem:[#allocation68_spill] sm:$0xff] %v9214_v45  ;;  %10694 = vst [vmem:[#allocation69_spill] sm:$0xff] %v9216_v44 }
 0x18d   : > { %10695 = vst [vmem:[#allocation70_spill] sm:$0xff] %v9218_v54  ;;  %v7036_v0 = vpop.f32.mrf.mxu0  ;;  %v9220_v5 = vpop.f32.mrf.mxu1 }
 0x18e   : > { %10696 = vst [vmem:[#allocation71_spill] sm:$0xff] %v9220_v5  ;;  %v9223_v23 = vadd.f32 %v7036_v0, %v9106_v27 }
 0x18f   : > { %v9225_v25 = vpop.f32.mrf.mxu0  ;;  %v9227_v19 = vpop.f32.mrf.mxu1 }
 0x190   : > { %10697 = vst [vmem:[#allocation72_spill] sm:$0xff] %v9223_v23  ;;  %10698 = vst [vmem:[#allocation73_spill] sm:$0xff] %v9225_v25 }
 0x191   : > { %10699 = vst [vmem:[#allocation74_spill] sm:$0xff] %v9227_v19  ;;  %v9229_v56 = vpop.f32.mrf.mxu1  ;;  %v9231_v30 = vpop.f32.mrf.mxu0 }
 0x192   : > { %10700 = vst [vmem:[#allocation75_spill] sm:$0xff] %v9229_v56 }
 0x193   : > { %v9233_v58 = vpop.f32.mrf.mxu1  ;;  %v9235_v3 = vpop.f32.mrf.mxu0 }
 0x194   : > { %10701 = vst [vmem:[#allocation76_spill] sm:$0xff] %v9233_v58 }
 0x195   : > { %v9237_v45 = vpop.f32.mrf.mxu1  ;;  %v9239_v54 = vpop.f32.mrf.mxu0 }
 0x196   : > { %10702 = vst [vmem:[#allocation77_spill] sm:$0xff] %v9237_v45 }
 0x197   : > { %v9241_v5 = vpop.f32.mrf.mxu1  ;;  %v9243_v27 = vpop.f32.mrf.mxu0 }
 0x198   : > { %10703 = vst [vmem:[#allocation78_spill] sm:$0xff] %v9241_v5 }
 0x199   : > { %v9245_v0 = vpop.f32.mrf.mxu0  ;;  %v9247_v23 = vpop.f32.mrf.mxu1 }
 0x19b   : > { %v9249_v19 = vpop.f32.mrf.mxu0  ;;  %v9251_v56 = vpop.f32.mrf.mxu1 }
 0x19d   : > { %v9253_v25 = vpop.f32.mrf.mxu0  ;;  %v9255_v58 = vpop.f32.mrf.mxu1 }
 0x19e   : > { %10704 = vst [vmem:[#allocation79_spill] sm:$0xff] %v9253_v25 }
 0x19f   : > { %v9257_v44 = vpop.f32.mrf.mxu0  ;;  %v9259_v45 = vpop.f32.mrf.mxu1 }
 0x1a0   : > { %10705 = vst [vmem:[#allocation80_spill] sm:$0xff] %v9257_v44  ;;  %10706 = vst [vmem:[#allocation81_spill] sm:$0xff] %v9259_v45 }
 0x1a1   : > { %v9261_v5 = vpop.f32.mrf.mxu0  ;;  %v9263_v51 = vpop.f32.mrf.mxu1 }
 0x1a2   : > { %10707 = vst [vmem:[#allocation82_spill] sm:$0xff] %v9261_v5  ;;  %10708 = vst [vmem:[#allocation83_spill] sm:$0xff] %v9263_v51 }
 0x1a3   : > { %v9265_v62 = vpop.f32.mrf.mxu0  ;;  %v9267_v48 = vpop.f32.mrf.mxu1 }
 0x1a4   : > { %10709 = vst [vmem:[#allocation84_spill] sm:$0xff] %v9265_v62  ;;  %10710 = vst [vmem:[#allocation85_spill] sm:$0xff] %v9267_v48 }
 0x1a5   : > { %v9269_v36 = vpop.f32.mrf.mxu0  ;;  %v9271_v52 = vpop.f32.mrf.mxu1 }
 0x1a6   : > { %10711 = vst [vmem:[#allocation86_spill] sm:$0xff] %v9269_v36  ;;  %10712 = vst [vmem:[#allocation87_spill] sm:$0xff] %v9271_v52 }
 0x1a7   : > { %v9273_v25 = vpop.f32.mrf.mxu0  ;;  %v9277_v44 = vpop.f32.mrf.mxu1 }
 0x1a8   : > { %10713 = vst [vmem:[#allocation88_spill] sm:$0xff] %v9273_v25  ;;  %10715 = vst [vmem:[#allocation90_spill] sm:$0xff] %v9277_v44 }
 0x1a9   : > { %v9275_v26 = vpop.f32.mrf.mxu0  ;;  %v9283_v5 = vpop.f32.mrf.mxu1 }
 0x1aa   : > { %10714 = vst [vmem:[#allocation89_spill] sm:$0xff] %v9275_v26  ;;  %10718 = vst [vmem:[#allocation93_spill] sm:$0xff] %v9283_v5 }
 0x1ab   : > { %v9279_v45 = vpop.f32.mrf.mxu0  ;;  %v9289_v48 = vpop.f32.mrf.mxu1 }
 0x1ac   : > { %10716 = vst [vmem:[#allocation91_spill] sm:$0xff] %v9279_v45 }
 0x1ad   : > { %v9281_v41 = vpop.f32.mrf.mxu0  ;;  %v9295_v25 = vpop.f32.mrf.mxu1 }
 0x1ae   : > { %10717 = vst [vmem:[#allocation92_spill] sm:$0xff] %v9281_v41 }
 0x1af   : > { %v9285_v51 = vpop.f32.mrf.mxu0  ;;  %v9301_v45 = vpop.f32.mrf.mxu1 }
 0x1b0   : > { %10719 = vst [vmem:[#allocation94_spill] sm:$0xff] %v9285_v51 }
 0x1b1   : > { %v9287_v62 = vpop.f32.mrf.mxu0  ;;  %v9315_v51 = vpop.f32.mrf.mxu1 }
 0x1b2   : > { %10720 = vst [vmem:[#allocation95_spill] sm:$0xff] %v9287_v62  ;;  %v803_v62 = vadd.f32 %v8830_v38, %v8814_v31  ;;  %v863_v31 = vadd.f32 %v8915_v15, %v8898_v2 }
 0x1b3   : > { %v9291_v36 = vpop.f32.mrf.mxu0 }
 0x1b4   : > { %10721 = vst [vmem:[#allocation96_spill] sm:$0xff] %v9291_v36  ;;  %v813_v36 = vadd.f32 %v8844_v55, %v8828_v35  ;;  %v873_v35 = vadd.f32 %v8926_v8, %v8913_v9  ;;  %v893_v55 = vadd.f32 %v8946_v18, %v8934_v12  ;;  %v933_v9 = vadd.f32 %v8987_v20, %v8816_v16  ;;  %v9347_v8 = vpop.f32.mrf.mxu1 }
 0x1b5   : > { %v9293_v52 = vpop.f32.mrf.mxu0 }
 0x1b6   : > { %10722 = vst [vmem:[#allocation97_spill] sm:$0xff] %v9293_v52  ;;  %v823_v52 = vadd.f32 %v8858_v21, %v8842_v42  ;;  %v883_v42 = vadd.f32 %v8936_v29, %v8924_v63  ;;  %v1265_v21 = vadd.f32 %v8989_v34, %v813_v36  ;;  %v2314_v34 = vadd.f32 %v9115_v53, %v9100_v13  ;;  %v9372_v13 = vpop.f32.mrf.mxu1  ;;  %v10736_v53 = vld [vmem:[#allocation19_spill] sm:$0xff] }
 0x1b7   : > { %v9297_v26 = vpop.f32.mrf.mxu0 }
 0x1b8   : > { %10723 = vst [vmem:[#allocation98_spill] sm:$0xff] %v9297_v26  ;;  %v833_v26 = vadd.f32 %v8872_v60, %v8856_v46  ;;  %v1263_v46 = vadd.f32 %v8977_v33, %v803_v62  ;;  %v913_v60 = vadd.f32 %v8966_v17, %v8954_v37  ;;  %v1615_v63 = vadd.f32 %v9011_v10, %v1265_v21  ;;  %v10727_v37 = vld [vmem:[#allocation10_spill] sm:$0xff]  ;;  %v10729_v33 = vld [vmem:[#allocation13_spill] sm:$0xff]  ;;  %v10737_v21 = vld [vmem:[#allocation20_spill] sm:$0xff] }
 0x1b9   : > { %v9299_v44 = vpop.f32.mrf.mxu0  ;;  %v1277_v16 = vadd.f32 %v10729_v33, %v873_v35  ;;  %v10733_v62 = vld [vmem:[#allocation17_spill] sm:$0xff]  ;;  %v2664_v35 = vadd.f32 %v9231_v30, %v2314_v34  ;;  %v10745_v34 = vld [vmem:[#allocation26_spill] sm:$0xff] }
 0x1ba   : > { %10724 = vst [vmem:[#allocation99_spill] sm:$0xff] %v9299_v44  ;;  %v843_v44 = vadd.f32 %v8887_v1, %v8870_v50  ;;  %v903_v50 = vadd.f32 %v8956_v11, %v8944_v14  ;;  %v1269_v1 = vadd.f32 %v9009_v43, %v833_v26  ;;  %v1613_v15 = vadd.f32 %v9000_v40, %v1263_v46  ;;  %v10726_v14 = vld [vmem:[#allocation9_spill] sm:$0xff]  ;;  %v10731_v43 = vld [vmem:[#allocation14_spill] sm:$0xff] }
 0x1bb   : > { %v9303_v41 = vpop.f32.mrf.mxu0  ;;  %v1281_v36 = vadd.f32 %v10733_v62, %v893_v55  ;;  %v10738_v55 = vld [vmem:[#allocation21_spill] sm:$0xff] }
 0x1bc   : > { %v1271_v12 = vadd.f32 %v9020_v47, %v843_v44  ;;  %v1619_v11 = vadd.f32 %v10727_v37, %v1269_v1  ;;  %v1963_v20 = vadd.f32 %v9104_v6, %v1613_v15  ;;  %v10732_v47 = vld [vmem:[#allocation15_spill] sm:$0xff]  ;;  %v10735_v44 = vld [vmem:[#allocation18_spill] sm:$0xff]  ;;  %v1283_v46 = vadd.f32 %v10736_v53, %v903_v50 }
 0x1bd   : > { %v9305_v5 = vpop.f32.mrf.mxu0  ;;  %v9380_v1 = vadd.f32 %v10738_v55, %v1281_v36  ;;  %v3014_v37 = vadd.f32 %v9247_v23, %v2664_v35  ;;  %v10741_v50 = vld [vmem:[#allocation23_spill] sm:$0xff]  ;;  %v10748_v36 = vld [vmem:[#allocation33_spill] sm:$0xff]  ;;  %v9418_v35 = vld [vmem:[%s10563_s3] ss:$0 sm:$0xff] }
 0x1be   : > { %10725 = vst [vmem:[#allocation100_spill] sm:$0xff] %v9305_v5  ;;  %v853_v5 = vadd.f32 %v8900_v7, %v8885_v57  ;;  %v1267_v57 = vadd.f32 %v8998_v39, %v823_v52  ;;  %v923_v7 = vadd.f32 %v8975_v28, %v8964_v61  ;;  %v10728_v61 = vld [vmem:[#allocation11_spill] sm:$0xff]  ;;  %v10730_v39 = vld [vmem:[#allocation12_spill] sm:$0xff]  ;;  %v2313_v6 = vadd.f32 %v9122_v24, %v1963_v20  ;;  %v10750_v53 = vld [vmem:[#allocation30_spill] sm:$0xff] }
 0x1bf   : > { %v9325_v38 = vpop.f32.mrf.mxu0  ;;  %v1275_v28 = vadd.f32 %v10728_v61, %v863_v31  ;;  %v1621_v40 = vadd.f32 %v10730_v39, %v1271_v12  ;;  %v10734_v52 = vld [vmem:[#allocation16_spill] sm:$0xff]  ;;  %v9368_v31 = vadd.f32 %v10735_v44, %v1277_v16  ;;  %v10739_v12 = vld [vmem:[#allocation22_spill] sm:$0xff]  ;;  %v9390_v61 = vadd.f32 %v10741_v50, %v1283_v46  ;;  %v10744_v16 = vld [vmem:[#allocation29_spill] sm:$0xff] }
 0x1c0   : > { %v1617_v29 = vadd.f32 %v9022_v32, %v1267_v57  ;;  %v1273_v18 = vadd.f32 %v10726_v14, %v853_v5  ;;  %v1279_v32 = vadd.f32 %v10732_v47, %v883_v42  ;;  %v1285_v42 = vadd.f32 %v9079_v22, %v913_v60  ;;  %v10743_v22 = vld [vmem:[#allocation25_spill] sm:$0xff]  ;;  %v10746_v47 = vld [vmem:[#allocation28_spill] sm:$0xff]  ;;  %v10749_v44 = vld [vmem:[#allocation34_spill] sm:$0xff] }
 0x1c1   : > { %v9339_v2 = vpop.f32.mrf.mxu0  ;;  %v1625_v5 = vadd.f32 %v10734_v52, %v1275_v28  ;;  %v1287_v14 = vadd.f32 %v10739_v12, %v923_v7  ;;  %v2663_v30 = vadd.f32 %v9235_v3, %v2313_v6  ;;  %v10742_v28 = vld [vmem:[#allocation24_spill] sm:$0xff]  ;;  %v1965_v20 = vadd.f32 %v10744_v16, %v1615_v63  ;;  %v10747_v63 = vld [vmem:[#allocation31_spill] sm:$0xff] }
 0x1c2   : > { %v1623_v10 = vadd.f32 %v10731_v43, %v1273_v18  ;;  %v9376_v57 = vadd.f32 %v10737_v21, %v1279_v32  ;;  %v10740_v18 = vld [vmem:[#allocation27_spill] sm:$0xff]  ;;  %v1289_v33 = vadd.f32 %v10742_v28, %v933_v9  ;;  %v9394_v60 = vadd.f32 %v10743_v22, %v1285_v42  ;;  %v9400_v7 = vld [vmem:[%s10562_s2] ss:$0 sm:$0xff]  ;;  %v9407_v43 = vpop.f32.mrf.mxu1 }
 0x1c3   : > { %v9353_v17 = vpop.f32.mrf.mxu0  ;;  %v2316_v24 = vadd.f32 %v9124_v49, %v10740_v18  ;;  %v9403_v3 = vadd.f32 %v10745_v34, %v1287_v14  ;;  %v3013_v39 = vadd.f32 %v9251_v56, %v2663_v30  ;;  %v1967_v62 = vadd.f32 %v10747_v63, %v1617_v29  ;;  %v10751_v56 = vld [vmem:[#allocation36_spill] sm:$0xff]  ;;  %v10753_v14 = vld [vmem:[#allocation38_spill] sm:$0xff]  ;;  %v10757_v34 = vld [vmem:[#allocation83_spill] sm:$0xff] }
 0x1c4   : > { %v9410_v32 = vadd.f32 %v10746_v47, %v1289_v33  ;;  %v1969_v52 = vadd.f32 %v10748_v36, %v1619_v11  ;;  %v2315_v6 = vadd.f32 %v10749_v44, %v1965_v20  ;;  %v2318_v46 = vadd.f32 %v10751_v56, %v10750_v53  ;;  %v10752_v12 = vld [vmem:[#allocation32_spill] sm:$0xff]  ;;  %v9430_v50 = vpop.f32.mrf.mxu1  ;;  %v10756_v20 = vld [vmem:[#allocation81_spill] sm:$0xff]  ;;  %v10759_v63 = vld [vmem:[#allocation42_spill] sm:$0xff] }
 0x1c5   : > { %v9364_v26 = vpop.f32.mrf.mxu0  ;;  %v2666_v23 = vadd.f32 %v9239_v54, %v2316_v24  ;;  %v1971_v29 = vadd.f32 %v9141_v4, %v1621_v40  ;;  %v2317_v11 = vadd.f32 %v9143_v59, %v1967_v62  ;;  %v2320_v18 = vadd.f32 %v10753_v14, %v10752_v12  ;;  %v10754_v22 = vld [vmem:[#allocation40_spill] sm:$0xff]  ;;  %v10755_v40 = vld [vmem:[#allocation41_spill] sm:$0xff]  ;;  %v10765_v12 = vld [vmem:[#allocation47_spill] sm:$0xff] }
 0x1c6   : > { %v2665_v24 = vadd.f32 %v9243_v27, %v2315_v6  ;;  %v1973_v4 = vadd.f32 %v10754_v22, %v1623_v10  ;;  %v2319_v59 = vadd.f32 %v10755_v40, %v1969_v52  ;;  %v10758_v47 = vld [vmem:[#allocation37_spill] sm:$0xff]  ;;  %v10761_v52 = vld [vmem:[#allocation79_spill] sm:$0xff]  ;;  %v9451_v56 = vpop.f32.mrf.mxu1 }
 0x1c7   : > { %v9382_v15 = vpop.f32.mrf.mxu0  ;;  %v3016_v21 = vadd.f32 %v9255_v58, %v2666_v23  ;;  %v2667_v16 = vadd.f32 %v9249_v19, %v2317_v11  ;;  %v2322_v62 = vadd.f32 %v10759_v63, %v10758_v47  ;;  %v10760_v10 = vld [vmem:[#allocation45_spill] sm:$0xff]  ;;  %v2670_v44 = vadd.f32 %v10761_v52, %v2320_v18  ;;  %v10766_v18 = vld [vmem:[#allocation80_spill] sm:$0xff]  ;;  %v10771_v47 = vld [vmem:[#allocation90_spill] sm:$0xff] }
 0x1c8   : > { %v1975_v36 = vadd.f32 %v10760_v10, %v1625_v5  ;;  %v10764_v5 = vld [vmem:[#allocation39_spill] sm:$0xff]  ;;  %v9477_v10 = vpop.f32.mrf.mxu1 }
 0x1c9   : > { %v7173_v49 = vpop.f32.mrf.mxu0  ;;  %v2324_v14 = vadd.f32 %v10765_v12, %v10764_v5 }
 0x1ca   : > { %v3364_v9 = vadd.f32 %v7173_v49, %v3014_v37  ;;  %v2668_v37 = vadd.f32 %v9245_v0, %v2318_v46  ;;  %v3015_v49 = vadd.f32 %v10756_v20, %v2665_v24  ;;  %v2669_v24 = vadd.f32 %v10766_v18, %v2319_v59 }
 0x1cb   : > { %v3224_v54 = vpop.f32.mrf.mxu0 }
 0x1cc   : > { %v3398_v42 = vmul.f32 %v9400_v7, %v3364_v9  ;;  %v3363_v55 = vadd.f32 %v3224_v54, %v3013_v39  ;;  %v3018_v23 = vadd.f32 %v10757_v34, %v2668_v37  ;;  %v10762_v54 = vld [vmem:[#allocation85_spill] sm:$0xff]  ;;  %v10770_v34 = vld [vmem:[#allocation82_spill] sm:$0xff]  ;;  %v3019_v63 = vadd.f32 %v10771_v47, %v2669_v24  ;;  %v10780_v47 = vld [vmem:[#allocation55_spill] sm:$0xff] }
 0x1cd   : > { %v7176_v30 = vpop.f32.mrf.mxu0  ;;  %v3017_v53 = vadd.f32 %v10762_v54, %v2667_v16  ;;  %v2672_v59 = vadd.f32 %v10770_v34, %v2322_v62  ;;  %v9502_v34 = vpop.f32.mrf.mxu1 }
 0x1ce   : > { %v9433_v28 = vadd.f32 %v9418_v35, %v3398_v42  ;;  %v3397_v58 = vmul.f32 %v9400_v7, %v3363_v55  ;;  %v3366_v33 = vadd.f32 %v7176_v30, %v3016_v21  ;;  %v10763_v55 = vld [vmem:[#allocation46_spill] sm:$0xff] }
 0x1cf   : > { %v3234_v27 = vpop.f32.mrf.mxu0  ;;  %v2321_v11 = vadd.f32 %v10763_v55, %v1971_v29  ;;  %v10768_v29 = vld [vmem:[#allocation49_spill] sm:$0xff] }
 0x1d0   : > { %v10597_v0 = vmax.f32 %v9433_v28, 0.0  ;;  %v9443_v39 = vadd.f32 %v9418_v35, %v3397_v58  ;;  %v3400_v9 = vmul.f32 %v9400_v7, %v3366_v33  ;;  %v3365_v19 = vadd.f32 %v3234_v27, %v3015_v49  ;;  %v10767_v58 = vld [vmem:[#allocation87_spill] sm:$0xff]  ;;  %v10769_v49 = vld [vmem:[#allocation50_spill] sm:$0xff] }
 0x1d1   : > { %v7179_v6 = vpop.f32.mrf.mxu0  ;;  %v3020_v33 = vadd.f32 %v10767_v58, %v2670_v44  ;;  %v1977_v20 = vadd.f32 %v10768_v29, %v9368_v31  ;;  %v2323_v27 = vadd.f32 %v10769_v49, %v1973_v4  ;;  %v10772_v4 = vld [vmem:[#allocation44_spill] sm:$0xff] }
 0x1d2   : > { %3488 = vst [vmem:[#allocation2 + $0x8] sm:$0xff] %v10597_v0  ;;  %v3459_v46 = vmax.f32 %v9443_v39, 0.0  ;;  %v9457_v21 = vadd.f32 %v9418_v35, %v3400_v9  ;;  %v3368_v42 = vadd.f32 %v7179_v6, %v3018_v23  ;;  %v3399_v30 = vmul.f32 %v9400_v7, %v3365_v19  ;;  %v10773_v19 = vld [vmem:[#allocation51_spill] sm:$0xff]  ;;  %v10774_v6 = vld [vmem:[#allocation84_spill] sm:$0xff]  ;;  %v4255_v39 = vld [vmem:[#allocation3 + $0x1e8] sm:$0xff] }
 0x1d3   : > { %v3244_v37 = vpop.f32.mrf.mxu0  ;;  %v2326_v62 = vadd.f32 %v10773_v19, %v10772_v4  ;;  %v2671_v54 = vadd.f32 %v10774_v6, %v2321_v11 }
 0x1d4   : > { %3487 = vst [vmem:[#allocation2] sm:$0xff] %v3459_v46  ;;  %v10594_v22 = vmax.f32 %v9457_v21, 0.0  ;;  %v3402_v40 = vmul.f32 %v9400_v7, %v3368_v42  ;;  %v3367_v16 = vadd.f32 %v3244_v37, %v3017_v53  ;;  %v9474_v23 = vadd.f32 %v9418_v35, %v3399_v30  ;;  %v10775_v53 = vld [vmem:[#allocation93_spill] sm:$0xff] }
 0x1d5   : > { %v7182_v9 = vpop.f32.mrf.mxu0  ;;  %v3022_v42 = vadd.f32 %v10775_v53, %v2672_v59  ;;  %v10776_v37 = vld [vmem:[#allocation53_spill] sm:$0xff]  ;;  %v3021_v29 = vadd.f32 %v9289_v48, %v2671_v54 }
 0x1d6   : > { %3490 = vst [vmem:[#allocation2 + $0x18] sm:$0xff] %v10594_v22  ;;  %v9482_v52 = vadd.f32 %v9418_v35, %v3402_v40  ;;  %v3401_v31 = vmul.f32 %v9400_v7, %v3367_v16  ;;  %v3370_v44 = vadd.f32 %v7182_v9, %v3020_v33  ;;  %v10596_v55 = vmax.f32 %v9474_v23, 0.0  ;;  %v10777_v33 = vld [vmem:[#allocation54_spill] sm:$0xff] }
 0x1d7   : > { %v3254_v5 = vpop.f32.mrf.mxu0  ;;  %v1979_v58 = vadd.f32 %v10776_v37, %v9376_v57  ;;  %v2325_v40 = vadd.f32 %v10777_v33, %v1975_v36  ;;  %v10778_v16 = vld [vmem:[#allocation86_spill] sm:$0xff]  ;;  %v10784_v37 = vld [vmem:[#allocation52_spill] sm:$0xff] }
 0x1d8   : > { %v10590_v12 = vmax.f32 %v9482_v52, 0.0  ;;  %v9492_v18 = vadd.f32 %v9418_v35, %v3401_v31  ;;  %v3404_v24 = vmul.f32 %v9400_v7, %v3370_v44  ;;  %v3369_v30 = vadd.f32 %v3254_v5, %v3019_v63  ;;  %3489 = vst [vmem:[#allocation2 + $0x10] sm:$0xff] %v10596_v55  ;;  %v10781_v63 = vld [vmem:[#allocation57_spill] sm:$0xff]  ;;  %v10782_v44 = vld [vmem:[#allocation88_spill] sm:$0xff]  ;;  %v4505_v22 = vld [vmem:[#allocation3 + $0x268] sm:$0xff] }
 0x1d9   : > { %v2674_v11 = vadd.f32 %v10778_v16, %v2324_v14  ;;  %v7185_v49 = vpop.f32.mrf.mxu0  ;;  %v10779_v14 = vld [vmem:[#allocation48_spill] sm:$0xff]  ;;  %v9515_v31 = vadd.f32 %v10781_v63, %v9380_v1  ;;  %v2673_v4 = vadd.f32 %v10782_v44, %v2323_v27  ;;  %v10783_v1 = vld [vmem:[#allocation58_spill] sm:$0xff]  ;;  %v10786_v16 = vld [vmem:[#allocation89_spill] sm:$0xff] }
 0x1da   : > { %3492 = vst [vmem:[#allocation2 + $0x28] sm:$0xff] %v10590_v12  ;;  %v10592_v59 = vmax.f32 %v9492_v18, 0.0  ;;  %v9508_v9 = vadd.f32 %v9418_v35, %v3404_v24  ;;  %v3403_v57 = vmul.f32 %v9400_v7, %v3369_v30  ;;  %v3372_v36 = vadd.f32 %v7185_v49, %v3022_v42  ;;  %v10787_v63 = vld [vmem:[#allocation61_spill] sm:$0xff] }
 0x1db   : > { %v2328_v48 = vadd.f32 %v10780_v47, %v10779_v14  ;;  %v3024_v19 = vadd.f32 %v9295_v25, %v2674_v11  ;;  %v3264_v6 = vpop.f32.mrf.mxu0  ;;  %v3556_v54 = vld [vmem:[#allocation2 + $0x1] sm:$0xff]  ;;  %v2327_v27 = vadd.f32 %v10783_v1, %v1977_v20  ;;  %v10785_v25 = vld [vmem:[#allocation59_spill] sm:$0xff]  ;;  %v2676_v11 = vadd.f32 %v10786_v16, %v2326_v62  ;;  %v9531_v47 = vpop.f32.mrf.mxu1  ;;  %v10788_v62 = vld [vmem:[#allocation62_spill] sm:$0xff] }
 0x1dc   : > { %v3967_v53 = vld [vmem:[#allocation2 + $0x2] sm:$0xff]  ;;  %3491 = vst [vmem:[#allocation2 + $0x20] sm:$0xff] %v10592_v59  ;;  %v10587_v5 = vmax.f32 %v9508_v9, 0.0  ;;  %v9523_v42 = vadd.f32 %v9418_v35, %v3403_v57  ;;  %v3406_v24 = vmul.f32 %v9400_v7, %v3372_v36  ;;  %v3371_v30 = vadd.f32 %v3264_v6, %v3021_v29  ;;  %7245 = vmatprep.mubr.f32.mxu1 %v3556_v54  ;;  %v3554_v1 = vld [vmem:[#allocation3 + $0x70] sm:$0xff] }
 0x1dd   : > { %7381 = vmatprep.mubr.f32.mxu0 %v3967_v53  ;;  %v2330_v33 = vadd.f32 %v10785_v25, %v10784_v37  ;;  %v3023_v49 = vadd.f32 %v9301_v45, %v2673_v4  ;;  %v7188_v14 = vpop.f32.mrf.mxu0  ;;  %v9542_v44 = vadd.f32 %v10787_v63, %v9390_v61  ;;  %v9545_v45 = vadd.f32 %v10788_v62, %v1979_v58  ;;  %v10789_v4 = vld [vmem:[#allocation91_spill] sm:$0xff] }
 0x1de   : > { %3494 = vst [vmem:[#allocation2 + $0x38] sm:$0xff] %v10587_v5  ;;  %v10588_v57 = vmax.f32 %v9523_v42, 0.0  ;;  %v9537_v29 = vadd.f32 %v9418_v35, %v3406_v24  ;;  %v3405_v20 = vmul.f32 %v9400_v7, %v3371_v30  ;;  %v3374_v36 = vadd.f32 %v7188_v14, %v3024_v19  ;;  %v10791_v16 = vld [vmem:[#allocation63_spill] sm:$0xff] }
 0x1df   : > { %v2675_v6 = vadd.f32 %v10789_v4, %v2325_v40  ;;  %v3026_v54 = vadd.f32 %v9315_v51, %v2676_v11  ;;  %v3274_v53 = vpop.f32.mrf.mxu0  ;;  %v3557_v37 = vld [vmem:[#allocation2 + $0x9] sm:$0xff]  ;;  %v9556_v25 = vld [vmem:[#allocation2 + $0x11] sm:$0xff]  ;;  %v10790_v40 = vld [vmem:[#allocation56_spill] sm:$0xff]  ;;  %v9564_v4 = vpop.f32.mrf.mxu1 }
 0x1e0   : > { %3493 = vst [vmem:[#allocation2 + $0x30] sm:$0xff] %v10588_v57  ;;  %v10586_v24 = vmax.f32 %v9537_v29, 0.0  ;;  %v9553_v19 = vadd.f32 %v9418_v35, %v3405_v20  ;;  %v3408_v61 = vmul.f32 %v9400_v7, %v3374_v36  ;;  %v3373_v30 = vadd.f32 %v3274_v53, %v3023_v49  ;;  %v3968_v58 = vld [vmem:[#allocation2 + $0xa] sm:$0xff]  ;;  %v10792_v11 = vld [vmem:[#allocation92_spill] sm:$0xff]  ;;  %7246 = vmatmul.mubr.f32.vlgmr.msra.gmra.mxu1 %v3557_v37  ;;  %v3969_v20 = vld [vmem:[#allocation2 + $0x12] sm:$0xff] }
 0x1e1   : > { %v9560_v51 = vadd.f32 %v10791_v16, %v10790_v40  ;;  %v2678_v14 = vadd.f32 %v10792_v11, %v2328_v48  ;;  %v3025_v63 = vadd.f32 %v9347_v8, %v2675_v6  ;;  %7382 = vmatmul.mubr.f32.vlgmr.msra.gmra.mxu0 %v3968_v58  ;;  %v7191_v62 = vpop.f32.mrf.mxu0  ;;  %7248 = vmatprep.mubr.f32.mxu1 %v9556_v25  ;;  %v10793_v8 = vld [vmem:[#allocation35_spill] sm:$0xff]  ;;  %v10794_v48 = vld [vmem:[#allocation65_spill] sm:$0xff]  ;;  %v10795_v37 = vld [vmem:[#allocation94_spill] sm:$0xff]  ;;  %v9598_v12 = vpop.f32.mrf.mxu1 }
 0x1e2   : > { %3496 = vst [vmem:[#allocation2 + $0x48] sm:$0xff] %v10586_v24  ;;  %v10589_v49 = vmax.f32 %v9553_v19, 0.0  ;;  %v9570_v36 = vadd.f32 %v9418_v35, %v3408_v61  ;;  %v3407_v53 = vmul.f32 %v9400_v7, %v3373_v30  ;;  %v3376_v40 = vadd.f32 %v7191_v62, %v3026_v54  ;;  %7282 = vmatpush3.msra.mxu1 %v10793_v8  ;;  %v4506_v8 = vld [vmem:[#allocation3 + $0x270] sm:$0xff] }
 0x1e3   : > { %v9577_v6 = vadd.f32 %v10794_v48, %v9394_v60  ;;  %v2677_v58 = vadd.f32 %v10795_v37, %v2327_v27  ;;  %v3028_v16 = vadd.f32 %v9372_v13, %v2678_v14  ;;  %7384 = vmatprep.mubr.f32.mxu0 %v3969_v20  ;;  %v3284_v11 = vpop.f32.mrf.mxu0  ;;  %7283 = vmatprep.subr.mxu1 %v3554_v1  ;;  %v9581_v61 = vld [vmem:[#allocation2 + $0x19] sm:$0xff]  ;;  %v9583_v30 = vld [vmem:[#allocation2 + $0x21] sm:$0xff]  ;;  %v3553_v14 = vld [vmem:[#allocation3 + $0x68] sm:$0xff] }
 0x1e4   : > { %v3970_v24 = vld [vmem:[#allocation2 + $0x1a] sm:$0xff]  ;;  %3495 = vst [vmem:[#allocation2 + $0x40] sm:$0xff] %v10589_v49  ;;  %v10591_v54 = vmax.f32 %v9570_v36, 0.0  ;;  %v9589_v60 = vadd.f32 %v9418_v35, %v3407_v53  ;;  %v3410_v27 = vmul.f32 %v9400_v7, %v3376_v40  ;;  %v3375_v62 = vadd.f32 %v3284_v11, %v3025_v63  ;;  %7284 = vmatpush3.msra.mxu1 %v3554_v1  ;;  %v3971_v13 = vld [vmem:[#allocation2 + $0x22] sm:$0xff]  ;;  %v10797_v48 = vld [vmem:[#allocation66_spill] sm:$0xff] }
 0x1e5   : > { %v10796_v20 = vld [vmem:[#allocation43_spill] sm:$0xff]  ;;  %v2331_v37 = vadd.f32 %v10797_v48, %v9515_v31  ;;  %v3027_v49 = vadd.f32 %v9407_v43, %v2677_v58  ;;  %7249 = vmatmul.mubr.f32.gmra.mxu1 %v9581_v61  ;;  %7385 = vmatmul.mubr.f32.gmra.mxu0 %v3970_v24  ;;  %v7194_v53 = vpop.f32.mrf.mxu0  ;;  %v3552_v43 = vld [vmem:[#allocation3 + $0x60] sm:$0xff]  ;;  %v10801_v58 = vld [vmem:[#allocation96_spill] sm:$0xff] }
 0x1e6   : > { %7486 = vmatpush3.msra.mxu0 %v10796_v20  ;;  %v10798_v5 = vld [vmem:[#allocation95_spill] sm:$0xff]  ;;  %3498 = vst [vmem:[#allocation2 + $0x58] sm:$0xff] %v10591_v54  ;;  %v10593_v1 = vmax.f32 %v9589_v60, 0.0  ;;  %v9604_v63 = vadd.f32 %v9418_v35, %v3410_v27  ;;  %v3409_v31 = vmul.f32 %v9400_v7, %v3375_v62  ;;  %v3378_v40 = vadd.f32 %v7194_v53, %v3028_v16 }
 0x1e7   : > { %v2680_v57 = vadd.f32 %v10798_v5, %v2330_v33  ;;  %7251 = vmatprep.mubr.f32.mxu1 %v9583_v30  ;;  %7387 = vmatprep.mubr.f32.mxu0 %v3971_v13  ;;  %v10799_v5 = vld [vmem:[#allocation60_spill] sm:$0xff]  ;;  %v10800_v33 = vld [vmem:[#allocation67_spill] sm:$0xff]  ;;  %v2679_v11 = vadd.f32 %v10801_v58, %v9545_v45  ;;  %v3294_v48 = vpop.f32.mrf.mxu0  ;;  %v9613_v54 = vld [vmem:[#allocation2 + $0x29] sm:$0xff] }
 0x1e8   : > { %v2334_v24 = vadd.f32 %v10800_v33, %v10799_v5  ;;  %7285 = vmatprep.subr.mxu1 %v3553_v14  ;;  %v3972_v27 = vld [vmem:[#allocation2 + $0x2a] sm:$0xff]  ;;  %7487 = vmatprep.subr.mxu0 %v4506_v8  ;;  %3497 = vst [vmem:[#allocation2 + $0x50] sm:$0xff] %v10593_v1  ;;  %v10595_v16 = vmax.f32 %v9604_v63, 0.0  ;;  %v3443_v62 = vadd.f32 %v9418_v35, %v3409_v31  ;;  %v3551_v31 = vld [vmem:[#allocation3 + $0x58] sm:$0xff] }
 0x1e9   : > { %v3030_v20 = vadd.f32 %v9430_v50, %v2680_v57  ;;  %v9615_v59 = vld [vmem:[#allocation2 + $0x31] sm:$0xff]  ;;  %v3412_v13 = vmul.f32 %v9400_v7, %v3378_v40  ;;  %v3377_v45 = vadd.f32 %v3294_v48, %v3027_v49  ;;  %7286 = vmatpush3.msra.mxu1 %v3553_v14  ;;  %7488 = vmatpush3.msra.mxu0 %v4506_v8  ;;  %v10802_v57 = vld [vmem:[#allocation69_spill] sm:$0xff]  ;;  %v7197_v1 = vpop.f32.mrf.mxu0  ;;  %v9630_v40 = vpop.f32.mrf.mxu1 }
 0x1ea   : > { %v3973_v50 = vld [vmem:[#allocation2 + $0x32] sm:$0xff]  ;;  %v9624_v53 = vadd.f32 %v10802_v57, %v9403_v3  ;;  %v10803_v5 = vld [vmem:[#allocation97_spill] sm:$0xff]  ;;  %v3029_v58 = vadd.f32 %v9451_v56, %v2679_v11  ;;  %7252 = vmatmul.mubr.f32.gmra.mxu1 %v9613_v54  ;;  %7388 = vmatmul.mubr.f32.gmra.mxu0 %v3972_v27  ;;  %3500 = vst [vmem:[#allocation2 + $0x68] sm:$0xff] %v10595_v16  ;;  %v9634_v49 = vmax.f32 %v3443_v62, 0.0 }
 0x1eb   : > { %v2682_v33 = vadd.f32 %v10803_v5, %v9560_v51  ;;  %v9637_v3 = vadd.f32 %v9418_v35, %v3412_v13  ;;  %v3411_v51 = vmul.f32 %v9400_v7, %v3377_v45  ;;  %v3380_v14 = vadd.f32 %v7197_v1, %v3030_v20  ;;  %7254 = vmatprep.mubr.f32.mxu1 %v9615_v59  ;;  %v10804_v56 = vld [vmem:[#allocation70_spill] sm:$0xff]  ;;  %v3304_v62 = vpop.f32.mrf.mxu0  ;;  %v9645_v57 = vld [vmem:[#allocation2 + $0x39] sm:$0xff]  ;;  %v9647_v5 = vld [vmem:[#allocation2 + $0x41] sm:$0xff]  ;;  %v9658_v0 = vpop.f32.mrf.mxu1 }
 0x1ec   : > { %7287 = vmatprep.subr.mxu1 %v3552_v43  ;;  %v2333_v8 = vadd.f32 %v10804_v56, %v9542_v44  ;;  %v10805_v11 = vld [vmem:[#allocation98_spill] sm:$0xff]  ;;  %7390 = vmatprep.mubr.f32.mxu0 %v3973_v50  ;;  %v3974_v13 = vld [vmem:[#allocation2 + $0x3a] sm:$0xff]  ;;  %3499 = vst [vmem:[#allocation2 + $0x60] sm:$0xff] %v9634_v49  ;;  %v3379_v45 = vadd.f32 %v3304_v62, %v3029_v58 }
 0x1ed   : > { %v2681_v48 = vadd.f32 %v10805_v11, %v2331_v37  ;;  %v3032_v27 = vadd.f32 %v9477_v10, %v2682_v33  ;;  %7288 = vmatpush3.msra.mxu1 %v3552_v43  ;;  %v10598_v1 = vmax.f32 %v9637_v3, 0.0  ;;  %v3445_v20 = vadd.f32 %v9418_v35, %v3411_v51  ;;  %v3975_v37 = vld [vmem:[#allocation2 + $0x42] sm:$0xff]  ;;  %v3550_v10 = vld [vmem:[#allocation3 + $0x50] sm:$0xff]  ;;  %7489 = vmatprep.subr.mxu0 %v4505_v22  ;;  %v7200_v55 = vpop.f32.mrf.mxu0 }
 0x1ee   : > { %v3414_v44 = vmul.f32 %v9400_v7, %v3380_v14  ;;  %7289 = vmatprep.subr.mxu1 %v3551_v31  ;;  %v10806_v43 = vld [vmem:[#allocation64_spill] sm:$0xff]  ;;  %v10807_v50 = vld [vmem:[#allocation71_spill] sm:$0xff]  ;;  %7255 = vmatmul.mubr.f32.gmra.mxu1 %v9645_v57  ;;  %v3413_v14 = vmul.f32 %v9400_v7, %v3379_v45  ;;  %v10810_v45 = vld [vmem:[#allocation74_spill] sm:$0xff] }
 0x1ef   : > { %v2336_v33 = vadd.f32 %v10807_v50, %v10806_v43  ;;  %v10808_v56 = vld [vmem:[#allocation99_spill] sm:$0xff]  ;;  %v3031_v16 = vadd.f32 %v9502_v34, %v2681_v48  ;;  %7391 = vmatmul.mubr.f32.gmra.mxu0 %v3974_v13  ;;  %3502 = vst [vmem:[#allocation2 + $0x78] sm:$0xff] %v10598_v1  ;;  %v9662_v58 = vmax.f32 %v3445_v20, 0.0  ;;  %v3382_v62 = vadd.f32 %v7200_v55, %v3032_v27  ;;  %v10809_v34 = vld [vmem:[#allocation73_spill] sm:$0xff]  ;;  %v3314_v43 = vpop.f32.mrf.mxu0  ;;  %v4503_v1 = vld [vmem:[#allocation3 + $0x258] sm:$0xff] }
 0x1f0   : > { %v2684_v11 = vadd.f32 %v10808_v56, %v2334_v24  ;;  %v3448_v51 = vadd.f32 %v9418_v35, %v3414_v44  ;;  %7257 = vmatprep.mubr.f32.mxu1 %v9647_v5  ;;  %7290 = vmatpush3.msra.mxu1 %v3551_v31  ;;  %v9669_v24 = vadd.f32 %v10809_v34, %v9410_v32  ;;  %v9673_v20 = vld [vmem:[#allocation2 + $0x49] sm:$0xff]  ;;  %v9675_v50 = vld [vmem:[#allocation2 + $0x51] sm:$0xff]  ;;  %v10811_v56 = vld [vmem:[#allocation100_spill] sm:$0xff] }
 0x1f1   : > { %v2683_v48 = vadd.f32 %v9303_v41, %v2333_v8  ;;  %7393 = vmatprep.mubr.f32.mxu0 %v3975_v37  ;;  %7291 = vmatprep.subr.mxu1 %v3550_v10  ;;  %v3976_v44 = vld [vmem:[#allocation2 + $0x4a] sm:$0xff]  ;;  %3501 = vst [vmem:[#allocation2 + $0x70] sm:$0xff] %v9662_v58  ;;  %v3447_v31 = vadd.f32 %v9418_v35, %v3413_v14  ;;  %v3977_v41 = vld [vmem:[#allocation2 + $0x52] sm:$0xff]  ;;  %v2994_v14 = vpop.f32.mrf.mxu1 }
 0x1f2   : > { %v3034_v13 = vadd.f32 %v9531_v47, %v2684_v11  ;;  %v9678_v55 = vmax.f32 %v3448_v51, 0.0  ;;  %v3416_v32 = vmul.f32 %v9400_v7, %v3382_v62  ;;  %v3381_v27 = vadd.f32 %v3314_v43, %v3031_v16  ;;  %7292 = vmatpush3.msra.mxu1 %v3550_v10  ;;  %v3549_v47 = vld [vmem:[#allocation3 + $0x48] sm:$0xff]  ;;  %7490 = vmatpush3.msra.mxu0 %v4505_v22  ;;  %v4504_v8 = vld [vmem:[#allocation3 + $0x260] sm:$0xff]  ;;  %v7203_v51 = vpop.f32.mrf.mxu0 }
 0x1f3   : > { %v2335_v37 = vadd.f32 %v10810_v45, %v9577_v6  ;;  %v2686_v11 = vadd.f32 %v10811_v56, %v2336_v33  ;;  %v3033_v34 = vadd.f32 %v9564_v4, %v2683_v48  ;;  %7258 = vmatmul.mubr.f32.gmra.mxu1 %v9673_v20  ;;  %7394 = vmatmul.mubr.f32.gmra.mxu0 %v3976_v44  ;;  %v9688_v16 = vmax.f32 %v3447_v31, 0.0  ;;  %v3548_v6 = vld [vmem:[#allocation3 + $0x40] sm:$0xff]  ;;  %v10812_v33 = vld [vmem:[#allocation68_spill] sm:$0xff]  ;;  %v10813_v4 = vld [vmem:[#allocation75_spill] sm:$0xff] }
 0x1f4   : > { %3504 = vst [vmem:[#allocation2 + $0x88] sm:$0xff] %v9678_v55  ;;  %v3450_v10 = vadd.f32 %v9418_v35, %v3416_v32  ;;  %v3415_v22 = vmul.f32 %v9400_v7, %v3381_v27  ;;  %v3384_v62 = vadd.f32 %v7203_v51, %v3034_v13  ;;  %7260 = vmatprep.mubr.f32.mxu1 %v9675_v50  ;;  %v3324_v45 = vpop.f32.mrf.mxu0  ;;  %v9697_v31 = vld [vmem:[#allocation2 + $0x59] sm:$0xff]  ;;  %v9699_v32 = vld [vmem:[#allocation2 + $0x61] sm:$0xff] }
 0x1f5   : > { %7396 = vmatprep.mubr.f32.mxu0 %v3977_v41  ;;  %v2338_v48 = vadd.f32 %v10813_v4, %v10812_v33  ;;  %v2685_v43 = vadd.f32 %v9325_v38, %v2335_v37  ;;  %v3036_v44 = vadd.f32 %v9598_v12, %v2686_v11  ;;  %7293 = vmatprep.subr.mxu1 %v3549_v47  ;;  %v3978_v56 = vld [vmem:[#allocation2 + $0x5a] sm:$0xff]  ;;  %v3979_v38 = vld [vmem:[#allocation2 + $0x62] sm:$0xff] }
 0x1f6   : > { %7491 = vmatprep.subr.mxu0 %v4504_v8  ;;  %3503 = vst [vmem:[#allocation2 + $0x80] sm:$0xff] %v9688_v16  ;;  %v9702_v13 = vmax.f32 %v3450_v10, 0.0  ;;  %v3449_v27 = vadd.f32 %v9418_v35, %v3415_v22  ;;  %v3418_v41 = vmul.f32 %v9400_v7, %v3384_v62  ;;  %v3383_v51 = vadd.f32 %v3324_v45, %v3033_v34  ;;  %v10814_v12 = vld [vmem:[#allocation76_spill] sm:$0xff]  ;;  %v7206_v10 = vpop.f32.mrf.mxu0  ;;  %v7168_v22 = vpop.f32.mrf.mxu1 }
 0x1f7   : > { %7294 = vmatpush3.msra.mxu1 %v3549_v47  ;;  %7492 = vmatpush3.msra.mxu0 %v4504_v8  ;;  %v2337_v37 = vadd.f32 %v10814_v12, %v9624_v53  ;;  %v2688_v11 = vadd.f32 %v9339_v2, %v2338_v48  ;;  %v3035_v33 = vadd.f32 %v9630_v40, %v2685_v43  ;;  %v3547_v4 = vld [vmem:[#allocation3 + $0x38] sm:$0xff]  ;;  %v10816_v40 = vld [vmem:[#allocation77_spill] sm:$0xff] }
 0x1f8   : > { %7261 = vmatmul.mubr.f32.gmra.mxu1 %v9697_v31  ;;  %7397 = vmatmul.mubr.f32.gmra.mxu0 %v3978_v56  ;;  %3506 = vst [vmem:[#allocation2 + $0x98] sm:$0xff] %v9702_v13  ;;  %v9712_v34 = vmax.f32 %v3449_v27, 0.0  ;;  %v3452_v47 = vadd.f32 %v9418_v35, %v3418_v41  ;;  %v3417_v8 = vmul.f32 %v9400_v7, %v3383_v51  ;;  %v10815_v2 = vld [vmem:[#allocation72_spill] sm:$0xff]  ;;  %v3334_v45 = vpop.f32.mrf.mxu0  ;;  %v9721_v56 = vld [vmem:[#allocation2 + $0x69] sm:$0xff]  ;;  %v9723_v41 = vld [vmem:[#allocation2 + $0x71] sm:$0xff] }
 0x1f9   : > { %v3386_v53 = vadd.f32 %v7206_v10, %v3036_v44  ;;  %7263 = vmatprep.mubr.f32.mxu1 %v9699_v32  ;;  %7295 = vmatprep.subr.mxu1 %v3548_v6  ;;  %v2340_v62 = vadd.f32 %v10816_v40, %v10815_v2  ;;  %v2687_v48 = vadd.f32 %v9353_v17, %v2337_v37  ;;  %v3980_v27 = vld [vmem:[#allocation2 + $0x6a] sm:$0xff]  ;;  %v3981_v17 = vld [vmem:[#allocation2 + $0x72] sm:$0xff]  ;;  %v3004_v40 = vpop.f32.mrf.mxu1 }
 0x1fa   : > { %v3038_v43 = vadd.f32 %v9658_v0, %v2688_v11  ;;  %7399 = vmatprep.mubr.f32.mxu0 %v3979_v38  ;;  %7296 = vmatpush3.msra.mxu1 %v3548_v6  ;;  %3505 = vst [vmem:[#allocation2 + $0x90] sm:$0xff] %v9712_v34  ;;  %v9726_v44 = vmax.f32 %v3452_v47, 0.0  ;;  %v3451_v51 = vadd.f32 %v9418_v35, %v3417_v8  ;;  %v10817_v0 = vld [vmem:[#allocation78_spill] sm:$0xff]  ;;  %v7209_v11 = vpop.f32.mrf.mxu0  ;;  %v4502_v47 = vld [vmem:[#allocation3 + $0x250] sm:$0xff] }
 0x1fb   : > { %v3420_v12 = vmul.f32 %v9400_v7, %v3386_v53  ;;  %v3385_v10 = vadd.f32 %v3334_v45, %v3035_v33  ;;  %7297 = vmatprep.subr.mxu1 %v3547_v4  ;;  %7493 = vmatprep.subr.mxu0 %v4503_v1  ;;  %v2339_v6 = vadd.f32 %v10817_v0, %v9669_v24  ;;  %v3546_v2 = vld [vmem:[#allocation3 + $0x30] sm:$0xff] }
 0x1fc   : > { %v2690_v38 = vadd.f32 %v9364_v26, %v2340_v62  ;;  %v3037_v37 = vadd.f32 %v2994_v14, %v2687_v48  ;;  %7264 = vmatmul.mubr.f32.gmra.mxu1 %v9721_v56  ;;  %7400 = vmatmul.mubr.f32.gmra.mxu0 %v3980_v27  ;;  %3508 = vst [vmem:[#allocation2 + $0xa8] sm:$0xff] %v9726_v44  ;;  %v9735_v8 = vmax.f32 %v3451_v51, 0.0  ;;  %v3344_v14 = vpop.f32.mrf.mxu0 }
 0x1fd   : > { %v3454_v33 = vadd.f32 %v9418_v35, %v3420_v12  ;;  %v3419_v53 = vmul.f32 %v9400_v7, %v3385_v10  ;;  %v3388_v45 = vadd.f32 %v7209_v11, %v3038_v43  ;;  %7266 = vmatprep.mubr.f32.mxu1 %v9723_v41  ;;  %7298 = vmatpush3.msra.mxu1 %v3547_v4  ;;  %v9741_v62 = vld [vmem:[#allocation2 + $0x79] sm:$0xff]  ;;  %v4501_v4 = vld [vmem:[#allocation3 + $0x248] sm:$0xff]  ;;  %v3983_v10 = vld [vmem:[#allocation2 + $0x82] sm:$0xff] }
 0x1fe   : > { %v2689_v26 = vadd.f32 %v9382_v15, %v2339_v6  ;;  %v3040_v24 = vadd.f32 %v7168_v22, %v2690_v38  ;;  %7402 = vmatprep.mubr.f32.mxu0 %v3981_v17  ;;  %7494 = vmatpush3.msra.mxu0 %v4503_v1  ;;  %v3982_v48 = vld [vmem:[#allocation2 + $0x7a] sm:$0xff]  ;;  %3507 = vst [vmem:[#allocation2 + $0xa0] sm:$0xff] %v9735_v8  ;;  %v7212_v1 = vpop.f32.mrf.mxu0  ;;  %v4500_v11 = vld [vmem:[#allocation3 + $0x240] sm:$0xff] }
 0x1ff   : > { %v9744_v27 = vmax.f32 %v3454_v33, 0.0  ;;  %v3453_v51 = vadd.f32 %v9418_v35, %v3419_v53  ;;  %v3422_v43 = vmul.f32 %v9400_v7, %v3388_v45  ;;  %7495 = vmatprep.subr.mxu0 %v4502_v47  ;;  %v3387_v12 = vadd.f32 %v3344_v14, %v3037_v37  ;;  %7299 = vmatprep.subr.mxu1 %v3546_v2  ;;  %v9748_v15 = vld [vmem:[#allocation2 + $0x81] sm:$0xff]  ;;  %v3545_v37 = vld [vmem:[#allocation3 + $0x28] sm:$0xff] }
 0x200   : > { %v3039_v22 = vadd.f32 %v3004_v40, %v2689_v26  ;;  %7496 = vmatpush3.msra.mxu0 %v4502_v47  ;;  %7267 = vmatmul.mubr.f32.gmra.mxu1 %v9741_v62  ;;  %v3390_v38 = vadd.f32 %v7212_v1, %v3040_v24  ;;  %v3354_v47 = vpop.f32.mrf.mxu0  ;;  %v4499_v24 = vld [vmem:[#allocation3 + $0x238] sm:$0xff] }
 0x201   : > { %3510 = vst [vmem:[#allocation2 + $0xb8] sm:$0xff] %v9744_v27  ;;  %v9752_v17 = vmax.f32 %v3453_v51, 0.0  ;;  %v3456_v0 = vadd.f32 %v9418_v35, %v3422_v43  ;;  %v3421_v6 = vmul.f32 %v9400_v7, %v3387_v12  ;;  %7300 = vmatpush3.msra.mxu1 %v3546_v2  ;;  %7403 = vmatmul.mubr.f32.gmra.mxu0 %v3982_v48  ;;  %v9762_v2 = vld [vmem:[#allocation2 + $0x89] sm:$0xff]  ;;  %v9764_v14 = vld [vmem:[#allocation2 + $0x91] sm:$0xff] }
 0x202   : > { %7497 = vmatprep.subr.mxu0 %v4501_v4  ;;  %7269 = vmatprep.mubr.f32.mxu1 %v9748_v15  ;;  %v3424_v53 = vmul.f32 %v9400_v7, %v3390_v38  ;;  %v3389_v45 = vadd.f32 %v3354_v47, %v3039_v22  ;;  %v3984_v26 = vld [vmem:[#allocation2 + $0x8a] sm:$0xff] }
 0x203   : > { %3509 = vst [vmem:[#allocation2 + $0xb0] sm:$0xff] %v9752_v17  ;;  %v9758_v40 = vmax.f32 %v3456_v0, 0.0  ;;  %v3455_v33 = vadd.f32 %v9418_v35, %v3421_v6  ;;  %7405 = vmatprep.mubr.f32.mxu0 %v3983_v10  ;;  %7498 = vmatpush3.msra.mxu0 %v4501_v4  ;;  %v3544_v12 = vld [vmem:[#allocation3 + $0x20] sm:$0xff]  ;;  %v3985_v4 = vld [vmem:[#allocation2 + $0x92] sm:$0xff] }
 0x204   : > { %7301 = vmatprep.subr.mxu1 %v3545_v37  ;;  %7499 = vmatprep.subr.mxu0 %v4500_v11  ;;  %v9770_v51 = vadd.f32 %v9418_v35, %v3424_v53  ;;  %v3423_v43 = vmul.f32 %v9400_v7, %v3389_v45  ;;  %v4498_v10 = vld [vmem:[#allocation3 + $0x230] sm:$0xff]  ;;  %v3543_v7 = vld [vmem:[#allocation3 + $0x18] sm:$0xff]  ;;  %v4496_v47 = vld [vmem:[#allocation3 + $0x220] sm:$0xff] }
 0x205   : > { %3512 = vst [vmem:[#allocation2 + $0xc8] sm:$0xff] %v9758_v40  ;;  %v9767_v48 = vmax.f32 %v3455_v33, 0.0  ;;  %7302 = vmatpush3.msra.mxu1 %v3545_v37  ;;  %7500 = vmatpush3.msra.mxu0 %v4500_v11  ;;  %v9780_v0 = vld [vmem:[#allocation2 + $0x99] sm:$0xff]  ;;  %v4497_v37 = vld [vmem:[#allocation3 + $0x228] sm:$0xff]  ;;  %v3987_v11 = vld [vmem:[#allocation2 + $0xa2] sm:$0xff] }
 0x206   : > { %7270 = vmatmul.mubr.f32.gmra.mxu1 %v9762_v2  ;;  %7406 = vmatmul.mubr.f32.gmra.mxu0 %v3984_v26  ;;  %v3486_v22 = vmax.f32 %v9770_v51, 0.0  ;;  %v9777_v1 = vadd.f32 %v9418_v35, %v3423_v43  ;;  %v3986_v38 = vld [vmem:[#allocation2 + $0x9a] sm:$0xff]  ;;  %v5469_v51 = vld [vmem:[#allocation2 + $0x32] sm:$0xff] }
 0x207   : > { %3511 = vst [vmem:[#allocation2 + $0xc0] sm:$0xff] %v9767_v48  ;;  %7501 = vmatprep.subr.mxu0 %v4499_v24  ;;  %7272 = vmatprep.mubr.f32.mxu1 %v9764_v14  ;;  %v9786_v35 = vld [vmem:[#allocation2 + $0xa1] sm:$0xff]  ;;  %v3542_v33 = vld [vmem:[#allocation3 + $0x10] sm:$0xff] }
 0x208   : > { %7303 = vmatprep.subr.mxu1 %v3544_v12  ;;  %7408 = vmatprep.mubr.f32.mxu0 %v3985_v4  ;;  %3514 = vst [vmem:[#allocation2 + $0xd8] sm:$0xff] %v3486_v22  ;;  %v3485_v6 = vmax.f32 %v9777_v1, 0.0  ;;  %v4495_v26 = vld [vmem:[#allocation3 + $0x218] sm:$0xff]  ;;  %v4494_v4 = vld [vmem:[#allocation3 + $0x210] sm:$0xff] }
 0x209   : > { %7502 = vmatpush3.msra.mxu0 %v4499_v24  ;;  %7304 = vmatpush3.msra.mxu1 %v3544_v12  ;;  %v3541_v12 = vld [vmem:[#allocation3 + $0x8] sm:$0xff]  ;;  %v5257_v1 = vld [vmem:[#allocation3 + $0x3f8] sm:$0xff] }
 0x20a   : > { %7503 = vmatprep.subr.mxu0 %v4498_v10  ;;  %7273 = vmatmul.mubr.f32.gmra.mxu1 %v9780_v0  ;;  %3513 = vst [vmem:[#allocation2 + $0xd0] sm:$0xff] %v3485_v6  ;;  %v9791_v53 = vld [vmem:[#allocation2 + $0xa9] sm:$0xff]  ;;  %v9793_v24 = vld [vmem:[#allocation2 + $0xb1] sm:$0xff] }
 0x20b   : > { %7504 = vmatpush3.msra.mxu0 %v4498_v10  ;;  %7305 = vmatprep.subr.mxu1 %v3543_v7  ;;  %v3988_v45 = vld [vmem:[#allocation2 + $0xaa] sm:$0xff]  ;;  %v3989_v43 = vld [vmem:[#allocation2 + $0xb2] sm:$0xff] }
 0x20c   : > { %7409 = vmatmul.mubr.f32.gmra.mxu0 %v3986_v38  ;;  %7505 = vmatprep.subr.mxu0 %v4497_v37  ;;  %v4493_v38 = vld [vmem:[#allocation3 + $0x208] sm:$0xff] }
 0x20d   : > { %7275 = vmatprep.mubr.f32.mxu1 %v9786_v35  ;;  %7306 = vmatpush3.msra.mxu1 %v3543_v7 }
 0x20e   : > { %7411 = vmatprep.mubr.f32.mxu0 %v3987_v11  ;;  %7506 = vmatpush3.msra.mxu0 %v4497_v37  ;;  %v9797_v10 = vld [vmem:[#allocation2 + $0xb9] sm:$0xff]  ;;  %v3540_v37 = vld [vmem:[#allocation3] sm:$0xff] }
 0x20f   : > { %7507 = vmatprep.subr.mxu0 %v4496_v47  ;;  %7307 = vmatprep.subr.mxu1 %v3542_v33  ;;  %v9799_v7 = vld [vmem:[#allocation2 + $0xba] sm:$0xff]  ;;  %v4492_v11 = vld [vmem:[#allocation3 + $0x200] sm:$0xff] }
 0x210   : > { %7508 = vmatpush3.msra.mxu0 %v4496_v47  ;;  %7276 = vmatmul.mubr.f32.gmra.mxu1 %v9791_v53  ;;  %v4257_v47 = vld [vmem:[#allocation3 + $0x1f8] sm:$0xff] }
 0x211   : > { %7308 = vmatpush3.msra.mxu1 %v3542_v33  ;;  %7412 = vmatmul.mubr.f32.gmra.mxu0 %v3988_v45  ;;  %v10818_v33 = vmax.f32 %v9433_v28, 0.0  ;;  %v4256_v45 = vld [vmem:[#allocation3 + $0x1f0] sm:$0xff]  ;;  %v10821_v28 = vmax.f32 %v9492_v18, 0.0  ;;  %v5007_v18 = vld [vmem:[#allocation3 + $0x378] sm:$0xff] }
 0x212   : > { %7509 = vmatprep.subr.mxu0 %v4495_v26  ;;  %7278 = vmatprep.mubr.f32.mxu1 %v9793_v24 }
 0x213   : > { %7414 = vmatprep.mubr.f32.mxu0 %v3989_v43  ;;  %7510 = vmatpush3.msra.mxu0 %v4495_v26  ;;  %v10819_v26 = vmax.f32 %v9474_v23, 0.0  ;;  %v4253_v23 = vld [vmem:[#allocation3 + $0x1d8] sm:$0xff]  ;;  %v4246_v43 = vld [vmem:[#allocation3 + $0x1a0] sm:$0xff] }
 0x214   : > { %7309 = vmatprep.subr.mxu1 %v3541_v12  ;;  %7511 = vmatprep.subr.mxu0 %v4494_v4 }
 0x215   : > { %7310 = vmatpush3.msra.mxu1 %v3541_v12  ;;  %7512 = vmatpush3.msra.mxu0 %v4494_v4  ;;  %v4244_v12 = vld [vmem:[#allocation3 + $0x190] sm:$0xff]  ;;  %v4243_v4 = vld [vmem:[#allocation3 + $0x188] sm:$0xff] }
 0x216   : > { %7279 = vmatmul.mubr.f32.gmra.mxu1 %v9797_v10  ;;  %7415 = vmatmul.mubr.f32.gmra.mxu0 %v9799_v7 }
 0x217   : > { %7513 = vmatprep.subr.mxu0 %v4493_v38  ;;  %7311 = vmatprep.subr.mxu1 %v3540_v37 }
 0x218   : > { %7313 = vmatprep.mubr.f32.mxu1 %v3459_v46  ;;  %7514 = vmatpush3.msra.mxu0 %v4493_v38  ;;  %v10820_v46 = vmax.f32 %v9457_v21, 0.0  ;;  %v4252_v21 = vld [vmem:[#allocation3 + $0x1d0] sm:$0xff]  ;;  %v9862_v38 = vld [vmem:[#allocation2 + $0xc1] sm:$0xff] }
 0x219   : > { %7517 = vmatprep.mubr.f32.mxu0 %v9556_v25  ;;  %7312 = vmatpush3.msra.mxu1 %v3540_v37  ;;  %v4254_v25 = vld [vmem:[#allocation3 + $0x1e0] sm:$0xff] }
 0x21a   : > { %7515 = vmatprep.subr.mxu0 %v4492_v11  ;;  %7314 = vmatmul.mubr.f32.vlgmr.msra.gmra.mxu1 %v10818_v33  ;;  %v4242_v37 = vld [vmem:[#allocation3 + $0x180] sm:$0xff]  ;;  %v4967_v33 = vld [vmem:[#allocation2 + $0x20] sm:$0xff] }
 0x21b   : > { %7516 = vmatpush3.msra.mxu0 %v4492_v11  ;;  %7417 = vmatprep.subr.mxu1 %v4257_v47  ;;  %v9865_v11 = vld [vmem:[#allocation2 + $0xc9] sm:$0xff] }
 0x21c   : > { %7518 = vmatmul.mubr.f32.vlgmr.msra.gmra.mxu0 %v9581_v61  ;;  %7316 = vmatprep.mubr.f32.mxu1 %v10819_v26  ;;  %v10822_v61 = vmax.f32 %v9482_v52, 0.0  ;;  %v10825_v52 = vmax.f32 %v9553_v19, 0.0  ;;  %v4250_v19 = vld [vmem:[#allocation3 + $0x1c0] sm:$0xff]  ;;  %v4218_v26 = vld [vmem:[#allocation2 + $0x18] sm:$0xff] }
 0x21d   : > { %7418 = vmatpush3.msra.mxu1 %v4257_v47  ;;  %7520 = vmatprep.mubr.f32.mxu0 %v9583_v30  ;;  %v10823_v30 = vmax.f32 %v9523_v42, 0.0  ;;  %v5006_v42 = vld [vmem:[#allocation3 + $0x370] sm:$0xff]  ;;  %v4992_v47 = vld [vmem:[#allocation3 + $0x300] sm:$0xff] }
 0x21e   : > { %7419 = vmatprep.subr.mxu1 %v4256_v45  ;;  %7317 = vmatmul.mubr.f32.gmra.mxu1 %v10820_v46  ;;  %v4756_v46 = vld [vmem:[#allocation3 + $0x2f0] sm:$0xff] }
 0x21f   : > { %7420 = vmatpush3.msra.mxu1 %v4256_v45  ;;  %7319 = vmatprep.mubr.f32.mxu1 %v10821_v28  ;;  %v4757_v45 = vld [vmem:[#allocation3 + $0x2f8] sm:$0xff]  ;;  %v4969_v28 = vld [vmem:[#allocation2 + $0x30] sm:$0xff] }
 0x220   : > { %7521 = vmatmul.mubr.f32.gmra.mxu0 %v9613_v54  ;;  %7421 = vmatprep.subr.mxu1 %v4255_v39  ;;  %v4251_v54 = vld [vmem:[#allocation3 + $0x1c8] sm:$0xff] }
 0x221   : > { %7523 = vmatprep.mubr.f32.mxu0 %v9615_v59  ;;  %7422 = vmatpush3.msra.mxu1 %v4255_v39  ;;  %v10824_v59 = vmax.f32 %v9508_v9, 0.0  ;;  %v10827_v9 = vmax.f32 %v9589_v60, 0.0  ;;  %v4249_v60 = vld [vmem:[#allocation3 + $0x1b8] sm:$0xff]  ;;  %v4968_v39 = vld [vmem:[#allocation2 + $0x28] sm:$0xff] }
 0x222   : > { %7320 = vmatmul.mubr.f32.gmra.mxu1 %v10822_v61  ;;  %7423 = vmatprep.subr.mxu1 %v4254_v25  ;;  %v4754_v61 = vld [vmem:[#allocation3 + $0x2e0] sm:$0xff] }
 0x223   : > { %7322 = vmatprep.mubr.f32.mxu1 %v10823_v30  ;;  %7424 = vmatpush3.msra.mxu1 %v4254_v25  ;;  %v4755_v25 = vld [vmem:[#allocation3 + $0x2e8] sm:$0xff]  ;;  %v4971_v30 = vld [vmem:[#allocation2 + $0x40] sm:$0xff] }
 0x224   : > { %7524 = vmatmul.mubr.f32.gmra.mxu0 %v9645_v57  ;;  %7425 = vmatprep.subr.mxu1 %v4253_v23  ;;  %v10826_v57 = vmax.f32 %v9537_v29, 0.0  ;;  %v5004_v29 = vld [vmem:[#allocation3 + $0x360] sm:$0xff] }
 0x225   : > { %7526 = vmatprep.mubr.f32.mxu0 %v9647_v5  ;;  %7426 = vmatpush3.msra.mxu1 %v4253_v23  ;;  %v5005_v5 = vld [vmem:[#allocation3 + $0x368] sm:$0xff]  ;;  %v4970_v23 = vld [vmem:[#allocation2 + $0x38] sm:$0xff] }
 0x226   : > { %7323 = vmatmul.mubr.f32.gmra.mxu1 %v10824_v59  ;;  %7427 = vmatprep.subr.mxu1 %v4252_v21  ;;  %v4752_v59 = vld [vmem:[#allocation3 + $0x2d0] sm:$0xff] }
 0x227   : > { %7325 = vmatprep.mubr.f32.mxu1 %v10825_v52  ;;  %7428 = vmatpush3.msra.mxu1 %v4252_v21  ;;  %v4753_v21 = vld [vmem:[#allocation3 + $0x2d8] sm:$0xff]  ;;  %v4973_v52 = vld [vmem:[#allocation2 + $0x50] sm:$0xff] }
 0x228   : > { %7527 = vmatmul.mubr.f32.gmra.mxu0 %v9673_v20  ;;  %7621 = vmatprep.subr.mxu0 %v5007_v18  ;;  %v10828_v20 = vmax.f32 %v9570_v36, 0.0  ;;  %v5002_v36 = vld [vmem:[#allocation3 + $0x350] sm:$0xff] }
 0x229   : > { %7529 = vmatprep.mubr.f32.mxu0 %v9675_v50  ;;  %7622 = vmatpush3.msra.mxu0 %v5007_v18  ;;  %v5003_v50 = vld [vmem:[#allocation3 + $0x358] sm:$0xff]  ;;  %v4972_v18 = vld [vmem:[#allocation2 + $0x48] sm:$0xff] }
 0x22a   : > { %7326 = vmatmul.mubr.f32.gmra.mxu1 %v10826_v57  ;;  %7429 = vmatprep.subr.mxu1 %v4251_v54  ;;  %v4751_v57 = vld [vmem:[#allocation3 + $0x2c8] sm:$0xff] }
 0x22b   : > { %7328 = vmatprep.mubr.f32.mxu1 %v10827_v9  ;;  %7623 = vmatprep.subr.mxu0 %v5006_v42  ;;  %v5506_v9 = vld [vmem:[#allocation3 + $0x470] sm:$0xff] }
 0x22c   : > { %7530 = vmatmul.mubr.f32.gmra.mxu0 %v9697_v31  ;;  %7430 = vmatpush3.msra.mxu1 %v4251_v54  ;;  %v10829_v31 = vmax.f32 %v9604_v63, 0.0  ;;  %v10830_v63 = vmax.f32 %v9637_v3, 0.0  ;;  %v4998_v3 = vld [vmem:[#allocation3 + $0x330] sm:$0xff]  ;;  %v5507_v54 = vld [vmem:[#allocation3 + $0x478] sm:$0xff] }
 0x22d   : > { %7532 = vmatprep.mubr.f32.mxu0 %v9699_v32  ;;  %7624 = vmatpush3.msra.mxu0 %v5006_v42  ;;  %v4248_v32 = vld [vmem:[#allocation3 + $0x1b0] sm:$0xff] }
 0x22e   : > { %7329 = vmatmul.mubr.f32.gmra.mxu1 %v10828_v20  ;;  %7625 = vmatprep.subr.mxu0 %v5005_v5  ;;  %v4974_v42 = vld [vmem:[#allocation2 + $0x58] sm:$0xff]  ;;  %v5505_v20 = vld [vmem:[#allocation3 + $0x468] sm:$0xff] }
 0x22f   : > { %7331 = vmatprep.mubr.f32.mxu1 %v9634_v49  ;;  %7431 = vmatprep.subr.mxu1 %v4250_v19 }
 0x230   : > { %7533 = vmatmul.mubr.f32.gmra.mxu0 %v9721_v56  ;;  %7432 = vmatpush3.msra.mxu1 %v4250_v19  ;;  %v5001_v56 = vld [vmem:[#allocation3 + $0x348] sm:$0xff]  ;;  %v4976_v19 = vld [vmem:[#allocation2 + $0x68] sm:$0xff] }
 0x231   : > { %7535 = vmatprep.mubr.f32.mxu0 %v9723_v41  ;;  %7626 = vmatpush3.msra.mxu0 %v5005_v5  ;;  %v4247_v41 = vld [vmem:[#allocation3 + $0x1a8] sm:$0xff]  ;;  %v4227_v5 = vld [vmem:[#allocation2 + $0x60] sm:$0xff] }
 0x232   : > { %7627 = vmatprep.subr.mxu0 %v5004_v29  ;;  %7332 = vmatmul.mubr.f32.gmra.mxu1 %v10829_v31  ;;  %v5503_v31 = vld [vmem:[#allocation3 + $0x458] sm:$0xff] }
 0x233   : > { %7628 = vmatpush3.msra.mxu0 %v5004_v29  ;;  %7433 = vmatprep.subr.mxu1 %v4249_v60  ;;  %v4750_v29 = vld [vmem:[#allocation3 + $0x2c0] sm:$0xff] }
 0x234   : > { %7536 = vmatmul.mubr.f32.gmra.mxu0 %v9741_v62  ;;  %7629 = vmatprep.subr.mxu0 %v5003_v50  ;;  %v5000_v62 = vld [vmem:[#allocation3 + $0x340] sm:$0xff] }
 0x235   : > { %7334 = vmatprep.mubr.f32.mxu1 %v9662_v58  ;;  %7434 = vmatpush3.msra.mxu1 %v4249_v60  ;;  %v4978_v60 = vld [vmem:[#allocation2 + $0x78] sm:$0xff] }
 0x236   : > { %7538 = vmatprep.mubr.f32.mxu0 %v9748_v15  ;;  %7630 = vmatpush3.msra.mxu0 %v5003_v50  ;;  %v4999_v15 = vld [vmem:[#allocation3 + $0x338] sm:$0xff] }
 0x237   : > { %7631 = vmatprep.subr.mxu0 %v5002_v36  ;;  %7435 = vmatprep.subr.mxu1 %v4248_v32  ;;  %v4749_v50 = vld [vmem:[#allocation3 + $0x2b8] sm:$0xff] }
 0x238   : > { %7632 = vmatpush3.msra.mxu0 %v5002_v36  ;;  %7335 = vmatmul.mubr.f32.gmra.mxu1 %v10830_v63  ;;  %v5502_v36 = vld [vmem:[#allocation3 + $0x450] sm:$0xff]  ;;  %v4747_v63 = vld [vmem:[#allocation3 + $0x2a8] sm:$0xff] }
 0x239   : > { %7436 = vmatpush3.msra.mxu1 %v4248_v32  ;;  %7539 = vmatmul.mubr.f32.gmra.mxu0 %v9762_v2  ;;  %v4245_v2 = vld [vmem:[#allocation3 + $0x198] sm:$0xff]  ;;  %v4748_v32 = vld [vmem:[#allocation3 + $0x2b0] sm:$0xff] }
 0x23a   : > { %7633 = vmatprep.subr.mxu0 %v5001_v56  ;;  %7337 = vmatprep.mubr.f32.mxu1 %v9688_v16 }
 0x23b   : > { %7541 = vmatprep.mubr.f32.mxu0 %v9764_v14  ;;  %7634 = vmatpush3.msra.mxu0 %v5001_v56  ;;  %v4997_v14 = vld [vmem:[#allocation3 + $0x328] sm:$0xff] }
 0x23c   : > { %7437 = vmatprep.subr.mxu1 %v4247_v41  ;;  %7635 = vmatprep.subr.mxu0 %v5000_v62  ;;  %v5501_v56 = vld [vmem:[#allocation3 + $0x448] sm:$0xff] }
 0x23d   : > { %7438 = vmatpush3.msra.mxu1 %v4247_v41  ;;  %7636 = vmatpush3.msra.mxu0 %v5000_v62  ;;  %v4234_v41 = vld [vmem:[#allocation2 + $0x98] sm:$0xff]  ;;  %v4746_v62 = vld [vmem:[#allocation3 + $0x2a0] sm:$0xff] }
 0x23e   : > { %7338 = vmatmul.mubr.f32.gmra.mxu1 %v9678_v55  ;;  %7542 = vmatmul.mubr.f32.gmra.mxu0 %v9780_v0  ;;  %v4996_v0 = vld [vmem:[#allocation3 + $0x320] sm:$0xff] }
 0x23f   : > { %7637 = vmatprep.subr.mxu0 %v4999_v15  ;;  %7340 = vmatprep.mubr.f32.mxu1 %v9712_v34 }
 0x240   : > { %7439 = vmatprep.subr.mxu1 %v4246_v43  ;;  %7544 = vmatprep.mubr.f32.mxu0 %v9786_v35  ;;  %v4995_v35 = vld [vmem:[#allocation3 + $0x318] sm:$0xff] }
 0x241   : > { %7638 = vmatpush3.msra.mxu0 %v4999_v15  ;;  %7440 = vmatpush3.msra.mxu1 %v4246_v43  ;;  %v5497_v15 = vld [vmem:[#allocation3 + $0x428] sm:$0xff]  ;;  %v5496_v43 = vld [vmem:[#allocation3 + $0x420] sm:$0xff] }
 0x242   : > { %7639 = vmatprep.subr.mxu0 %v4998_v3  ;;  %7341 = vmatmul.mubr.f32.gmra.mxu1 %v9702_v13 }
 0x243   : > { %7640 = vmatpush3.msra.mxu0 %v4998_v3  ;;  %7441 = vmatprep.subr.mxu1 %v4245_v2  ;;  %v4744_v3 = vld [vmem:[#allocation3 + $0x290] sm:$0xff] }
 0x244   : > { %7545 = vmatmul.mubr.f32.gmra.mxu0 %v9791_v53  ;;  %7641 = vmatprep.subr.mxu0 %v4997_v14  ;;  %v4994_v53 = vld [vmem:[#allocation3 + $0x310] sm:$0xff] }
 0x245   : > { %7343 = vmatprep.mubr.f32.mxu1 %v9735_v8  ;;  %7442 = vmatpush3.msra.mxu1 %v4245_v2  ;;  %v5494_v2 = vld [vmem:[#allocation3 + $0x410] sm:$0xff] }
 0x246   : > { %7547 = vmatprep.mubr.f32.mxu0 %v9793_v24  ;;  %7642 = vmatpush3.msra.mxu0 %v4997_v14  ;;  %v4993_v24 = vld [vmem:[#allocation3 + $0x308] sm:$0xff]  ;;  %v4742_v14 = vld [vmem:[#allocation3 + $0x280] sm:$0xff] }
 0x247   : > { %7643 = vmatprep.subr.mxu0 %v4996_v0  ;;  %7443 = vmatprep.subr.mxu1 %v4244_v12 }
 0x248   : > { %7644 = vmatpush3.msra.mxu0 %v4996_v0  ;;  %7344 = vmatmul.mubr.f32.gmra.mxu1 %v9726_v44  ;;  %v5492_v0 = vld [vmem:[#allocation3 + $0x400] sm:$0xff] }
 0x249   : > { %7444 = vmatpush3.msra.mxu1 %v4244_v12  ;;  %7548 = vmatmul.mubr.f32.gmra.mxu0 %v9797_v10  ;;  %v4217_v10 = vld [vmem:[#allocation2 + $0x10] sm:$0xff] }
 0x24a   : > { %7645 = vmatprep.subr.mxu0 %v4995_v35  ;;  %7346 = vmatprep.mubr.f32.mxu1 %v9752_v17  ;;  %v5468_v12 = vld [vmem:[#allocation2 + $0x2a] sm:$0xff] }
 0x24b   : > { %7550 = vmatprep.mubr.f32.mxu0 %v9862_v38  ;;  %7646 = vmatpush3.msra.mxu0 %v4995_v35  ;;  %v5470_v35 = vld [vmem:[#allocation2 + $0x3a] sm:$0xff] }
 0x24c   : > { %7445 = vmatprep.subr.mxu1 %v4243_v4  ;;  %7647 = vmatprep.subr.mxu0 %v4994_v53 }
 0x24d   : > { %7446 = vmatpush3.msra.mxu1 %v4243_v4  ;;  %7648 = vmatpush3.msra.mxu0 %v4994_v53  ;;  %v5254_v4 = vld [vmem:[#allocation3 + $0x3e0] sm:$0xff] }
 0x24e   : > { %7347 = vmatmul.mubr.f32.gmra.mxu1 %v9744_v27  ;;  %7551 = vmatmul.mubr.f32.gmra.mxu0 %v9865_v11  ;;  %v5471_v53 = vld [vmem:[#allocation2 + $0x42] sm:$0xff] }
 0x24f   : > { %7649 = vmatprep.subr.mxu0 %v4993_v24  ;;  %7447 = vmatprep.subr.mxu1 %v4242_v37 }
 0x250   : > { %7449 = vmatprep.mubr.f32.mxu1 %v4217_v10  ;;  %7650 = vmatpush3.msra.mxu0 %v4993_v24  ;;  %v5253_v24 = vld [vmem:[#allocation3 + $0x3d8] sm:$0xff]  ;;  %v5252_v10 = vld [vmem:[#allocation3 + $0x3d0] sm:$0xff] }
 0x251   : > { %7653 = vmatprep.mubr.f32.mxu0 %v4967_v33  ;;  %7448 = vmatpush3.msra.mxu1 %v4242_v37  ;;  %v5472_v37 = vld [vmem:[#allocation2 + $0x4a] sm:$0xff] }
 0x252   : > { %7651 = vmatprep.subr.mxu0 %v4992_v47  ;;  %7450 = vmatmul.mubr.f32.vlgmr.msra.gmra.mxu1 %v4218_v26  ;;  %v5250_v26 = vld [vmem:[#allocation3 + $0x3c0] sm:$0xff] }
 0x253   : > { %7652 = vmatpush3.msra.mxu0 %v4992_v47  ;;  %7553 = vmatprep.subr.mxu1 %v4757_v45  ;;  %v5473_v47 = vld [vmem:[#allocation2 + $0x52] sm:$0xff] }
 0x254   : > { %7654 = vmatmul.mubr.f32.vlgmr.msra.gmra.mxu0 %v4968_v39  ;;  %7452 = vmatprep.mubr.f32.mxu1 %v4967_v33  ;;  %v5251_v33 = vld [vmem:[#allocation3 + $0x3c8] sm:$0xff] }
 0x255   : > { %7554 = vmatpush3.msra.mxu1 %v4757_v45  ;;  %7656 = vmatprep.mubr.f32.mxu0 %v4969_v28  ;;  %v5474_v45 = vld [vmem:[#allocation2 + $0x5a] sm:$0xff] }
 0x256   : > { %7555 = vmatprep.subr.mxu1 %v4756_v46  ;;  %7453 = vmatmul.mubr.f32.gmra.mxu1 %v4968_v39  ;;  %v5475_v39 = vld [vmem:[#allocation2 + $0x62] sm:$0xff] }
 0x257   : > { %7556 = vmatpush3.msra.mxu1 %v4756_v46  ;;  %7455 = vmatprep.mubr.f32.mxu1 %v4969_v28  ;;  %v5249_v46 = vld [vmem:[#allocation3 + $0x3b8] sm:$0xff]  ;;  %v5476_v28 = vld [vmem:[#allocation2 + $0x6a] sm:$0xff] }
 0x258   : > { %7657 = vmatmul.mubr.f32.gmra.mxu0 %v4970_v23  ;;  %7557 = vmatprep.subr.mxu1 %v4755_v25 }
 0x259   : > { %7659 = vmatprep.mubr.f32.mxu0 %v4971_v30  ;;  %7558 = vmatpush3.msra.mxu1 %v4755_v25  ;;  %v5248_v25 = vld [vmem:[#allocation3 + $0x3b0] sm:$0xff] }
 0x25a   : > { %7456 = vmatmul.mubr.f32.gmra.mxu1 %v4970_v23  ;;  %7559 = vmatprep.subr.mxu1 %v4754_v61  ;;  %v5477_v23 = vld [vmem:[#allocation2 + $0x72] sm:$0xff] }
 0x25b   : > { %7458 = vmatprep.mubr.f32.mxu1 %v4971_v30  ;;  %7560 = vmatpush3.msra.mxu1 %v4754_v61  ;;  %v5247_v61 = vld [vmem:[#allocation3 + $0x3a8] sm:$0xff]  ;;  %v5478_v30 = vld [vmem:[#allocation2 + $0x7a] sm:$0xff] }
 0x25c   : > { %7660 = vmatmul.mubr.f32.gmra.mxu0 %v4972_v18  ;;  %7561 = vmatprep.subr.mxu1 %v4753_v21 }
 0x25d   : > { %7662 = vmatprep.mubr.f32.mxu0 %v4973_v52  ;;  %7562 = vmatpush3.msra.mxu1 %v4753_v21  ;;  %v5246_v21 = vld [vmem:[#allocation3 + $0x3a0] sm:$0xff] }
 0x25e   : > { %7459 = vmatmul.mubr.f32.gmra.mxu1 %v4972_v18  ;;  %7563 = vmatprep.subr.mxu1 %v4752_v59  ;;  %v5479_v18 = vld [vmem:[#allocation2 + $0x82] sm:$0xff] }
 0x25f   : > { %7461 = vmatprep.mubr.f32.mxu1 %v4973_v52  ;;  %7564 = vmatpush3.msra.mxu1 %v4752_v59  ;;  %v5245_v59 = vld [vmem:[#allocation3 + $0x398] sm:$0xff]  ;;  %v5480_v52 = vld [vmem:[#allocation2 + $0x8a] sm:$0xff] }
 0x260   : > { %7663 = vmatmul.mubr.f32.gmra.mxu0 %v4974_v42  ;;  %7757 = vmatprep.subr.mxu0 %v5507_v54 }
 0x261   : > { %7665 = vmatprep.mubr.f32.mxu0 %v9634_v49  ;;  %7758 = vmatpush3.msra.mxu0 %v5507_v54  ;;  %v5504_v49 = vld [vmem:[#allocation3 + $0x460] sm:$0xff]  ;;  %v5244_v54 = vld [vmem:[#allocation3 + $0x390] sm:$0xff] }
 0x262   : > { %7462 = vmatmul.mubr.f32.gmra.mxu1 %v4974_v42  ;;  %7565 = vmatprep.subr.mxu1 %v4751_v57  ;;  %v5481_v42 = vld [vmem:[#allocation2 + $0x92] sm:$0xff] }
 0x263   : > { %7464 = vmatprep.mubr.f32.mxu1 %v4227_v5  ;;  %7759 = vmatprep.subr.mxu0 %v5506_v9  ;;  %v5243_v5 = vld [vmem:[#allocation3 + $0x388] sm:$0xff] }
 0x264   : > { %7666 = vmatmul.mubr.f32.gmra.mxu0 %v4976_v19  ;;  %7566 = vmatpush3.msra.mxu1 %v4751_v57 }
 0x265   : > { %7668 = vmatprep.mubr.f32.mxu0 %v9662_v58  ;;  %7760 = vmatpush3.msra.mxu0 %v5506_v9 }
 0x266   : > { %7465 = vmatmul.mubr.f32.gmra.mxu1 %v4976_v19  ;;  %7761 = vmatprep.subr.mxu0 %v5505_v20 }
 0x267   : > { %7467 = vmatprep.mubr.f32.mxu1 %v9662_v58  ;;  %7567 = vmatprep.subr.mxu1 %v4750_v29  ;;  %v4232_v58 = vld [vmem:[#allocation2 + $0x88] sm:$0xff] }
 0x268   : > { %7669 = vmatmul.mubr.f32.gmra.mxu0 %v4978_v60  ;;  %7568 = vmatpush3.msra.mxu1 %v4750_v29  ;;  %v5482_v29 = vld [vmem:[#allocation2 + $0x9a] sm:$0xff] }
 0x269   : > { %7671 = vmatprep.mubr.f32.mxu0 %v9688_v16  ;;  %7762 = vmatpush3.msra.mxu0 %v5505_v20 }
 0x26a   : > { %7763 = vmatprep.subr.mxu0 %v5504_v49  ;;  %7468 = vmatmul.mubr.f32.gmra.mxu1 %v4978_v60  ;;  %v5242_v60 = vld [vmem:[#allocation3 + $0x380] sm:$0xff] }
 0x26b   : > { %7764 = vmatpush3.msra.mxu0 %v5504_v49  ;;  %7569 = vmatprep.subr.mxu1 %v4749_v50  ;;  %v5483_v49 = vld [vmem:[#allocation2 + $0xa2] sm:$0xff] }
 0x26c   : > { %7672 = vmatmul.mubr.f32.gmra.mxu0 %v9678_v55  ;;  %7765 = vmatprep.subr.mxu0 %v5503_v31  ;;  %v5500_v55 = vld [vmem:[#allocation3 + $0x440] sm:$0xff] }
 0x26d   : > { %7470 = vmatprep.mubr.f32.mxu1 %v9688_v16  ;;  %7570 = vmatpush3.msra.mxu1 %v4749_v50  ;;  %v5499_v16 = vld [vmem:[#allocation3 + $0x438] sm:$0xff] }
 0x26e   : > { %7674 = vmatprep.mubr.f32.mxu0 %v9712_v34  ;;  %7766 = vmatpush3.msra.mxu0 %v5503_v31 }
 0x26f   : > { %7767 = vmatprep.subr.mxu0 %v5502_v36  ;;  %7571 = vmatprep.subr.mxu1 %v4748_v32 }
 0x270   : > { %7768 = vmatpush3.msra.mxu0 %v5502_v36  ;;  %7471 = vmatmul.mubr.f32.gmra.mxu1 %v4232_v58  ;;  %v5484_v58 = vld [vmem:[#allocation2 + $0xaa] sm:$0xff] }
 0x271   : > { %7572 = vmatpush3.msra.mxu1 %v4748_v32  ;;  %7675 = vmatmul.mubr.f32.gmra.mxu0 %v9702_v13  ;;  %v5498_v13 = vld [vmem:[#allocation3 + $0x430] sm:$0xff] }
 0x272   : > { %7769 = vmatprep.subr.mxu0 %v5501_v56  ;;  %7473 = vmatprep.mubr.f32.mxu1 %v9712_v34  ;;  %v4745_v34 = vld [vmem:[#allocation3 + $0x298] sm:$0xff] }
 0x273   : > { %7677 = vmatprep.mubr.f32.mxu0 %v9735_v8  ;;  %7770 = vmatpush3.msra.mxu0 %v5501_v56  ;;  %v5485_v56 = vld [vmem:[#allocation2 + $0xb2] sm:$0xff] }
 0x274   : > { %7573 = vmatprep.subr.mxu1 %v4747_v63  ;;  %7771 = vmatprep.subr.mxu0 %v5500_v55 }
 0x275   : > { %7574 = vmatpush3.msra.mxu1 %v4747_v63  ;;  %7772 = vmatpush3.msra.mxu0 %v5500_v55 }
 0x276   : > { %7474 = vmatmul.mubr.f32.gmra.mxu1 %v4234_v41  ;;  %7678 = vmatmul.mubr.f32.gmra.mxu0 %v9726_v44 }
 0x277   : > { %7773 = vmatprep.subr.mxu0 %v5499_v16  ;;  %7476 = vmatprep.mubr.f32.mxu1 %v9735_v8  ;;  %v5495_v8 = vld [vmem:[#allocation3 + $0x418] sm:$0xff] }
 0x278   : > { %7575 = vmatprep.subr.mxu1 %v4746_v62  ;;  %7680 = vmatprep.mubr.f32.mxu0 %v9752_v17 }
 0x279   : > { %7774 = vmatpush3.msra.mxu0 %v5499_v16  ;;  %7576 = vmatpush3.msra.mxu1 %v4746_v62  ;;  %v5487_v62 = vld [vmem:[#allocation2 + $0xc2] sm:$0xff] }
 0x27a   : > { %7775 = vmatprep.subr.mxu0 %v5498_v13  ;;  %7477 = vmatmul.mubr.f32.gmra.mxu1 %v9726_v44  ;;  %v4743_v44 = vld [vmem:[#allocation3 + $0x288] sm:$0xff] }
 0x27b   : > { %7776 = vmatpush3.msra.mxu0 %v5498_v13  ;;  %7577 = vmatprep.subr.mxu1 %v4745_v34 }
 0x27c   : > { %7681 = vmatmul.mubr.f32.gmra.mxu0 %v9744_v27  ;;  %7777 = vmatprep.subr.mxu0 %v5497_v15 }
 0x27d   : > { %7479 = vmatprep.mubr.f32.mxu1 %v9752_v17  ;;  %7578 = vmatpush3.msra.mxu1 %v4745_v34  ;;  %v5493_v17 = vld [vmem:[#allocation3 + $0x408] sm:$0xff] }
 0x27e   : > { %7683 = vmatprep.mubr.f32.mxu0 %v9767_v48  ;;  %7778 = vmatpush3.msra.mxu0 %v5497_v15  ;;  %v4738_v15 = vld [vmem:[#allocation2 + $0xba] sm:$0xff] }
 0x27f   : > { %7779 = vmatprep.subr.mxu0 %v5496_v43  ;;  %7579 = vmatprep.subr.mxu1 %v4744_v3 }
 0x280   : > { %7780 = vmatpush3.msra.mxu0 %v5496_v43  ;;  %7480 = vmatmul.mubr.f32.gmra.mxu1 %v9744_v27  ;;  %v4717_v27 = vld [vmem:[#allocation2 + $0x12] sm:$0xff] }
 0x281   : > { %7580 = vmatpush3.msra.mxu1 %v4744_v3  ;;  %7684 = vmatmul.mubr.f32.gmra.mxu0 %v9758_v40 }
 0x282   : > { %7781 = vmatprep.subr.mxu0 %v5495_v8  ;;  %7482 = vmatprep.mubr.f32.mxu1 %v9767_v48  ;;  %v5467_v48 = vld [vmem:[#allocation2 + $0x22] sm:$0xff] }
 0x283   : > { %7686 = vmatprep.mubr.f32.mxu0 %v3485_v6  ;;  %7782 = vmatpush3.msra.mxu0 %v5495_v8  ;;  %v4718_v6 = vld [vmem:[#allocation2 + $0x1a] sm:$0xff]  ;;  %v5488_v8 = vld [vmem:[#allocation2 + $0xca] sm:$0xff] }
 0x284   : > { %7581 = vmatprep.subr.mxu1 %v4743_v44  ;;  %7783 = vmatprep.subr.mxu0 %v5494_v2 }
 0x285   : > { %7582 = vmatpush3.msra.mxu1 %v4743_v44  ;;  %7784 = vmatpush3.msra.mxu0 %v5494_v2  ;;  %v5489_v44 = vld [vmem:[#allocation2 + $0xd2] sm:$0xff] }
 0x286   : > { %7483 = vmatmul.mubr.f32.gmra.mxu1 %v9758_v40  ;;  %7687 = vmatmul.mubr.f32.gmra.mxu0 %v3486_v22  ;;  %v5256_v40 = vld [vmem:[#allocation3 + $0x3f0] sm:$0xff]  ;;  %v5255_v22 = vld [vmem:[#allocation3 + $0x3e8] sm:$0xff] }
 0x287   : > { %7785 = vmatprep.subr.mxu0 %v5493_v17  ;;  %7583 = vmatprep.subr.mxu1 %v4742_v14 }
 0x288   : > { %7585 = vmatprep.mubr.f32.mxu1 %v4717_v27  ;;  %7786 = vmatpush3.msra.mxu0 %v5493_v17 }
 0x289   : > { %7789 = vmatprep.mubr.f32.mxu0 %v5467_v48  ;;  %7584 = vmatpush3.msra.mxu1 %v4742_v14 }
 0x28a   : > { %7787 = vmatprep.subr.mxu0 %v5492_v0  ;;  %7586 = vmatmul.mubr.f32.vlgmr.msra.gmra.mxu1 %v4718_v6  ;;  %v5218_v6 = vld [vmem:[#allocation2 + $0x29] sm:$0xff] }
 0x28b   : > { %7788 = vmatpush3.msra.mxu0 %v5492_v0  ;;  %7689 = vmatprep.subr.mxu1 %v5257_v1  ;;  %v5490_v0 = vld [vmem:[#allocation2 + $0xda] sm:$0xff] }
 0x28c   : > { %7790 = vmatmul.mubr.f32.vlgmr.msra.gmra.mxu0 %v5468_v12  ;;  %7588 = vmatprep.mubr.f32.mxu1 %v5467_v48 }
 0x28d   : > { %7690 = vmatpush3.msra.mxu1 %v5257_v1  ;;  %7792 = vmatprep.mubr.f32.mxu0 %v5469_v51 }
 0x28e   : > { %7691 = vmatprep.subr.mxu1 %v5256_v40  ;;  %7589 = vmatmul.mubr.f32.gmra.mxu1 %v5468_v12  ;;  %v5219_v12 = vld [vmem:[#allocation2 + $0x31] sm:$0xff] }
 0x28f   : > { %7692 = vmatpush3.msra.mxu1 %v5256_v40  ;;  %7591 = vmatprep.mubr.f32.mxu1 %v5469_v51 }
 0x290   : > { %7793 = vmatmul.mubr.f32.gmra.mxu0 %v5470_v35  ;;  %7693 = vmatprep.subr.mxu1 %v5255_v22 }
 0x291   : > { %7795 = vmatprep.mubr.f32.mxu0 %v5471_v53  ;;  %7694 = vmatpush3.msra.mxu1 %v5255_v22 }
 0x292   : > { %7592 = vmatmul.mubr.f32.gmra.mxu1 %v5470_v35  ;;  %7695 = vmatprep.subr.mxu1 %v5254_v4 }
 0x293   : > { %7594 = vmatprep.mubr.f32.mxu1 %v5471_v53  ;;  %7696 = vmatpush3.msra.mxu1 %v5254_v4  ;;  %v5220_v4 = vld [vmem:[#allocation2 + $0x39] sm:$0xff]  ;;  %v5221_v53 = vld [vmem:[#allocation2 + $0x41] sm:$0xff] }
 0x294   : > { %7796 = vmatmul.mubr.f32.gmra.mxu0 %v5472_v37  ;;  %7697 = vmatprep.subr.mxu1 %v5253_v24 }
 0x295   : > { %7798 = vmatprep.mubr.f32.mxu0 %v5473_v47  ;;  %7698 = vmatpush3.msra.mxu1 %v5253_v24 }
 0x296   : > { %7595 = vmatmul.mubr.f32.gmra.mxu1 %v5472_v37  ;;  %7699 = vmatprep.subr.mxu1 %v5252_v10 }
 0x297   : > { %7597 = vmatprep.mubr.f32.mxu1 %v5473_v47  ;;  %7700 = vmatpush3.msra.mxu1 %v5252_v10  ;;  %v5222_v47 = vld [vmem:[#allocation2 + $0x49] sm:$0xff] }
 0x298   : > { %7799 = vmatmul.mubr.f32.gmra.mxu0 %v5474_v45  ;;  %7701 = vmatprep.subr.mxu1 %v5251_v33 }
 0x299   : > { %7801 = vmatprep.mubr.f32.mxu0 %v5475_v39  ;;  %7702 = vmatpush3.msra.mxu1 %v5251_v33 }
 0x29a   : > { %7598 = vmatmul.mubr.f32.gmra.mxu1 %v5474_v45  ;;  %7703 = vmatprep.subr.mxu1 %v5250_v26  ;;  %v5223_v45 = vld [vmem:[#allocation2 + $0x51] sm:$0xff] }
 0x29b   : > { %7600 = vmatprep.mubr.f32.mxu1 %v5475_v39  ;;  %7704 = vmatpush3.msra.mxu1 %v5250_v26 }
 0x29c   : > { %7802 = vmatmul.mubr.f32.gmra.mxu0 %v5476_v28  ;;  %7705 = vmatprep.subr.mxu1 %v5249_v46 }
 0x29d   : > { %7804 = vmatprep.mubr.f32.mxu0 %v5477_v23  ;;  %7706 = vmatpush3.msra.mxu1 %v5249_v46  ;;  %v5224_v46 = vld [vmem:[#allocation2 + $0x59] sm:$0xff] }
 0x29e   : > { %7601 = vmatmul.mubr.f32.gmra.mxu1 %v5476_v28  ;;  %7707 = vmatprep.subr.mxu1 %v5248_v25  ;;  %v5225_v28 = vld [vmem:[#allocation2 + $0x61] sm:$0xff] }
 0x29f   : > { %7603 = vmatprep.mubr.f32.mxu1 %v5477_v23  ;;  %7708 = vmatpush3.msra.mxu1 %v5248_v25 }
 0x2a0   : > { %7805 = vmatmul.mubr.f32.gmra.mxu0 %v5478_v30  ;;  %7709 = vmatprep.subr.mxu1 %v5247_v61  ;;  %v9894_v57 = vpop.f32.mrf.mxu1 }
 0x2a1   : > { %7807 = vmatprep.mubr.f32.mxu0 %v5479_v18  ;;  %7710 = vmatpush3.msra.mxu1 %v5247_v61  ;;  %v9896_v9 = vpop.f32.mrf.mxu0 }
 0x2a2   : > { %7604 = vmatmul.mubr.f32.gmra.mxu1 %v5478_v30  ;;  %7711 = vmatprep.subr.mxu1 %v5246_v21  ;;  %v9898_v19 = vpop.f32.mrf.mxu1 }
 0x2a3   : > { %7606 = vmatprep.mubr.f32.mxu1 %v5479_v18  ;;  %7712 = vmatpush3.msra.mxu1 %v5246_v21  ;;  %v9900_v20 = vpop.f32.mrf.mxu0  ;;  %v5226_v21 = vld [vmem:[#allocation2 + $0x69] sm:$0xff]  ;;  %v5227_v18 = vld [vmem:[#allocation2 + $0x71] sm:$0xff] }
 0x2a4   : > { %7808 = vmatmul.mubr.f32.gmra.mxu0 %v5480_v52  ;;  %7713 = vmatprep.subr.mxu1 %v5245_v59 }
 0x2a5   : > { %7810 = vmatprep.mubr.f32.mxu0 %v5481_v42  ;;  %7714 = vmatpush3.msra.mxu1 %v5245_v59  ;;  %v9902_v50 = vpop.f32.mrf.mxu1  ;;  %v9904_v31 = vpop.f32.mrf.mxu0 }
 0x2a6   : > { %7607 = vmatmul.mubr.f32.gmra.mxu1 %v5480_v52  ;;  %7715 = vmatprep.subr.mxu1 %v5244_v54 }
 0x2a7   : > { %7609 = vmatprep.mubr.f32.mxu1 %v5481_v42  ;;  %7716 = vmatpush3.msra.mxu1 %v5244_v54  ;;  %v9906_v36 = vpop.f32.mrf.mxu1  ;;  %v9908_v32 = vpop.f32.mrf.mxu0  ;;  %v5228_v42 = vld [vmem:[#allocation2 + $0x79] sm:$0xff] }
 0x2a8   : > { %7811 = vmatmul.mubr.f32.gmra.mxu0 %v5482_v29  ;;  %7717 = vmatprep.subr.mxu1 %v5243_v5 }
 0x2a9   : > { %7813 = vmatprep.mubr.f32.mxu0 %v5483_v49  ;;  %7718 = vmatpush3.msra.mxu1 %v5243_v5  ;;  %v5229_v5 = vld [vmem:[#allocation2 + $0x81] sm:$0xff] }
 0x2aa   : > { %7610 = vmatmul.mubr.f32.gmra.mxu1 %v5482_v29  ;;  %7719 = vmatprep.subr.mxu1 %v5242_v60  ;;  %v9910_v63 = vpop.f32.mrf.mxu1  ;;  %v9912_v55 = vpop.f32.mrf.mxu0 }
 0x2ab   : > { %7612 = vmatprep.mubr.f32.mxu1 %v5483_v49  ;;  %7720 = vmatpush3.msra.mxu1 %v5242_v60  ;;  %v5230_v49 = vld [vmem:[#allocation2 + $0x89] sm:$0xff] }
 0x2ac   : > { %7814 = vmatmul.mubr.f32.gmra.mxu0 %v5484_v58  ;;  %v9914_v16 = vpop.f32.mrf.mxu1  ;;  %v9916_v41 = vpop.f32.mrf.mxu0 }
 0x2ad   : > { %7816 = vmatprep.mubr.f32.mxu0 %v5485_v56 }
 0x2ae   : > { %7613 = vmatmul.mubr.f32.gmra.mxu1 %v5484_v58  ;;  %v9919_v13 = vpop.f32.mrf.mxu1 }
 0x2af   : > { %7615 = vmatprep.mubr.f32.mxu1 %v5485_v56  ;;  %v9921_v34 = vpop.f32.mrf.mxu0  ;;  %v5231_v56 = vld [vmem:[#allocation2 + $0x91] sm:$0xff] }
 0x2b0   : > { %7817 = vmatmul.mubr.f32.gmra.mxu0 %v9799_v7  ;;  %v9923_v43 = vpop.f32.mrf.mxu1  ;;  %v5217_v7 = vld [vmem:[#allocation2 + $0x21] sm:$0xff] }
 0x2b1   : > { %7819 = vmatprep.mubr.f32.mxu0 %v5487_v62  ;;  %v9925_v3 = vpop.f32.mrf.mxu0 }
 0x2b2   : > { %7616 = vmatmul.mubr.f32.gmra.mxu1 %v4738_v15 }
 0x2b3   : > { %7618 = vmatprep.mubr.f32.mxu1 %v5487_v62  ;;  %v9927_v2 = vpop.f32.mrf.mxu1  ;;  %v9929_v17 = vpop.f32.mrf.mxu0 }
 0x2b4   : > { %7820 = vmatmul.mubr.f32.gmra.mxu0 %v5488_v8 }
 0x2b5   : > { %7822 = vmatprep.mubr.f32.mxu0 %v5489_v44  ;;  %v9931_v14 = vpop.f32.mrf.mxu1  ;;  %v9933_v27 = vpop.f32.mrf.mxu0  ;;  %v5233_v44 = vld [vmem:[#allocation2 + $0xa1] sm:$0xff] }
 0x2b6   : > { %7619 = vmatmul.mubr.f32.gmra.mxu1 %v5488_v8  ;;  %v5232_v8 = vld [vmem:[#allocation2 + $0x99] sm:$0xff] }
 0x2b7   : > { %7721 = vmatprep.mubr.f32.mxu1 %v5217_v7 }
 0x2b8   : > { %7823 = vmatmul.mubr.f32.gmra.mxu0 %v5490_v0  ;;  %v9935_v48 = vpop.f32.mrf.mxu1  ;;  %v9937_v1 = vpop.f32.mrf.mxu0 }
 0x2ba   : > { %7722 = vmatmul.mubr.f32.vlgmr.msra.gmra.mxu1 %v5218_v6  ;;  %v9939_v40 = vpop.f32.mrf.mxu1  ;;  %v9941_v51 = vpop.f32.mrf.mxu0 }
 0x2bb   : > { %7724 = vmatprep.mubr.f32.mxu1 %v5219_v12 }
 0x2bc   : > { %v9943_v22 = vpop.f32.mrf.mxu1  ;;  %v9945_v35 = vpop.f32.mrf.mxu0 }
 0x2be   : > { %7725 = vmatmul.mubr.f32.gmra.mxu1 %v5220_v4  ;;  %v9947_v24 = vpop.f32.mrf.mxu1  ;;  %v9949_v37 = vpop.f32.mrf.mxu0  ;;  %v5234_v4 = vld [vmem:[#allocation2 + $0xa9] sm:$0xff] }
 0x2bf   : > { %7727 = vmatprep.mubr.f32.mxu1 %v5221_v53  ;;  %v5235_v53 = vld [vmem:[#allocation2 + $0xb1] sm:$0xff] }
 0x2c0   : > { %v9951_v10 = vpop.f32.mrf.mxu1 }
 0x2c1   : > { %v9953_v33 = vpop.f32.mrf.mxu0 }
 0x2c2   : > { %7728 = vmatmul.mubr.f32.gmra.mxu1 %v5222_v47  ;;  %v9955_v26 = vpop.f32.mrf.mxu1 }
 0x2c3   : > { %7730 = vmatprep.mubr.f32.mxu1 %v5223_v45  ;;  %v9957_v39 = vpop.f32.mrf.mxu0 }
 0x2c6   : > { %7731 = vmatmul.mubr.f32.gmra.mxu1 %v5224_v46  ;;  %v9959_v25 = vpop.f32.mrf.mxu1  ;;  %v9961_v23 = vpop.f32.mrf.mxu0 }
 0x2c7   : > { %7733 = vmatprep.mubr.f32.mxu1 %v5225_v28 }
 0x2c8   : > { %v9963_v61 = vpop.f32.mrf.mxu1  ;;  %v9965_v30 = vpop.f32.mrf.mxu0 }
 0x2ca   : > { %7734 = vmatmul.mubr.f32.gmra.mxu1 %v5226_v21  ;;  %v9967_v59 = vpop.f32.mrf.mxu1  ;;  %v5236_v21 = vld [vmem:[#allocation2 + $0xb9] sm:$0xff] }
 0x2cb   : > { %7736 = vmatprep.mubr.f32.mxu1 %v5227_v18 }
 0x2cc   : > { %v9969_v52 = vpop.f32.mrf.mxu0  ;;  %v9971_v54 = vpop.f32.mrf.mxu1 }
 0x2ce   : > { %7737 = vmatmul.mubr.f32.gmra.mxu1 %v5228_v42  ;;  %v9973_v29 = vpop.f32.mrf.mxu0 }
 0x2cf   : > { %7739 = vmatprep.mubr.f32.mxu1 %v5229_v5 }
 0x2d0   : > { %v9975_v60 = vpop.f32.mrf.mxu1 }
 0x2d1   : > { %v9977_v58 = vpop.f32.mrf.mxu0 }
 0x2d2   : > { %7740 = vmatmul.mubr.f32.gmra.mxu1 %v5230_v49  ;;  %v9979_v62 = vpop.f32.mrf.mxu1 }
 0x2d3   : > { %7742 = vmatprep.mubr.f32.mxu1 %v5231_v56  ;;  %v9981_v15 = vpop.f32.mrf.mxu0 }
 0x2d6   : > { %7743 = vmatmul.mubr.f32.gmra.mxu1 %v5232_v8  ;;  %v9983_v7 = vpop.f32.mrf.mxu1  ;;  %v9985_v0 = vpop.f32.mrf.mxu0 }
 0x2d7   : > { %7745 = vmatprep.mubr.f32.mxu1 %v5233_v44 }
 0x2d8   : > { %v9987_v6 = vpop.f32.mrf.mxu1  ;;  %v9989_v12 = vpop.f32.mrf.mxu0 }
 0x2da   : > { %7746 = vmatmul.mubr.f32.gmra.mxu1 %v5234_v4  ;;  %v7315_v47 = vpop.f32.mrf.mxu1 }
 0x2db   : > { %7748 = vmatprep.mubr.f32.mxu1 %v5235_v53  ;;  %v3854_v45 = vadd.f32 %v7315_v47, %v9894_v57 }
 0x2dc   : > { %v9992_v46 = vpop.f32.mrf.mxu0  ;;  %v3848_v28 = vpop.f32.mrf.mxu1 }
 0x2dd   : > { %v3849_v18 = vadd.f32 %v3848_v28, %v9898_v19  ;;  %v9996_v42 = vadd.f32 %v9896_v9, %v3854_v45  ;;  %v5239_v9 = vld [vmem:[#allocation2 + $0xd1] sm:$0xff]  ;;  %v5240_v28 = vld [vmem:[#allocation2 + $0xd9] sm:$0xff] }
 0x2de   : > { %7749 = vmatmul.mubr.f32.gmra.mxu1 %v5236_v21  ;;  %v9998_v5 = vpop.f32.mrf.mxu0  ;;  %v7318_v49 = vpop.f32.mrf.mxu1 }
 0x2df   : > { %7751 = vmatprep.mubr.f32.mxu1 %v9862_v38  ;;  %v3864_v56 = vadd.f32 %v7318_v49, %v9902_v50  ;;  %v10003_v8 = vadd.f32 %v9900_v20, %v3849_v18 }
 0x2e0   : > { %v10005_v57 = vpop.f32.mrf.mxu0  ;;  %v3858_v44 = vpop.f32.mrf.mxu1 }
 0x2e1   : > { %v3859_v4 = vadd.f32 %v3858_v44, %v9906_v36  ;;  %v10009_v19 = vadd.f32 %v9904_v31, %v3864_v56 }
 0x2e2   : > { %7752 = vmatmul.mubr.f32.gmra.mxu1 %v9865_v11  ;;  %v10012_v53 = vpop.f32.mrf.mxu0  ;;  %v7321_v47 = vpop.f32.mrf.mxu1 }
 0x2e3   : > { %7754 = vmatprep.mubr.f32.mxu1 %v5239_v9  ;;  %v3874_v38 = vadd.f32 %v7321_v47, %v9910_v63  ;;  %v10016_v20 = vadd.f32 %v9908_v32, %v3859_v4 }
 0x2e4   : > { %v10018_v50 = vpop.f32.mrf.mxu0  ;;  %v3868_v45 = vpop.f32.mrf.mxu1 }
 0x2e5   : > { %v3869_v36 = vadd.f32 %v3868_v45, %v9914_v16  ;;  %v10022_v31 = vadd.f32 %v9912_v55, %v3874_v38 }
 0x2e6   : > { %7755 = vmatmul.mubr.f32.gmra.mxu1 %v5240_v28  ;;  %v10024_v11 = vpop.f32.mrf.mxu0  ;;  %v7324_v21 = vpop.f32.mrf.mxu1 }
 0x2e7   : > { %v3884_v18 = vadd.f32 %v7324_v21, %v9919_v13  ;;  %v10028_v63 = vadd.f32 %v9916_v41, %v3869_v36 }
 0x2e8   : > { %v10030_v32 = vpop.f32.mrf.mxu0  ;;  %v3878_v49 = vpop.f32.mrf.mxu1 }
 0x2e9   : > { %v3879_v56 = vadd.f32 %v3878_v49, %v9923_v43  ;;  %v10034_v44 = vadd.f32 %v9921_v34, %v3884_v18 }
 0x2ea   : > { %v10036_v16 = vpop.f32.mrf.mxu0  ;;  %v7327_v55 = vpop.f32.mrf.mxu1 }
 0x2eb   : > { %v3894_v4 = vadd.f32 %v7327_v55, %v9927_v2  ;;  %v10040_v9 = vadd.f32 %v9925_v3, %v3879_v56 }
 0x2ec   : > { %v10042_v13 = vpop.f32.mrf.mxu0  ;;  %v3888_v41 = vpop.f32.mrf.mxu1 }
 0x2ed   : > { %v3889_v47 = vadd.f32 %v3888_v41, %v9931_v14  ;;  %v10046_v38 = vadd.f32 %v9929_v17, %v3894_v4 }
 0x2ee   : > { %v10048_v43 = vpop.f32.mrf.mxu0  ;;  %v7330_v34 = vpop.f32.mrf.mxu1 }
 0x2ef   : > { %v3904_v45 = vadd.f32 %v7330_v34, %v9935_v48  ;;  %v10052_v28 = vadd.f32 %v9933_v27, %v3889_v47 }
 0x2f0   : > { %v10054_v2 = vpop.f32.mrf.mxu0  ;;  %v3898_v3 = vpop.f32.mrf.mxu1 }
 0x2f1   : > { %v3899_v36 = vadd.f32 %v3898_v3, %v9939_v40  ;;  %v10058_v21 = vadd.f32 %v9937_v1, %v3904_v45 }
 0x2f2   : > { %v10060_v14 = vpop.f32.mrf.mxu0  ;;  %v7333_v17 = vpop.f32.mrf.mxu1 }
 0x2f3   : > { %v3914_v18 = vadd.f32 %v7333_v17, %v9943_v22  ;;  %v10064_v49 = vadd.f32 %v9941_v51, %v3899_v36 }
 0x2f4   : > { %v10066_v48 = vpop.f32.mrf.mxu0  ;;  %v3908_v27 = vpop.f32.mrf.mxu1 }
 0x2f5   : > { %v3909_v56 = vadd.f32 %v3908_v27, %v9947_v24  ;;  %v10070_v55 = vadd.f32 %v9945_v35, %v3914_v18 }
 0x2f6   : > { %v10072_v40 = vpop.f32.mrf.mxu0 }
 0x2f7   : > { %v10075_v1 = vadd.f32 %v9949_v37, %v3909_v56 }
 0x2f8   : > { %v7336_v4 = vpop.f32.mrf.mxu1 }
 0x2f9   : > { %v3924_v41 = vadd.f32 %v7336_v4, %v9951_v10  ;;  %v10078_v22 = vpop.f32.mrf.mxu0 }
 0x2fa   : > { %v3918_v51 = vpop.f32.mrf.mxu1 }
 0x2fb   : > { %v3919_v47 = vadd.f32 %v3918_v51, %v9955_v26  ;;  %v10081_v34 = vpop.f32.mrf.mxu0  ;;  %v10084_v24 = vadd.f32 %v9953_v33, %v3924_v41 }
 0x2fd   : > { %v10087_v35 = vadd.f32 %v9957_v39, %v3919_v47 }
 0x2fe   : > { %v7339_v45 = vpop.f32.mrf.mxu1  ;;  %v10089_v3 = vpop.f32.mrf.mxu0 }
 0x2ff   : > { %v3934_v37 = vadd.f32 %v7339_v45, %v9959_v25 }
 0x300   : > { %v3928_v36 = vpop.f32.mrf.mxu1  ;;  %v10092_v10 = vpop.f32.mrf.mxu0 }
 0x301   : > { %v3929_v17 = vadd.f32 %v3928_v36, %v9963_v61  ;;  %v10096_v26 = vadd.f32 %v9961_v23, %v3934_v37 }
 0x302   : > { %v7342_v18 = vpop.f32.mrf.mxu1 }
 0x303   : > { %v3944_v33 = vadd.f32 %v7342_v18, %v9967_v59  ;;  %v10100_v27 = vadd.f32 %v9965_v30, %v3929_v17 }
 0x304   : > { %v10102_v39 = vpop.f32.mrf.mxu0  ;;  %v3938_v56 = vpop.f32.mrf.mxu1 }
 0x305   : > { %v3939_v4 = vadd.f32 %v3938_v56, %v9971_v54  ;;  %v10106_v25 = vadd.f32 %v9969_v52, %v3944_v33 }
 0x306   : > { %v10108_v41 = vpop.f32.mrf.mxu0 }
 0x307   : > { %v10111_v61 = vadd.f32 %v9973_v29, %v3939_v4 }
 0x308   : > { %v7345_v23 = vpop.f32.mrf.mxu1 }
 0x309   : > { %v3954_v51 = vadd.f32 %v7345_v23, %v9975_v60  ;;  %v10114_v59 = vpop.f32.mrf.mxu0 }
 0x30a   : > { %v3948_v30 = vpop.f32.mrf.mxu1 }
 0x30b   : > { %v3949_v47 = vadd.f32 %v3948_v30, %v9979_v62  ;;  %v10117_v45 = vpop.f32.mrf.mxu0  ;;  %v10120_v54 = vadd.f32 %v9977_v58, %v3954_v51 }
 0x30d   : > { %v10123_v52 = vadd.f32 %v9981_v15, %v3949_v47 }
 0x30e   : > { %v7348_v37 = vpop.f32.mrf.mxu1  ;;  %v10125_v36 = vpop.f32.mrf.mxu0 }
 0x30f   : > { %v3964_v29 = vadd.f32 %v7348_v37, %v9983_v7 }
 0x310   : > { %v3958_v17 = vpop.f32.mrf.mxu1  ;;  %v10128_v60 = vpop.f32.mrf.mxu0 }
 0x311   : > { %v3959_v18 = vadd.f32 %v3958_v17, %v9987_v6  ;;  %v10132_v62 = vadd.f32 %v9985_v0, %v3964_v29 }
 0x312   : > { %v7451_v33 = vpop.f32.mrf.mxu1 }
 0x313   : > { %v4444_v58 = vadd.f32 %v7451_v33, %v9996_v42  ;;  %v10136_v56 = vadd.f32 %v9989_v12, %v3959_v18 }
 0x314   : > { %v10138_v15 = vpop.f32.mrf.mxu0  ;;  %v4324_v4 = vpop.f32.mrf.mxu1 }
 0x315   : > { %v4443_v23 = vadd.f32 %v4324_v4, %v10003_v8  ;;  %v10142_v7 = vadd.f32 %v9992_v46, %v4444_v58 }
 0x316   : > { %v10144_v51 = vpop.f32.mrf.mxu0  ;;  %v7454_v6 = vpop.f32.mrf.mxu1 }
 0x317   : > { %v4446_v0 = vadd.f32 %v7454_v6, %v10009_v19  ;;  %v10148_v30 = vadd.f32 %v9998_v5, %v4443_v23 }
 0x318   : > { %v10150_v42 = vpop.f32.mrf.mxu0  ;;  %v4334_v12 = vpop.f32.mrf.mxu1 }
 0x319   : > { %v4445_v47 = vadd.f32 %v4334_v12, %v10016_v20  ;;  %v10154_v37 = vadd.f32 %v10005_v57, %v4446_v0 }
 0x31a   : > { %v10156_v8 = vpop.f32.mrf.mxu0  ;;  %v7457_v46 = vpop.f32.mrf.mxu1 }
 0x31b   : > { %v4448_v29 = vadd.f32 %v7457_v46, %v10022_v31  ;;  %v10160_v17 = vadd.f32 %v10012_v53, %v4445_v47 }
 0x31c   : > { %v10162_v19 = vpop.f32.mrf.mxu0  ;;  %v4344_v5 = vpop.f32.mrf.mxu1 }
 0x31d   : > { %v4447_v18 = vadd.f32 %v4344_v5, %v10028_v63  ;;  %v10166_v33 = vadd.f32 %v10018_v50, %v4448_v29 }
 0x31e   : > { %v10168_v20 = vpop.f32.mrf.mxu0  ;;  %v7460_v57 = vpop.f32.mrf.mxu1 }
 0x31f   : > { %v4450_v58 = vadd.f32 %v7460_v57, %v10034_v44  ;;  %v10172_v4 = vadd.f32 %v10024_v11, %v4447_v18 }
 0x320   : > { %v10174_v31 = vpop.f32.mrf.mxu0  ;;  %v4354_v53 = vpop.f32.mrf.mxu1 }
 0x321   : > { %v4449_v23 = vadd.f32 %v4354_v53, %v10040_v9  ;;  %v10178_v6 = vadd.f32 %v10030_v32, %v4450_v58 }
 0x322   : > { %v10180_v63 = vpop.f32.mrf.mxu0  ;;  %v7463_v50 = vpop.f32.mrf.mxu1 }
 0x323   : > { %v4452_v0 = vadd.f32 %v7463_v50, %v10046_v38  ;;  %v10184_v12 = vadd.f32 %v10036_v16, %v4449_v23 }
 0x324   : > { %v10186_v44 = vpop.f32.mrf.mxu0  ;;  %v4364_v11 = vpop.f32.mrf.mxu1 }
 0x325   : > { %v4451_v47 = vadd.f32 %v4364_v11, %v10052_v28  ;;  %v10190_v46 = vadd.f32 %v10042_v13, %v4452_v0 }
 0x326   : > { %v10192_v9 = vpop.f32.mrf.mxu0  ;;  %v7466_v32 = vpop.f32.mrf.mxu1 }
 0x327   : > { %v4454_v29 = vadd.f32 %v7466_v32, %v10058_v21  ;;  %v10196_v5 = vadd.f32 %v10048_v43, %v4451_v47 }
 0x328   : > { %v10198_v38 = vpop.f32.mrf.mxu0  ;;  %v4374_v16 = vpop.f32.mrf.mxu1 }
 0x329   : > { %v4453_v18 = vadd.f32 %v4374_v16, %v10064_v49  ;;  %v10202_v57 = vadd.f32 %v10054_v2, %v4454_v29 }
 0x32a   : > { %v10204_v28 = vpop.f32.mrf.mxu0  ;;  %v7469_v13 = vpop.f32.mrf.mxu1 }
 0x32b   : > { %v4456_v58 = vadd.f32 %v7469_v13, %v10070_v55  ;;  %v10208_v53 = vadd.f32 %v10060_v14, %v4453_v18 }
 0x32c   : > { %v10210_v21 = vpop.f32.mrf.mxu0  ;;  %v4384_v43 = vpop.f32.mrf.mxu1 }
 0x32d   : > { %v4455_v23 = vadd.f32 %v4384_v43, %v10075_v1  ;;  %v10214_v50 = vadd.f32 %v10066_v48, %v4456_v58 }
 0x32e   : > { %v10216_v49 = vpop.f32.mrf.mxu0 }
 0x32f   : > { %10831 = vst [vmem:[#allocation9_spill] sm:$0xff] %v10216_v49  ;;  %v10219_v2 = vadd.f32 %v10072_v40, %v4455_v23 }
 0x330   : > { %v7472_v0 = vpop.f32.mrf.mxu1 }
 0x331   : > { %v4458_v11 = vadd.f32 %v7472_v0, %v10084_v24  ;;  %v10222_v55 = vpop.f32.mrf.mxu0 }
 0x332   : > { %10832 = vst [vmem:[#allocation10_spill] sm:$0xff] %v10222_v55  ;;  %v4394_v14 = vpop.f32.mrf.mxu1 }
 0x333   : > { %v4457_v47 = vadd.f32 %v4394_v14, %v10087_v35  ;;  %v10225_v32 = vpop.f32.mrf.mxu0  ;;  %v10228_v1 = vadd.f32 %v10078_v22, %v4458_v11 }
 0x334   : > { %10833 = vst [vmem:[#allocation11_spill] sm:$0xff] %v10225_v32 }
 0x335   : > { %v10231_v48 = vadd.f32 %v10081_v34, %v4457_v47 }
 0x336   : > { %v7475_v29 = vpop.f32.mrf.mxu1  ;;  %v10233_v16 = vpop.f32.mrf.mxu0 }
 0x337   : > { %10834 = vst [vmem:[#allocation13_spill] sm:$0xff] %v10233_v16  ;;  %v4460_v40 = vadd.f32 %v7475_v29, %v10096_v26 }
 0x338   : > { %v4404_v18 = vpop.f32.mrf.mxu1  ;;  %v10236_v24 = vpop.f32.mrf.mxu0 }
 0x339   : > { %10835 = vst [vmem:[#allocation12_spill] sm:$0xff] %v10236_v24  ;;  %v4459_v13 = vadd.f32 %v4404_v18, %v10100_v27  ;;  %v10240_v35 = vadd.f32 %v10089_v3, %v4460_v40 }
 0x33a   : > { %v7478_v58 = vpop.f32.mrf.mxu1 }
 0x33b   : > { %10836 = vst [vmem:[#allocation14_spill] sm:$0xff] %v10240_v35  ;;  %v4462_v22 = vadd.f32 %v7478_v58, %v10106_v25  ;;  %v10244_v43 = vadd.f32 %v10092_v10, %v4459_v13 }
 0x33c   : > { %v10246_v34 = vpop.f32.mrf.mxu0  ;;  %v4414_v23 = vpop.f32.mrf.mxu1 }
 0x33d   : > { %10837 = vst [vmem:[#allocation15_spill] sm:$0xff] %v10244_v43  ;;  %10838 = vst [vmem:[#allocation17_spill] sm:$0xff] %v10246_v34  ;;  %v4461_v0 = vadd.f32 %v4414_v23, %v10111_v61  ;;  %v10250_v26 = vadd.f32 %v10102_v39, %v4462_v22 }
 0x33e   : > { %v10252_v11 = vpop.f32.mrf.mxu0 }
 0x33f   : > { %10839 = vst [vmem:[#allocation16_spill] sm:$0xff] %v10250_v26  ;;  %10840 = vst [vmem:[#allocation18_spill] sm:$0xff] %v10252_v11  ;;  %v10255_v27 = vadd.f32 %v10108_v41, %v4461_v0 }
 0x340   : > { %v7481_v3 = vpop.f32.mrf.mxu1 }
 0x341   : > { %10841 = vst [vmem:[#allocation19_spill] sm:$0xff] %v10255_v27  ;;  %v4464_v14 = vadd.f32 %v7481_v3, %v10120_v54  ;;  %v10258_v25 = vpop.f32.mrf.mxu0 }
 0x342   : > { %10842 = vst [vmem:[#allocation20_spill] sm:$0xff] %v10258_v25  ;;  %v4424_v10 = vpop.f32.mrf.mxu1 }
 0x343   : > { %v4463_v47 = vadd.f32 %v4424_v10, %v10123_v52  ;;  %v10261_v29 = vpop.f32.mrf.mxu0  ;;  %v10264_v61 = vadd.f32 %v10114_v59, %v4464_v14 }
 0x344   : > { %10843 = vst [vmem:[#allocation21_spill] sm:$0xff] %v10261_v29 }
 0x345   : > { %10844 = vst [vmem:[#allocation22_spill] sm:$0xff] %v10264_v61  ;;  %v10267_v39 = vadd.f32 %v10117_v45, %v4463_v47 }
 0x346   : > { %v7484_v40 = vpop.f32.mrf.mxu1  ;;  %v10269_v18 = vpop.f32.mrf.mxu0 }
 0x347   : > { %10845 = vst [vmem:[#allocation27_spill] sm:$0xff] %v10267_v39  ;;  %10846 = vst [vmem:[#allocation23_spill] sm:$0xff] %v10269_v18  ;;  %v4466_v41 = vadd.f32 %v7484_v40, %v10132_v62 }
 0x348   : > { %v4434_v13 = vpop.f32.mrf.mxu1  ;;  %v10276_v52 = vpop.f32.mrf.mxu0 }
 0x349   : > { %v4465_v54 = vadd.f32 %v4434_v13, %v10136_v56  ;;  %v10274_v58 = vadd.f32 %v10125_v36, %v4466_v41  ;;  %10848 = vst [vmem:[#allocation25_spill] sm:$0xff] %v10276_v52 }
 0x34a   : > { %v7587_v22 = vpop.f32.mrf.mxu1 }
 0x34b   : > { %10847 = vst [vmem:[#allocation24_spill] sm:$0xff] %v10274_v58  ;;  %v10279_v59 = vadd.f32 %v10128_v60, %v4465_v54  ;;  %v4944_v43 = vadd.f32 %v7587_v22, %v10142_v7 }
 0x34c   : > { %v4824_v23 = vpop.f32.mrf.mxu1  ;;  %v7791_v45 = vpop.f32.mrf.mxu0 }
 0x34d   : > { %10849 = vst [vmem:[#allocation29_spill] sm:$0xff] %v10279_v59 }
 0x34e   : > { %v7590_v0 = vpop.f32.mrf.mxu1  ;;  %v5574_v14 = vpop.f32.mrf.mxu0 }
 0x350   : > { %v4834_v3 = vpop.f32.mrf.mxu1  ;;  %v7794_v62 = vpop.f32.mrf.mxu0 }
 0x352   : > { %v7593_v10 = vpop.f32.mrf.mxu1  ;;  %v10281_v56 = vpop.f32.mrf.mxu0 }
 0x354   : > { %v4844_v47 = vpop.f32.mrf.mxu1  ;;  %v10287_v13 = vpop.f32.mrf.mxu0 }
 0x356   : > { %v7596_v40 = vpop.f32.mrf.mxu1  ;;  %v10293_v52 = vpop.f32.mrf.mxu0 }
 0x358   : > { %v4854_v18 = vpop.f32.mrf.mxu1  ;;  %v10299_v25 = vpop.f32.mrf.mxu0 }
 0x35a   : > { %v10283_v36 = vpop.f32.mrf.mxu1  ;;  %v10305_v39 = vpop.f32.mrf.mxu0 }
 0x35c   : > { %v10285_v41 = vpop.f32.mrf.mxu1  ;;  %v10311_v27 = vpop.f32.mrf.mxu0 }
 0x35e   : > { %v10289_v60 = vpop.f32.mrf.mxu1  ;;  %v10317_v26 = vpop.f32.mrf.mxu0 }
 0x360   : > { %v10291_v54 = vpop.f32.mrf.mxu1  ;;  %v10324_v35 = vpop.f32.mrf.mxu0 }
 0x362   : > { %v10295_v29 = vpop.f32.mrf.mxu1 }
 0x364   : > { %v10297_v59 = vpop.f32.mrf.mxu1 }
 0x366   : > { %v10301_v11 = vpop.f32.mrf.mxu1 }
 0x368   : > { %v10303_v58 = vpop.f32.mrf.mxu1 }
 0x369   : > { %10850 = vst [vmem:[#allocation26_spill] sm:$0xff] %v10303_v58  ;;  %v10333_v58 = vpop.f32.mrf.mxu0 }
 0x36a   : > { %v10307_v34 = vpop.f32.mrf.mxu1 }
 0x36b   : > { %10851 = vst [vmem:[#allocation28_spill] sm:$0xff] %v10307_v34 }
 0x36c   : > { %v10309_v61 = vpop.f32.mrf.mxu1 }
 0x36d   : > { %10852 = vst [vmem:[#allocation31_spill] sm:$0xff] %v10309_v61  ;;  %v4943_v61 = vadd.f32 %v4824_v23, %v10148_v30  ;;  %v10341_v30 = vld [vmem:[%s10565_s5] ss:$0 sm:$0xff] }
 0x36e   : > { %v10313_v24 = vpop.f32.mrf.mxu1 }
 0x36f   : > { %10853 = vst [vmem:[#allocation33_spill] sm:$0xff] %v10313_v24  ;;  %v4946_v24 = vadd.f32 %v7590_v0, %v10154_v37  ;;  %v5193_v22 = vadd.f32 %v10144_v51, %v4943_v61  ;;  %v10353_v51 = vld [vmem:[%s10566_s6] ss:$0 sm:$0xff] }
 0x370   : > { %v10315_v16 = vpop.f32.mrf.mxu1 }
 0x371   : > { %10854 = vst [vmem:[#allocation34_spill] sm:$0xff] %v10315_v16  ;;  %v5194_v16 = vadd.f32 %v10138_v15, %v4944_v43  ;;  %v5196_v0 = vadd.f32 %v10150_v42, %v4946_v24  ;;  %v4948_v15 = vadd.f32 %v7593_v10, %v10166_v33  ;;  %v4947_v43 = vadd.f32 %v4844_v47, %v10172_v4 }
 0x372   : > { %v10319_v32 = vpop.f32.mrf.mxu1  ;;  %v4950_v33 = vadd.f32 %v7596_v40, %v10178_v6  ;;  %v4949_v47 = vadd.f32 %v4854_v18, %v10184_v12 }
 0x373   : > { %10855 = vst [vmem:[#allocation30_spill] sm:$0xff] %v10319_v32 }
 0x374   : > { %v10321_v55 = vpop.f32.mrf.mxu1  ;;  %v5200_v12 = vadd.f32 %v10174_v31, %v4950_v33 }
 0x375   : > { %10856 = vst [vmem:[#allocation36_spill] sm:$0xff] %v10321_v55  ;;  %v4945_v55 = vadd.f32 %v4834_v3, %v10160_v17 }
 0x376   : > { %v10326_v34 = vpop.f32.mrf.mxu1 }
 0x377   : > { %10857 = vst [vmem:[#allocation32_spill] sm:$0xff] %v10326_v34  ;;  %v10346_v34 = vpop.f32.mrf.mxu0  ;;  %v5195_v42 = vadd.f32 %v10156_v8, %v4945_v55 }
 0x378   : > { %v10329_v49 = vpop.f32.mrf.mxu1 }
 0x379   : > { %10858 = vst [vmem:[#allocation38_spill] sm:$0xff] %v10329_v49 }
 0x37a   : > { %v7723_v32 = vpop.f32.mrf.mxu1 }
 0x37b   : > { %v5444_v7 = vadd.f32 %v7723_v32, %v5194_v16 }
 0x37c   : > { %v5324_v23 = vpop.f32.mrf.mxu1 }
 0x37d   : > { %v5694_v49 = vadd.f32 %v7791_v45, %v5444_v7  ;;  %v5443_v37 = vadd.f32 %v5324_v23, %v5193_v22  ;;  %v10361_v7 = vpop.f32.mrf.mxu0  ;;  %v5198_v22 = vadd.f32 %v10162_v19, %v4948_v15  ;;  %v5199_v15 = vadd.f32 %v10180_v63, %v4949_v47 }
 0x37e   : > { %v7726_v17 = vpop.f32.mrf.mxu1 }
 0x37f   : > { %v5724_v32 = vmul.f32 %v10341_v30, %v5694_v49  ;;  %v5693_v16 = vadd.f32 %v5574_v14, %v5443_v37  ;;  %v5446_v61 = vadd.f32 %v7726_v17, %v5196_v0  ;;  %v5197_v14 = vadd.f32 %v10168_v20, %v4947_v43 }
 0x380   : > { %v5334_v24 = vpop.f32.mrf.mxu1 }
 0x381   : > { %v5754_v4 = vadd.f32 %v10353_v51, %v5724_v32  ;;  %v5723_v45 = vmul.f32 %v10341_v30, %v5693_v16  ;;  %v5696_v3 = vadd.f32 %v7794_v62, %v5446_v61  ;;  %v5445_v10 = vadd.f32 %v5334_v24, %v5195_v42 }
 0x382   : > { %v7729_v49 = vpop.f32.mrf.mxu1  ;;  %v4952_v62 = vadd.f32 %v10283_v36, %v10190_v46  ;;  %v4951_v16 = vadd.f32 %v10285_v41, %v10196_v5  ;;  %v4954_v61 = vadd.f32 %v10289_v60, %v10202_v57 }
 0x383   : > { %v5778_v23 = vmax.f32 %v5754_v4, 0.0  ;;  %v5753_v8 = vadd.f32 %v10353_v51, %v5723_v45  ;;  %v5726_v6 = vmul.f32 %v10341_v30, %v5696_v3  ;;  %v5695_v55 = vadd.f32 %v10281_v56, %v5445_v10  ;;  %v10376_v56 = vpop.f32.mrf.mxu0 }
 0x384   : > { %v5448_v40 = vadd.f32 %v7729_v49, %v5198_v22  ;;  %v5344_v37 = vpop.f32.mrf.mxu1  ;;  %v5202_v33 = vadd.f32 %v10186_v44, %v4952_v62  ;;  %v4953_v45 = vadd.f32 %v10291_v54, %v10208_v53  ;;  %v5201_v53 = vadd.f32 %v10192_v9, %v4951_v16  ;;  %v10862_v16 = vld [vmem:[#allocation28_spill] sm:$0xff] }
 0x385   : > { %5802 = vst [vmem:[%s10371_s13 + $0x8] sm:$0xff] %v5778_v23  ;;  %v5777_v19 = vmax.f32 %v5753_v8, 0.0  ;;  %v5756_v20 = vadd.f32 %v10353_v51, %v5726_v6  ;;  %v5725_v18 = vmul.f32 %v10341_v30, %v5695_v55  ;;  %v5447_v0 = vadd.f32 %v5344_v37, %v5197_v14  ;;  %v10394_v3 = vpop.f32.mrf.mxu0 }
 0x386   : > { %v5698_v46 = vadd.f32 %v10287_v13, %v5448_v40  ;;  %v7732_v36 = vpop.f32.mrf.mxu1  ;;  %v5204_v22 = vadd.f32 %v10198_v38, %v4954_v61  ;;  %v5203_v9 = vadd.f32 %v10204_v28, %v4953_v45  ;;  %v10865_v45 = vld [vmem:[#allocation10_spill] sm:$0xff] }
 0x387   : > { %5801 = vst [vmem:[%s10371_s13] sm:$0xff] %v5777_v19  ;;  %v5780_v31 = vmax.f32 %v5756_v20, 0.0  ;;  %v5755_v43 = vadd.f32 %v10353_v51, %v5725_v18  ;;  %v5697_v17 = vadd.f32 %v10293_v52, %v5447_v0  ;;  %v5450_v32 = vadd.f32 %v7732_v36, %v5200_v12  ;;  %v10410_v6 = vpop.f32.mrf.mxu0  ;;  %v10859_v18 = vld [vmem:[#allocation26_spill] sm:$0xff] }
 0x388   : > { %v5728_v42 = vmul.f32 %v10341_v30, %v5698_v46  ;;  %v5354_v13 = vpop.f32.mrf.mxu1  ;;  %v4958_v20 = vadd.f32 %v10301_v11, %v10228_v1  ;;  %v4957_v0 = vadd.f32 %v10859_v18, %v10231_v48 }
 0x389   : > { %5804 = vst [vmem:[%s10371_s13 + $0x18] sm:$0xff] %v5780_v31  ;;  %v5779_v63 = vmax.f32 %v5755_v43, 0.0  ;;  %v5727_v24 = vmul.f32 %v10341_v30, %v5697_v17  ;;  %v5700_v4 = vadd.f32 %v10299_v25, %v5450_v32  ;;  %v5449_v52 = vadd.f32 %v5354_v13, %v5199_v15  ;;  %v10426_v46 = vpop.f32.mrf.mxu0  ;;  %v10861_v32 = vld [vmem:[#allocation14_spill] sm:$0xff] }
 0x38a   : > { %v5758_v5 = vadd.f32 %v10353_v51, %v5728_v42  ;;  %v7735_v57 = vpop.f32.mrf.mxu1  ;;  %v4956_v25 = vadd.f32 %v10295_v29, %v10214_v50  ;;  %v4960_v1 = vadd.f32 %v10862_v16, %v10861_v32 }
 0x38b   : > { %5803 = vst [vmem:[%s10371_s13 + $0x10] sm:$0xff] %v5779_v63  ;;  %v5757_v41 = vadd.f32 %v10353_v51, %v5727_v24  ;;  %v5730_v44 = vmul.f32 %v10341_v30, %v5700_v4  ;;  %v5699_v60 = vadd.f32 %v10305_v39, %v5449_v52  ;;  %v5452_v10 = vadd.f32 %v7735_v57, %v5202_v33  ;;  %v10863_v63 = vld [vmem:[#allocation15_spill] sm:$0xff]  ;;  %v7818_v4 = vpop.f32.mrf.mxu0 }
 0x38c   : > { %v5782_v47 = vmax.f32 %v5758_v5, 0.0  ;;  %v5364_v54 = vpop.f32.mrf.mxu1  ;;  %v4955_v39 = vadd.f32 %v10297_v59, %v10219_v2  ;;  %v5206_v2 = vadd.f32 %v10210_v21, %v4956_v25  ;;  %v10860_v21 = vld [vmem:[#allocation9_spill] sm:$0xff]  ;;  %v10864_v24 = vld [vmem:[#allocation31_spill] sm:$0xff]  ;;  %v5208_v5 = vadd.f32 %v10865_v45, %v4958_v20  ;;  %v10874_v20 = vld [vmem:[#allocation30_spill] sm:$0xff] }
 0x38d   : > { %v5781_v49 = vmax.f32 %v5757_v41, 0.0  ;;  %v5760_v14 = vadd.f32 %v10353_v51, %v5730_v44  ;;  %v5729_v23 = vmul.f32 %v10341_v30, %v5699_v60  ;;  %v5702_v8 = vadd.f32 %v10311_v27, %v5452_v10  ;;  %v10866_v41 = vld [vmem:[#allocation11_spill] sm:$0xff]  ;;  %v10881_v45 = vld [vmem:[#allocation20_spill] sm:$0xff] }
 0x38e   : > { %5806 = vst [vmem:[%s10371_s13 + $0x28] sm:$0xff] %v5782_v47  ;;  %v5451_v50 = vadd.f32 %v5364_v54, %v5201_v53  ;;  %v7738_v29 = vpop.f32.mrf.mxu1  ;;  %v5205_v15 = vadd.f32 %v10860_v21, %v4955_v39  ;;  %v5207_v44 = vadd.f32 %v10866_v41, %v4957_v0  ;;  %v10867_v47 = vld [vmem:[#allocation16_spill] sm:$0xff]  ;;  %v10868_v53 = vld [vmem:[#allocation33_spill] sm:$0xff] }
 0x38f   : > { %5805 = vst [vmem:[%s10371_s13 + $0x20] sm:$0xff] %v5781_v49  ;;  %v5784_v38 = vmax.f32 %v5760_v14, 0.0  ;;  %v5759_v55 = vadd.f32 %v10353_v51, %v5729_v23  ;;  %v5732_v62 = vmul.f32 %v10341_v30, %v5702_v8  ;;  %v5454_v40 = vadd.f32 %v7738_v29, %v5204_v22  ;;  %v10869_v14 = vld [vmem:[#allocation13_spill] sm:$0xff] }
 0x390   : > { %v5701_v27 = vadd.f32 %v10317_v26, %v5451_v50  ;;  %v5374_v37 = vpop.f32.mrf.mxu1  ;;  %v4962_v54 = vadd.f32 %v10868_v53, %v10867_v47  ;;  %v5210_v23 = vadd.f32 %v10869_v14, %v4960_v1 }
 0x391   : > { %5808 = vst [vmem:[%s10371_s13 + $0x38] sm:$0xff] %v5784_v38  ;;  %v5783_v59 = vmax.f32 %v5759_v55, 0.0  ;;  %v5762_v12 = vadd.f32 %v10353_v51, %v5732_v62  ;;  %v5704_v19 = vadd.f32 %v10324_v35, %v5454_v40  ;;  %v5453_v28 = vadd.f32 %v5374_v37, %v5203_v9  ;;  %v5664_v9 = vpop.f32.mrf.mxu0  ;;  %v10870_v55 = vld [vmem:[#allocation12_spill] sm:$0xff] }
 0x392   : > { %v5731_v26 = vmul.f32 %v10341_v30, %v5701_v27  ;;  %v7741_v36 = vpop.f32.mrf.mxu1 }
 0x393   : > { %5807 = vst [vmem:[%s10371_s13 + $0x30] sm:$0xff] %v5783_v59  ;;  %v5786_v31 = vmax.f32 %v5762_v12, 0.0  ;;  %v5734_v43 = vmul.f32 %v10341_v30, %v5704_v19  ;;  %v5703_v35 = vadd.f32 %v10333_v58, %v5453_v28  ;;  %v5456_v17 = vadd.f32 %v7741_v36, %v5206_v2  ;;  %v10871_v59 = vld [vmem:[#allocation19_spill] sm:$0xff]  ;;  %v10872_v12 = vld [vmem:[#allocation34_spill] sm:$0xff] }
 0x394   : > { %v5761_v11 = vadd.f32 %v10353_v51, %v5731_v26  ;;  %v5384_v48 = vpop.f32.mrf.mxu1  ;;  %v4959_v58 = vadd.f32 %v10864_v24, %v10863_v63  ;;  %v4961_v19 = vadd.f32 %v10872_v12, %v10871_v59  ;;  %v10873_v28 = vld [vmem:[#allocation22_spill] sm:$0xff]  ;;  %v10875_v26 = vld [vmem:[#allocation17_spill] sm:$0xff] }
 0x395   : > { %5810 = vst [vmem:[%s10371_s13 + $0x48] sm:$0xff] %v5786_v31  ;;  %v5764_v61 = vadd.f32 %v10353_v51, %v5734_v43  ;;  %v5733_v42 = vmul.f32 %v10341_v30, %v5703_v35  ;;  %v5706_v13 = vadd.f32 %v10346_v34, %v5456_v17  ;;  %v5455_v33 = vadd.f32 %v5384_v48, %v5205_v15  ;;  %v7821_v43 = vpop.f32.mrf.mxu0  ;;  %v10876_v35 = vld [vmem:[#allocation27_spill] sm:$0xff]  ;;  %v10877_v17 = vld [vmem:[#allocation36_spill] sm:$0xff]  ;;  %v10880_v24 = vld [vmem:[#allocation18_spill] sm:$0xff] }
 0x396   : > { %v5785_v52 = vmax.f32 %v5761_v11, 0.0  ;;  %v7744_v57 = vpop.f32.mrf.mxu1  ;;  %v5209_v62 = vadd.f32 %v10870_v55, %v4959_v58  ;;  %v4964_v18 = vadd.f32 %v10874_v20, %v10873_v28  ;;  %v5212_v36 = vadd.f32 %v10875_v26, %v4962_v54  ;;  %v10884_v54 = vld [vmem:[#allocation21_spill] sm:$0xff] }
 0x397   : > { %v5788_v60 = vmax.f32 %v5764_v61, 0.0  ;;  %v5763_v10 = vadd.f32 %v10353_v51, %v5733_v42  ;;  %v5736_v25 = vmul.f32 %v10341_v30, %v5706_v13  ;;  %v5705_v34 = vadd.f32 %v10361_v7, %v5455_v33  ;;  %v10878_v13 = vld [vmem:[#allocation24_spill] sm:$0xff] }
 0x398   : > { %5809 = vst [vmem:[%s10371_s13 + $0x40] sm:$0xff] %v5785_v52  ;;  %v5458_v22 = vadd.f32 %v7744_v57, %v5208_v5  ;;  %v5394_v49 = vpop.f32.mrf.mxu1  ;;  %v4963_v32 = vadd.f32 %v10877_v17, %v10876_v35  ;;  %v10879_v33 = vld [vmem:[#allocation32_spill] sm:$0xff]  ;;  %v5211_v58 = vadd.f32 %v10880_v24, %v4961_v19  ;;  %v5214_v5 = vadd.f32 %v10881_v45, %v4964_v18 }
 0x399   : > { %5812 = vst [vmem:[%s10371_s13 + $0x58] sm:$0xff] %v5788_v60  ;;  %v5787_v8 = vmax.f32 %v5763_v10, 0.0  ;;  %v5766_v39 = vadd.f32 %v10353_v51, %v5736_v25  ;;  %v5735_v50 = vmul.f32 %v10341_v30, %v5705_v34  ;;  %v5457_v29 = vadd.f32 %v5394_v49, %v5207_v44  ;;  %v5674_v10 = vpop.f32.mrf.mxu0  ;;  %v10883_v25 = vld [vmem:[#allocation38_spill] sm:$0xff] }
 0x39a   : > { %v5708_v38 = vadd.f32 %v10376_v56, %v5458_v22  ;;  %v7747_v7 = vpop.f32.mrf.mxu1  ;;  %v5213_v22 = vadd.f32 %v10884_v54, %v4963_v32 }
 0x39b   : > { %5811 = vst [vmem:[%s10371_s13 + $0x50] sm:$0xff] %v5787_v8  ;;  %v5790_v40 = vmax.f32 %v5766_v39, 0.0  ;;  %v5765_v27 = vadd.f32 %v10353_v51, %v5735_v50  ;;  %v5707_v37 = vadd.f32 %v10394_v3, %v5457_v29  ;;  %v5460_v2 = vadd.f32 %v7747_v7, %v5210_v23 }
 0x39c   : > { %v5738_v0 = vmul.f32 %v10341_v30, %v5708_v38  ;;  %v5404_v56 = vpop.f32.mrf.mxu1 }
 0x39d   : > { %5814 = vst [vmem:[%s10371_s13 + $0x68] sm:$0xff] %v5790_v40  ;;  %v5789_v21 = vmax.f32 %v5765_v27, 0.0  ;;  %v5737_v15 = vmul.f32 %v10341_v30, %v5707_v37  ;;  %v5710_v31 = vadd.f32 %v10410_v6, %v5460_v2  ;;  %v5459_v3 = vadd.f32 %v5404_v56, %v5209_v62  ;;  %v7824_v40 = vpop.f32.mrf.mxu0  ;;  %v10886_v2 = vld [vmem:[#allocation25_spill] sm:$0xff] }
 0x39e   : > { %v5768_v16 = vadd.f32 %v10353_v51, %v5738_v0  ;;  %v7750_v1 = vpop.f32.mrf.mxu1  ;;  %v4966_v6 = vadd.f32 %v10879_v33, %v10878_v13 }
 0x39f   : > { %5813 = vst [vmem:[%s10371_s13 + $0x60] sm:$0xff] %v5789_v21  ;;  %v5767_v11 = vadd.f32 %v10353_v51, %v5737_v15  ;;  %v5740_v48 = vmul.f32 %v10341_v30, %v5710_v31  ;;  %v5709_v61 = vadd.f32 %v10426_v46, %v5459_v3  ;;  %v5462_v42 = vadd.f32 %v7750_v1, %v5212_v36  ;;  %v10882_v46 = vld [vmem:[#allocation29_spill] sm:$0xff]  ;;  %v5684_v21 = vpop.f32.mrf.mxu0 }
 0x3a0   : > { %v5792_v63 = vmax.f32 %v5768_v16, 0.0  ;;  %v5414_v52 = vpop.f32.mrf.mxu1  ;;  %v4965_v34 = vadd.f32 %v10883_v25, %v10882_v46 }
 0x3a1   : > { %v5791_v57 = vmax.f32 %v5767_v11, 0.0  ;;  %v5770_v41 = vadd.f32 %v10353_v51, %v5740_v48  ;;  %v5739_v44 = vmul.f32 %v10341_v30, %v5709_v61  ;;  %v5712_v60 = vadd.f32 %v7818_v4, %v5462_v42  ;;  %v10885_v4 = vld [vmem:[#allocation23_spill] sm:$0xff] }
 0x3a2   : > { %5816 = vst [vmem:[%s10371_s13 + $0x78] sm:$0xff] %v5792_v63  ;;  %v5461_v47 = vadd.f32 %v5414_v52, %v5211_v58  ;;  %v7753_v53 = vpop.f32.mrf.mxu1  ;;  %v5216_v29 = vadd.f32 %v10885_v4, %v4966_v6  ;;  %v5215_v59 = vadd.f32 %v10886_v2, %v4965_v34 }
 0x3a3   : > { %5815 = vst [vmem:[%s10371_s13 + $0x70] sm:$0xff] %v5791_v57  ;;  %v5794_v49 = vmax.f32 %v5770_v41, 0.0  ;;  %v5769_v14 = vadd.f32 %v10353_v51, %v5739_v44  ;;  %v5742_v23 = vmul.f32 %v10341_v30, %v5712_v60  ;;  %v5464_v8 = vadd.f32 %v7753_v53, %v5214_v5 }
 0x3a4   : > { %v5711_v39 = vadd.f32 %v5664_v9, %v5461_v47  ;;  %v5424_v50 = vpop.f32.mrf.mxu1 }
 0x3a5   : > { %5818 = vst [vmem:[%s10371_s13 + $0x88] sm:$0xff] %v5794_v49  ;;  %v5793_v38 = vmax.f32 %v5769_v14, 0.0  ;;  %v5772_v7 = vadd.f32 %v10353_v51, %v5742_v23  ;;  %v5714_v55 = vadd.f32 %v7821_v43, %v5464_v8  ;;  %v5463_v62 = vadd.f32 %v5424_v50, %v5213_v22 }
 0x3a6   : > { %v5741_v27 = vmul.f32 %v10341_v30, %v5711_v39  ;;  %v7756_v37 = vpop.f32.mrf.mxu1 }
 0x3a7   : > { %5817 = vst [vmem:[%s10371_s13 + $0x80] sm:$0xff] %v5793_v38  ;;  %v5796_v12 = vmax.f32 %v5772_v7, 0.0  ;;  %v5744_v9 = vmul.f32 %v10341_v30, %v5714_v55  ;;  %v5713_v19 = vadd.f32 %v5674_v10, %v5463_v62  ;;  %v5466_v28 = vadd.f32 %v7756_v37, %v5216_v29 }
 0x3a8   : > { %v5771_v20 = vadd.f32 %v10353_v51, %v5741_v27  ;;  %v5434_v18 = vpop.f32.mrf.mxu1 }
 0x3a9   : > { %5820 = vst [vmem:[%s10371_s13 + $0x98] sm:$0xff] %v5796_v12  ;;  %v5774_v0 = vadd.f32 %v10353_v51, %v5744_v9  ;;  %v5743_v56 = vmul.f32 %v10341_v30, %v5713_v19  ;;  %v5716_v26 = vadd.f32 %v7824_v40, %v5466_v28  ;;  %v5465_v36 = vadd.f32 %v5434_v18, %v5215_v59 }
 0x3aa   : > { %v5795_v15 = vmax.f32 %v5771_v20, 0.0 }
 0x3ab   : > { %v5798_v31 = vmax.f32 %v5774_v0, 0.0  ;;  %v5773_v3 = vadd.f32 %v10353_v51, %v5743_v56  ;;  %v5746_v43 = vmul.f32 %v10341_v30, %v5716_v26  ;;  %v5715_v35 = vadd.f32 %v5684_v21, %v5465_v36 }
 0x3ac   : > { %5819 = vst [vmem:[%s10371_s13 + $0x90] sm:$0xff] %v5795_v15 }
 0x3ad   : > { %5822 = vst [vmem:[%s10371_s13 + $0xa8] sm:$0xff] %v5798_v31  ;;  %v5797_v17 = vmax.f32 %v5773_v3, 0.0  ;;  %v5776_v32 = vadd.f32 %v10353_v51, %v5746_v43  ;;  %v5745_v16 = vmul.f32 %v10341_v30, %v5715_v35 }
 0x3af   : > { %5821 = vst [vmem:[%s10371_s13 + $0xa0] sm:$0xff] %v5797_v17  ;;  %v5800_v1 = vmax.f32 %v5776_v32, 0.0  ;;  %v5775_v11 = vadd.f32 %v10353_v51, %v5745_v16 }
 0x3b1   : > { %5824 = vst [vmem:[%s10371_s13 + $0xb8] sm:$0xff] %v5800_v1  ;;  %v5799_v48 = vmax.f32 %v5775_v11, 0.0 }
 0x3b3   : > { %5823 = vst [vmem:[%s10371_s13 + $0xb0] sm:$0xff] %v5799_v48 }
 0x3b4   : > { %7924 = shalt.err (!%p7921_p0)
}
 0x3b5   : > { %s7925_s20 = scalar_lea.hbm %s10515_s17, 3072  ;;  %s7929_s9 = scalar_lea.hbm %s10567_s7, 6144 }
 0x3b6   : > { %p7926_p1 = scmp.ne.s32.totalorder %s10515_s17, %s7925_s20  ;;  %p7930_p4 = scmp.lt.s32.totalorder %s10515_s17, %s10567_s7 }
 0x3b7   : > { %p7931_p7 = scmp.lt.s32.totalorder %s7929_s9, %s7925_s20 }
 0x3b8   : > { %p7927_p2 = pnand %p7926_p1, %p8062_p5 }
 0x3b9   : > { %p7932_p8 = por %p7931_p7, %p7930_p4 }
 0x3ba   : > { %p7928_p3 = pneg %p7927_p2 }
 0x3bc   : > { %p7933_p6 = pnand %p7932_p8, %p7928_p3 }
 0x3be   : > { %7936 = shalt.err (!%p7933_p6)
}
 0x3bf   : > { %s7982_s16 = smov 128   ;;  %s7983_s8 = smov 8  }
 0x3c0   : > { %7834 = dma.vmem_to_hbm [thread:$0]  (%p8062_p5), %s10509_s15, 3072, %s10515_s17, %s10520_s28, %s7982_s16, %s7982_s16, %s7983_s8  }
 0x3c1 PF: > { %p7846_p9 = scmp.ge.s32.totalorder %s7975_s27, 2  ;;  %s5854_s18 = sand.u32 1, %s7963_s24  }
 0x3c2   : > { %p10887_p10 = scmp.ne.s32.totalorder %s10600_s12, 0  ;;  %s5855_s19 = scalar_lea.sflag [#allocation5], %s5854_s18 }
 0x3c4   : > { %p7841_p11 = pnand %p7846_p9, %p10887_p10 }
 0x3c6   : > { %p7842_p12 = pneg %p7841_p11 }
 0x3c8   : > { %7958 = dma.done.wait (%p7842_p12), %s5855_s19, 3072  }
 0x3c9   : > { %7960 = vsyncadd (%p7842_p12), %s5855_s19, 4294964224  ;;  %p18_p13 = scmp.ge.s32.totalorder %s8049_s30, 4   ;;  %s10888_s24 = smov %s7967_s25 }
 0x3ca   : > { %s10889_s25 = smov %s7971_s26  ;;  %s10890_s26 = smov %s8060_s10 }
 0x3cb   : > { %s10891_s27 = smov %s8049_s30  ;;  %20 = sbr.rel (!%p18_p13) target bundleno = 4 (0x4), region = 104 }
 0x3d0   :  { %5860 = vsyncpa [#allocation4], 1 }
 0x3d1   :  { %5862 = vsyncpa [#allocation4 + $0x1], 1 }
 0x3d2   :  { %5863 = vsyncpa [#allocation5], 1 }
 0x3d3   :  { %5865 = vsyncpa [#allocation5 + $0x1], 1 }

</bundles_post_ra>
